<compile_context>
chip_gen: v6e
topology: v6e:2x2x1
jax: 0.10.0
libtpu: 0.0.40
codegen_flags: <defaults>
</compile_context>

<pallas_src>
import functools
import math

import jax
import jax.numpy as jnp
from jax.experimental import pallas as pl
from jax.experimental.pallas import tpu as pltpu

LANES = 128   # lane-dense width of the final output slab
B_PAD = 8     # sublane-padded graph/batch dimension for the pooling head
NEG = -1e30


def _dot_nt(a, b):
    # a: [M, K], b: [N, K] -> [M, N]  (contract last dims, no explicit transpose)
    return jax.lax.dot_general(
        a, b, (((1,), (1,)), ((), ())), preferred_element_type=jnp.float32)


def _transformer_conv(x_in, wcat_ref, bcat_ref, we_ref, ea, addmask, has_edge,
                      *, heads, out_ch):
    """TransformerConv (concat=True, root_weight=True, edge_dim=4).

    x_in:     [N, Fin] f32 value
    wcat_ref: [Fin, 4*H*C] (wq | wk | wv | wskip), bcat_ref: [1, 4*H*C]
    we_ref:   [4, H*C]     (lin_edge, no bias)
    ea:       [4, N, N] f32 dense edge attrs (channel-major)
    addmask:  [N, N] f32 additive mask (0 where edge, -1e30 otherwise)
    has_edge: [N, 1] f32 (1 if node has >= 1 incoming edge, else 0)
    """
    H, C = heads, out_ch
    D = H * C
    edge_dim = ea.shape[0]
    scale = jnp.float32(1.0 / math.sqrt(C))
    we = we_ref[...]                                   # [4, D]

    # Fused q/k/v/skip projection: one MXU matmul.
    qkvs = (jnp.dot(x_in, wcat_ref[...], preferred_element_type=jnp.float32)
            + bcat_ref[...])                           # [N, 4*D]
    q = qkvs[:, 0 * D:1 * D] * scale                   # fold 1/sqrt(C) once (not per head)
    k = qkvs[:, 1 * D:2 * D]
    v = qkvs[:, 2 * D:3 * D]
    skip = qkvs[:, 3 * D:4 * D]

    head_outs = []
    for h in range(H):                                 # small static head count -> unrolled
        sl = slice(h * C, (h + 1) * C)
        q_h, k_h, v_h, we_h = q[:, sl], k[:, sl], v[:, sl], we[:, sl]

        # scores_ij = q_i . (k_j + e_ij @ we_h) / sqrt(C) + mask    (mask is additive only)
        qe_h = _dot_nt(q_h, we_h)                      # [N, 4] tiny MXU matmul
        scores = (_dot_nt(q_h, k_h)                    # [N, N] MXU
                  + sum(qe_h[:, d:d + 1] * ea[d] for d in range(edge_dim))
                  + addmask)

        # softmax over incoming edges (masked entries underflow to exactly 0)
        m = jnp.max(scores, axis=-1, keepdims=True)
        e = jnp.exp(scores - m)
        denom = jnp.sum(e, axis=-1, keepdims=True)
        # NOTE: approx reciprocal (EUP slot) -> rows sum to 1 within ~1e-3 (deliberate).
        alpha = e * pl.reciprocal(jnp.maximum(denom, jnp.float32(1e-20)), approx=True)

        # out_i = sum_j alpha_ij (v_j + e_ij @ we_h)
        out_h = jnp.dot(alpha, v_h, preferred_element_type=jnp.float32)   # MXU
        # single fused multiply + reduce over the stacked edge channels
        agg = jnp.sum(ea * alpha[None], axis=-1, keepdims=True)           # [4, N, 1]
        out_h = out_h + sum(agg[d] * we_h[d:d + 1, :] for d in range(edge_dim))
        head_outs.append(out_h)

    attn = head_outs[0] if H == 1 else jnp.concatenate(head_outs, axis=1)
    # zero-in-degree rows get zero aggregation (PyG scatter-softmax semantics),
    # applied once on [N, D] instead of an [N, N] `* adj` pass per head.
    return attn * has_edge + skip


def _batchnorm(y, g_ref, b_ref):
    mean = jnp.mean(y, axis=0, keepdims=True)
    var = jnp.mean(jnp.square(y - mean), axis=0, keepdims=True)
    return (y - mean) * jax.lax.rsqrt(var + 1e-5) * g_ref[...] + b_ref[...]


def _net_kernel(x_ref, adj_ref, ea_ref, oh_ref,
                wc1_ref, bc1_ref, we1_ref, g1_ref, bb1_ref,
                wc2_ref, bc2_ref, we2_ref, g2_ref, bb2_ref,
                w1a_ref, w1m_ref, w1e_ref, b1_ref, w2_ref, b2_ref, pa_ref,
                o_ref, *, heads1, num_graphs):
    x = x_ref[...]                                          # [N, Fin] f32

    # graph structure shared by both conv layers (bf16 storage -> f32 once)
    adj = adj_ref[...].astype(jnp.float32)                  # [N, N]
    ea = ea_ref[...].astype(jnp.float32)                    # [4, N, N]
    addmask = jnp.where(adj > 0.0, jnp.float32(0.0), jnp.float32(NEG))
    has_edge = (jnp.max(addmask, axis=-1, keepdims=True) == 0.0).astype(jnp.float32)

    d1 = we1_ref.shape[1]
    d2 = we2_ref.shape[1]

    # ---- layer 1: TransformerConv(heads=4) + BN + concat([y1, x]) ----
    y1 = _transformer_conv(x, wc1_ref, bc1_ref, we1_ref, ea, addmask, has_edge,
                           heads=heads1, out_ch=d1 // heads1)
    y1 = _batchnorm(y1, g1_ref, bb1_ref)
    x1 = jnp.concatenate([y1, x], axis=1)                   # [N, F1]

    # ---- layer 2: TransformerConv(heads=1) + BN + concat([y2, x1]) ----
    y2 = _transformer_conv(x1, wc2_ref, bc2_ref, we2_ref, ea, addmask, has_edge,
                           heads=1, out_ch=d2)
    y2 = _batchnorm(y2, g2_ref, bb2_ref)
    x2 = jnp.concatenate([y2, x1], axis=1)                  # [N, F2]

    # ---- global add / mean / max pooling (batch dim padded to B_PAD sublanes) ----
    oh = oh_ref[...]                                        # [B_PAD, N]
    s = jnp.dot(oh, x2, preferred_element_type=jnp.float32)   # add-pool (MXU)
    cnt = jnp.sum(oh, axis=1, keepdims=True)                  # [B_PAD, 1]
    mean = s * pl.reciprocal(jnp.maximum(cnt, jnp.float32(1.0)), approx=True)

    f2 = x2.shape[1]
    ohc = oh[:, :, None]                                    # [B_PAD, N, 1]
    maxes = [jnp.max(jnp.where(ohc[b] > 0.0, x2, jnp.float32(NEG)),
                     axis=0, keepdims=True)
             for b in range(num_graphs)]                    # masked per-graph reduce
    if num_graphs < oh.shape[0]:
        maxes.append(jnp.zeros((oh.shape[0] - num_graphs, f2), jnp.float32))
    mx = jnp.concatenate(maxes, axis=0)                     # [B_PAD, F2]

    # ---- MLP head: Linear -> Dropout(p=0) -> PReLU -> Linear -> log_softmax ----
    # w1 pre-split into add/max/mean row blocks (no [B, 3F] lane concat);
    # w2/b2 pre-padded to 128 lanes with -1e30 bias on the pad columns.
    h = (jnp.dot(s, w1a_ref[...], preferred_element_type=jnp.float32)
         + jnp.dot(mx, w1m_ref[...], preferred_element_type=jnp.float32)
         + jnp.dot(mean, w1e_ref[...], preferred_element_type=jnp.float32)
         + b1_ref[...])
    a = pa_ref[0, 0]                                        # PReLU shared alpha (SMEM scalar)
    h = jnp.where(h > 0.0, h, a * h)
    logits = jnp.dot(h, w2_ref[...], preferred_element_type=jnp.float32) + b2_ref[...]
    m = jnp.max(logits, axis=-1, keepdims=True)
    z = logits - m
    o_ref[...] = z - jnp.log(jnp.sum(jnp.exp(z), axis=-1, keepdims=True))


def net_forward(params, x, adj, eattr4, onehot_pad, *, heads, num_graphs, num_classes):
    n, fin = x.shape
    d1 = params["we1"].shape[1]
    d2 = params["we2"].shape[1]
    f1 = d1 + fin
    f2 = f1 + d2
    bpad = onehot_pad.shape[0]
    nh = params["b1h"].shape[1]

    flops = (2 * n * fin * 4 * d1 + 2 * n * f1 * 4 * d2
             + heads * (4 * n * n * (d1 // heads) + 16 * n * n)
             + (4 * n * n * d2 + 16 * n * n)
             + 2 * bpad * n * f2 + 6 * bpad * f2 * nh + 2 * bpad * nh * LANES)

    args = (x, adj, eattr4, onehot_pad,
            params["wc1"], params["bc1"], params["we1"], params["g1"], params["bb1"],
            params["wc2"], params["bc2"], params["we2"], params["g2"], params["bb2"],
            params["w1_add"], params["w1_max"], params["w1_mean"], params["b1h"],
            params["w2p"], params["b2p"], params["prelu_a"])
    bytes_accessed = sum(int(a.size) * a.dtype.itemsize for a in args) + bpad * LANES * 4

    vmem = pl.BlockSpec(memory_space=pltpu.MemorySpace.VMEM)
    smem = pl.BlockSpec(memory_space=pltpu.MemorySpace.SMEM)
    kernel = functools.partial(_net_kernel, heads1=heads, num_graphs=num_graphs)

    out_pad = pl.pallas_call(
        kernel,
        out_shape=jax.ShapeDtypeStruct((bpad, LANES), jnp.float32),
        in_specs=[vmem] * 20 + [smem],
        out_specs=vmem,
        compiler_params=pltpu.CompilerParams(vmem_limit_bytes=32 * 1024 * 1024),
        cost_estimate=pl.CostEstimate(
            flops=int(flops),
            transcendentals=int((heads + 1) * n * n + bpad * LANES),
            bytes_accessed=int(bytes_accessed)),
    )(*args)
    return out_pad[:num_graphs, :num_classes]


# ----------------------------- parameter init -----------------------------

def _init_linear(key, fan_in, fan_out, scale=0.1):
    kw, kb = jax.random.split(key)
    w = scale * jax.random.normal(kw, (fan_in, fan_out), jnp.float32)
    b = scale * jax.random.normal(kb, (1, fan_out), jnp.float32)
    return w, b


def _init_transformer_conv(key, in_ch, out_ch, heads, edge_dim):
    d = heads * out_ch
    keys = jax.random.split(key, 5)
    wq, bq = _init_linear(keys[0], in_ch, d)
    wk, bk = _init_linear(keys[1], in_ch, d)
    wv, bv = _init_linear(keys[2], in_ch, d)
    we = 0.1 * jax.random.normal(keys[3], (edge_dim, d), jnp.float32)  # lin_edge, no bias
    wskip, bskip = _init_linear(keys[4], in_ch, d)
    return (jnp.concatenate([wq, wk, wv, wskip], axis=1),
            jnp.concatenate([bq, bk, bv, bskip], axis=1),
            we,
            jnp.ones((1, d), jnp.float32),
            jnp.zeros((1, d), jnp.float32))


def init_params(key, in_ch, hidden, heads=4, edge_dim=4, num_classes=2):
    d1 = heads * hidden
    f1 = d1 + in_ch
    d2 = f1                       # conv2: in = out = f1, heads = 1
    f2 = d2 + f1
    keys = jax.random.split(key, 4)
    wc1, bc1, we1, g1, bb1 = _init_transformer_conv(keys[0], in_ch, hidden, heads, edge_dim)
    wc2, bc2, we2, g2, bb2 = _init_transformer_conv(keys[1], f1, d2, 1, edge_dim)
    w1, b1 = _init_linear(keys[2], 3 * f2, 3 * d2)
    w2, b2 = _init_linear(keys[3], 3 * d2, num_classes)
    # pre-split w1 into add / max / mean row blocks (pool concat order: add|max|mean)
    w1_add, w1_max, w1_mean = w1[:f2], w1[f2:2 * f2], w1[2 * f2:]
    # pad the classifier to 128 output lanes (pad weights 0, pad bias -1e30 so the
    # log_softmax over the padded lane axis is exact on the real classes)
    w2p = jnp.zeros((3 * d2, LANES), jnp.float32).at[:, :num_classes].set(w2)
    b2p = jnp.full((1, LANES), NEG, jnp.float32).at[:, :num_classes].set(b2)
    return dict(wc1=wc1, bc1=bc1, we1=we1, g1=g1, bb1=bb1,
                wc2=wc2, bc2=bc2, we2=we2, g2=g2, bb2=bb2,
                w1_add=w1_add, w1_max=w1_max, w1_mean=w1_mean, b1h=b1,
                w2p=w2p, b2p=b2p,
                prelu_a=jnp.full((1, 1), 0.25, jnp.float32))


# ----------------------------- main -----------------------------

if __name__ == "__main__":
    in_ch, hidden, out_classes = 4, 8, 2    # Net(in_channels, hidden_channels, out_channels)
    heads = 4
    num_graphs, nodes_per_graph = 2, 8
    n_nodes = num_graphs * nodes_per_graph
    edge_dim = 4

    key = jax.random.PRNGKey(0)
    k_x, k_e, k_p = jax.random.split(key, 3)

    # node features
    x = jax.random.normal(k_x, (n_nodes, in_ch), jnp.float32)

    # bidirectional ring graph per example -> every node has >= 1 incoming edge
    src, dst = [], []
    for g in range(num_graphs):
        base = g * nodes_per_graph
        for i in range(nodes_per_graph):
            a = base + i
            b = base + (i + 1) % nodes_per_graph
            src += [a, b]
            dst += [b, a]
    edge_index = jnp.array([src, dst], dtype=jnp.int32)          # [2, E]
    n_edges = edge_index.shape[1]
    edge_attr = jax.random.normal(k_e, (n_edges, edge_dim), jnp.float32)
    batch = jnp.array(sum([[g] * nodes_per_graph for g in range(num_graphs)], []),
                      dtype=jnp.int32)

    # densify graph structure; adj / eattr stored bf16 (halves HBM->VMEM traffic of
    # the largest inputs; all in-kernel math stays f32)
    adj = (jnp.zeros((n_nodes, n_nodes), jnp.float32)
           .at[edge_index[1], edge_index[0]].set(1.0)).astype(jnp.bfloat16)
    eattr = (jnp.zeros((n_nodes, n_nodes, edge_dim), jnp.float32)
             .at[edge_index[1], edge_index[0]].set(edge_attr))
    eattr4 = jnp.transpose(eattr, (2, 0, 1)).astype(jnp.bfloat16)      # [4, N, N]

    onehot = (batch[None, :] == jnp.arange(num_graphs)[:, None]).astype(jnp.float32)
    onehot_pad = jnp.zeros((B_PAD, n_nodes), jnp.float32).at[:num_graphs].set(onehot)

    params = init_params(k_p, in_ch, hidden, heads=heads,
                         edge_dim=edge_dim, num_classes=out_classes)

    fwd = jax.jit(functools.partial(net_forward, heads=heads,
                                    num_graphs=num_graphs, num_classes=out_classes))
    out = jax.block_until_ready(fwd(params, x, adj, eattr4, onehot_pad))

    assert out.shape == (num_graphs, out_classes)
    assert bool(jnp.all(jnp.isfinite(out)))
    # rows of log_softmax should exp-sum to 1
    assert bool(jnp.allclose(jnp.sum(jnp.exp(out), axis=-1), 1.0, atol=1e-4))
    print("KERNEL_OK")
</pallas_src>

<mosaic_0001>
module attributes {stable_mosaic.version = 11 : i64} {
  func.func @_net_kernel(%arg0: memref<16x4xf32, #tpu.memory_space<vmem>>, %arg1: memref<16x16xbf16, #tpu.memory_space<vmem>>, %arg2: memref<4x16x16xbf16, #tpu.memory_space<vmem>>, %arg3: memref<8x16xf32, #tpu.memory_space<vmem>>, %arg4: memref<4x128xf32, #tpu.memory_space<vmem>>, %arg5: memref<1x128xf32, #tpu.memory_space<vmem>>, %arg6: memref<4x32xf32, #tpu.memory_space<vmem>>, %arg7: memref<1x32xf32, #tpu.memory_space<vmem>>, %arg8: memref<1x32xf32, #tpu.memory_space<vmem>>, %arg9: memref<36x144xf32, #tpu.memory_space<vmem>>, %arg10: memref<1x144xf32, #tpu.memory_space<vmem>>, %arg11: memref<4x36xf32, #tpu.memory_space<vmem>>, %arg12: memref<1x36xf32, #tpu.memory_space<vmem>>, %arg13: memref<1x36xf32, #tpu.memory_space<vmem>>, %arg14: memref<72x108xf32, #tpu.memory_space<vmem>>, %arg15: memref<72x108xf32, #tpu.memory_space<vmem>>, %arg16: memref<72x108xf32, #tpu.memory_space<vmem>>, %arg17: memref<1x108xf32, #tpu.memory_space<vmem>>, %arg18: memref<108x128xf32, #tpu.memory_space<vmem>>, %arg19: memref<1x128xf32, #tpu.memory_space<vmem>>, %arg20: memref<1x1xf32, #tpu.memory_space<smem>>, %arg21: memref<8x128xf32, #tpu.memory_space<vmem>>) attributes {dimension_semantics = [], scalar_prefetch = 0 : i64, scratch_operands = 0 : i64, tpu.core_type = #tpu.core_type<tc>} {
    %c0 = arith.constant 0 : index
    %c0_0 = arith.constant 0 : index
    %0 = vector.load %arg0[%c0, %c0_0] : memref<16x4xf32, #tpu.memory_space<vmem>>, vector<16x4xf32>
    %c0_1 = arith.constant 0 : index
    %c0_2 = arith.constant 0 : index
    %1 = vector.load %arg1[%c0_1, %c0_2] : memref<16x16xbf16, #tpu.memory_space<vmem>>, vector<16x16xbf16>
    %2 = arith.extf %1 : vector<16x16xbf16> to vector<16x16xf32>
    %c0_3 = arith.constant 0 : index
    %c0_4 = arith.constant 0 : index
    %c0_5 = arith.constant 0 : index
    %3 = vector.load %arg2[%c0_3, %c0_4, %c0_5] : memref<4x16x16xbf16, #tpu.memory_space<vmem>>, vector<4x16x16xbf16>
    %4 = arith.extf %3 : vector<4x16x16xbf16> to vector<4x16x16xf32>
    %cst = arith.constant 0.000000e+00 : f32
    %5 = vector.broadcast %cst : f32 to vector<16x16xf32>
    %6 = arith.cmpf ogt, %2, %5 : vector<16x16xf32>
    %cst_6 = arith.constant 0.000000e+00 : f32
    %cst_7 = arith.constant -1.000000e+30 : f32
    %7 = vector.broadcast %cst_6 : f32 to vector<16x16xf32>
    %8 = vector.broadcast %cst_7 : f32 to vector<16x16xf32>
    %9 = arith.select %6, %7, %8 : vector<16x16xi1>, vector<16x16xf32>
    %cst_8 = arith.constant dense<0xFF800000> : vector<16xf32>
    %10 = vector.multi_reduction <maximumf>, %9, %cst_8 [1] : vector<16x16xf32> to vector<16xf32>
    %11 = vector.shape_cast %10 : vector<16xf32> to vector<16x1xf32>
    %cst_9 = arith.constant 0.000000e+00 : f32
    %12 = vector.broadcast %cst_9 : f32 to vector<16x1xf32>
    %13 = arith.cmpf oeq, %11, %12 : vector<16x1xf32>
    %14 = arith.extui %13 : vector<16x1xi1> to vector<16x1xi32>
    %15 = arith.sitofp %14 : vector<16x1xi32> to vector<16x1xf32>
    %c0_10 = arith.constant 0 : index
    %c0_11 = arith.constant 0 : index
    %16 = vector.load %arg6[%c0_10, %c0_11] : memref<4x32xf32, #tpu.memory_space<vmem>>, vector<4x32xf32>
    %c0_12 = arith.constant 0 : index
    %c0_13 = arith.constant 0 : index
    %17 = vector.load %arg4[%c0_12, %c0_13] : memref<4x128xf32, #tpu.memory_space<vmem>>, vector<4x128xf32>
    %cst_14 = arith.constant dense<0.000000e+00> : vector<16x128xf32>
    %18 = tpu.matmul %0, %17, %cst_14 {dimension_numbers = #tpu.dot_dimension_numbers<[1], [0], [0], [1], [0, 0, 1, 1], [], []>} : vector<16x4xf32>, vector<4x128xf32>, vector<16x128xf32> -> vector<16x128xf32>
    %c0_15 = arith.constant 0 : index
    %c0_16 = arith.constant 0 : index
    %19 = vector.load %arg5[%c0_15, %c0_16] : memref<1x128xf32, #tpu.memory_space<vmem>>, vector<1x128xf32>
    %20 = vector.broadcast %19 : vector<1x128xf32> to vector<16x128xf32>
    %21 = arith.addf %18, %20 : vector<16x128xf32>
    %22 = vector.extract_strided_slice %21 {offsets = [0, 0], sizes = [16, 32], strides = [1, 1]} : vector<16x128xf32> to vector<16x32xf32>
    %cst_17 = arith.constant 0.353553385 : f32
    %23 = vector.broadcast %cst_17 : f32 to vector<16x32xf32>
    %24 = arith.mulf %22, %23 : vector<16x32xf32>
    %25 = vector.extract_strided_slice %21 {offsets = [0, 32], sizes = [16, 32], strides = [1, 1]} : vector<16x128xf32> to vector<16x32xf32>
    %26 = vector.extract_strided_slice %21 {offsets = [0, 64], sizes = [16, 32], strides = [1, 1]} : vector<16x128xf32> to vector<16x32xf32>
    %27 = vector.extract_strided_slice %21 {offsets = [0, 96], sizes = [16, 32], strides = [1, 1]} : vector<16x128xf32> to vector<16x32xf32>
    %28 = vector.extract_strided_slice %24 {offsets = [0, 0], sizes = [16, 8], strides = [1, 1]} : vector<16x32xf32> to vector<16x8xf32>
    %29 = vector.extract_strided_slice %25 {offsets = [0, 0], sizes = [16, 8], strides = [1, 1]} : vector<16x32xf32> to vector<16x8xf32>
    %30 = vector.extract_strided_slice %26 {offsets = [0, 0], sizes = [16, 8], strides = [1, 1]} : vector<16x32xf32> to vector<16x8xf32>
    %31 = vector.extract_strided_slice %16 {offsets = [0, 0], sizes = [4, 8], strides = [1, 1]} : vector<4x32xf32> to vector<4x8xf32>
    %cst_18 = arith.constant dense<0.000000e+00> : vector<16x4xf32>
    %32 = tpu.matmul %28, %31, %cst_18 {dimension_numbers = #tpu.dot_dimension_numbers<[1], [1], [0], [0], [0, 0, 1, 0], [], []>} : vector<16x8xf32>, vector<4x8xf32>, vector<16x4xf32> -> vector<16x4xf32>
    %cst_19 = arith.constant dense<0.000000e+00> : vector<16x16xf32>
    %33 = tpu.matmul %28, %29, %cst_19 {dimension_numbers = #tpu.dot_dimension_numbers<[1], [1], [0], [0], [0, 0, 1, 0], [], []>} : vector<16x8xf32>, vector<16x8xf32>, vector<16x16xf32> -> vector<16x16xf32>
    %34 = vector.extract_strided_slice %32 {offsets = [0, 0], sizes = [16, 1], strides = [1, 1]} : vector<16x4xf32> to vector<16x1xf32>
    %35 = vector.extract_strided_slice %4 {offsets = [0, 0, 0], sizes = [1, 16, 16], strides = [1, 1, 1]} : vector<4x16x16xf32> to vector<1x16x16xf32>
    %36 = vector.shape_cast %35 : vector<1x16x16xf32> to vector<16x16xf32>
    %37 = vector.broadcast %34 : vector<16x1xf32> to vector<16x16xf32>
    %38 = arith.mulf %37, %36 : vector<16x16xf32>
    %cst_20 = arith.constant 0.000000e+00 : f32
    %39 = vector.broadcast %cst_20 : f32 to vector<16x16xf32>
    %40 = arith.addf %39, %38 : vector<16x16xf32>
    %41 = vector.extract_strided_slice %32 {offsets = [0, 1], sizes = [16, 1], strides = [1, 1]} : vector<16x4xf32> to vector<16x1xf32>
    %42 = vector.extract_strided_slice %4 {offsets = [1, 0, 0], sizes = [1, 16, 16], strides = [1, 1, 1]} : vector<4x16x16xf32> to vector<1x16x16xf32>
    %43 = vector.shape_cast %42 : vector<1x16x16xf32> to vector<16x16xf32>
    %44 = vector.broadcast %41 : vector<16x1xf32> to vector<16x16xf32>
    %45 = arith.mulf %44, %43 : vector<16x16xf32>
    %46 = arith.addf %40, %45 : vector<16x16xf32>
    %47 = vector.extract_strided_slice %32 {offsets = [0, 2], sizes = [16, 1], strides = [1, 1]} : vector<16x4xf32> to vector<16x1xf32>
    %48 = vector.extract_strided_slice %4 {offsets = [2, 0, 0], sizes = [1, 16, 16], strides = [1, 1, 1]} : vector<4x16x16xf32> to vector<1x16x16xf32>
    %49 = vector.shape_cast %48 : vector<1x16x16xf32> to vector<16x16xf32>
    %50 = vector.broadcast %47 : vector<16x1xf32> to vector<16x16xf32>
    %51 = arith.mulf %50, %49 : vector<16x16xf32>
    %52 = arith.addf %46, %51 : vector<16x16xf32>
    %53 = vector.extract_strided_slice %32 {offsets = [0, 3], sizes = [16, 1], strides = [1, 1]} : vector<16x4xf32> to vector<16x1xf32>
    %54 = vector.extract_strided_slice %4 {offsets = [3, 0, 0], sizes = [1, 16, 16], strides = [1, 1, 1]} : vector<4x16x16xf32> to vector<1x16x16xf32>
    %55 = vector.shape_cast %54 : vector<1x16x16xf32> to vector<16x16xf32>
    %56 = vector.broadcast %53 : vector<16x1xf32> to vector<16x16xf32>
    %57 = arith.mulf %56, %55 : vector<16x16xf32>
    %58 = arith.addf %52, %57 : vector<16x16xf32>
    %59 = arith.addf %33, %58 : vector<16x16xf32>
    %60 = arith.addf %59, %9 : vector<16x16xf32>
    %cst_21 = arith.constant dense<0xFF800000> : vector<16xf32>
    %61 = vector.multi_reduction <maximumf>, %60, %cst_21 [1] : vector<16x16xf32> to vector<16xf32>
    %62 = vector.shape_cast %61 : vector<16xf32> to vector<16x1xf32>
    %63 = vector.broadcast %62 : vector<16x1xf32> to vector<16x16xf32>
    %64 = arith.subf %60, %63 : vector<16x16xf32>
    %65 = math.exp %64 : vector<16x16xf32>
    %cst_22 = arith.constant dense<0.000000e+00> : vector<16xf32>
    %66 = vector.multi_reduction <add>, %65, %cst_22 [1] : vector<16x16xf32> to vector<16xf32>
    %67 = vector.shape_cast %66 : vector<16xf32> to vector<16x1xf32>
    %cst_23 = arith.constant 9.99999968E-21 : f32
    %68 = vector.broadcast %cst_23 : f32 to vector<16x1xf32>
    %69 = arith.maximumf %67, %68 : vector<16x1xf32>
    %70 = tpu.reciprocal %69 {approx = true} : vector<16x1xf32> -> vector<16x1xf32>
    %71 = vector.broadcast %70 : vector<16x1xf32> to vector<16x16xf32>
    %72 = arith.mulf %65, %71 : vector<16x16xf32>
    %cst_24 = arith.constant dense<0.000000e+00> : vector<16x8xf32>
    %73 = tpu.matmul %72, %30, %cst_24 {dimension_numbers = #tpu.dot_dimension_numbers<[1], [0], [0], [1], [0, 0, 1, 1], [], []>} : vector<16x16xf32>, vector<16x8xf32>, vector<16x8xf32> -> vector<16x8xf32>
    %74 = vector.shape_cast %72 : vector<16x16xf32> to vector<1x16x16xf32>
    %75 = vector.broadcast %74 : vector<1x16x16xf32> to vector<4x16x16xf32>
    %76 = arith.mulf %4, %75 : vector<4x16x16xf32>
    %cst_25 = arith.constant dense<0.000000e+00> : vector<4x16xf32>
    %77 = vector.multi_reduction <add>, %76, %cst_25 [2] : vector<4x16x16xf32> to vector<4x16xf32>
    %78 = vector.shape_cast %77 : vector<4x16xf32> to vector<4x16x1xf32>
    %79 = vector.extract_strided_slice %78 {offsets = [0, 0, 0], sizes = [1, 16, 1], strides = [1, 1, 1]} : vector<4x16x1xf32> to vector<1x16x1xf32>
    %80 = vector.shape_cast %79 : vector<1x16x1xf32> to vector<16x1xf32>
    %81 = vector.extract_strided_slice %31 {offsets = [0, 0], sizes = [1, 8], strides = [1, 1]} : vector<4x8xf32> to vector<1x8xf32>
    %82 = vector.broadcast %80 : vector<16x1xf32> to vector<16x8xf32>
    %83 = vector.broadcast %81 : vector<1x8xf32> to vector<16x8xf32>
    %84 = arith.mulf %82, %83 : vector<16x8xf32>
    %cst_26 = arith.constant 0.000000e+00 : f32
    %85 = vector.broadcast %cst_26 : f32 to vector<16x8xf32>
    %86 = arith.addf %85, %84 : vector<16x8xf32>
    %87 = vector.extract_strided_slice %78 {offsets = [1, 0, 0], sizes = [1, 16, 1], strides = [1, 1, 1]} : vector<4x16x1xf32> to vector<1x16x1xf32>
    %88 = vector.shape_cast %87 : vector<1x16x1xf32> to vector<16x1xf32>
    %89 = vector.extract_strided_slice %31 {offsets = [1, 0], sizes = [1, 8], strides = [1, 1]} : vector<4x8xf32> to vector<1x8xf32>
    %90 = vector.broadcast %88 : vector<16x1xf32> to vector<16x8xf32>
    %91 = vector.broadcast %89 : vector<1x8xf32> to vector<16x8xf32>
    %92 = arith.mulf %90, %91 : vector<16x8xf32>
    %93 = arith.addf %86, %92 : vector<16x8xf32>
    %94 = vector.extract_strided_slice %78 {offsets = [2, 0, 0], sizes = [1, 16, 1], strides = [1, 1, 1]} : vector<4x16x1xf32> to vector<1x16x1xf32>
    %95 = vector.shape_cast %94 : vector<1x16x1xf32> to vector<16x1xf32>
    %96 = vector.extract_strided_slice %31 {offsets = [2, 0], sizes = [1, 8], strides = [1, 1]} : vector<4x8xf32> to vector<1x8xf32>
    %97 = vector.broadcast %95 : vector<16x1xf32> to vector<16x8xf32>
    %98 = vector.broadcast %96 : vector<1x8xf32> to vector<16x8xf32>
    %99 = arith.mulf %97, %98 : vector<16x8xf32>
    %100 = arith.addf %93, %99 : vector<16x8xf32>
    %101 = vector.extract_strided_slice %78 {offsets = [3, 0, 0], sizes = [1, 16, 1], strides = [1, 1, 1]} : vector<4x16x1xf32> to vector<1x16x1xf32>
    %102 = vector.shape_cast %101 : vector<1x16x1xf32> to vector<16x1xf32>
    %103 = vector.extract_strided_slice %31 {offsets = [3, 0], sizes = [1, 8], strides = [1, 1]} : vector<4x8xf32> to vector<1x8xf32>
    %104 = vector.broadcast %102 : vector<16x1xf32> to vector<16x8xf32>
    %105 = vector.broadcast %103 : vector<1x8xf32> to vector<16x8xf32>
    %106 = arith.mulf %104, %105 : vector<16x8xf32>
    %107 = arith.addf %100, %106 : vector<16x8xf32>
    %108 = arith.addf %73, %107 : vector<16x8xf32>
    %109 = vector.extract_strided_slice %24 {offsets = [0, 8], sizes = [16, 8], strides = [1, 1]} : vector<16x32xf32> to vector<16x8xf32>
    %110 = vector.extract_strided_slice %25 {offsets = [0, 8], sizes = [16, 8], strides = [1, 1]} : vector<16x32xf32> to vector<16x8xf32>
    %111 = vector.extract_strided_slice %26 {offsets = [0, 8], sizes = [16, 8], strides = [1, 1]} : vector<16x32xf32> to vector<16x8xf32>
    %112 = vector.extract_strided_slice %16 {offsets = [0, 8], sizes = [4, 8], strides = [1, 1]} : vector<4x32xf32> to vector<4x8xf32>
    %cst_27 = arith.constant dense<0.000000e+00> : vector<16x4xf32>
    %113 = tpu.matmul %109, %112, %cst_27 {dimension_numbers = #tpu.dot_dimension_numbers<[1], [1], [0], [0], [0, 0, 1, 0], [], []>} : vector<16x8xf32>, vector<4x8xf32>, vector<16x4xf32> -> vector<16x4xf32>
    %cst_28 = arith.constant dense<0.000000e+00> : vector<16x16xf32>
    %114 = tpu.matmul %109, %110, %cst_28 {dimension_numbers = #tpu.dot_dimension_numbers<[1], [1], [0], [0], [0, 0, 1, 0], [], []>} : vector<16x8xf32>, vector<16x8xf32>, vector<16x16xf32> -> vector<16x16xf32>
    %115 = vector.extract_strided_slice %113 {offsets = [0, 0], sizes = [16, 1], strides = [1, 1]} : vector<16x4xf32> to vector<16x1xf32>
    %116 = vector.extract_strided_slice %4 {offsets = [0, 0, 0], sizes = [1, 16, 16], strides = [1, 1, 1]} : vector<4x16x16xf32> to vector<1x16x16xf32>
    %117 = vector.shape_cast %116 : vector<1x16x16xf32> to vector<16x16xf32>
    %118 = vector.broadcast %115 : vector<16x1xf32> to vector<16x16xf32>
    %119 = arith.mulf %118, %117 : vector<16x16xf32>
    %cst_29 = arith.constant 0.000000e+00 : f32
    %120 = vector.broadcast %cst_29 : f32 to vector<16x16xf32>
    %121 = arith.addf %120, %119 : vector<16x16xf32>
    %122 = vector.extract_strided_slice %113 {offsets = [0, 1], sizes = [16, 1], strides = [1, 1]} : vector<16x4xf32> to vector<16x1xf32>
    %123 = vector.extract_strided_slice %4 {offsets = [1, 0, 0], sizes = [1, 16, 16], strides = [1, 1, 1]} : vector<4x16x16xf32> to vector<1x16x16xf32>
    %124 = vector.shape_cast %123 : vector<1x16x16xf32> to vector<16x16xf32>
    %125 = vector.broadcast %122 : vector<16x1xf32> to vector<16x16xf32>
    %126 = arith.mulf %125, %124 : vector<16x16xf32>
    %127 = arith.addf %121, %126 : vector<16x16xf32>
    %128 = vector.extract_strided_slice %113 {offsets = [0, 2], sizes = [16, 1], strides = [1, 1]} : vector<16x4xf32> to vector<16x1xf32>
    %129 = vector.extract_strided_slice %4 {offsets = [2, 0, 0], sizes = [1, 16, 16], strides = [1, 1, 1]} : vector<4x16x16xf32> to vector<1x16x16xf32>
    %130 = vector.shape_cast %129 : vector<1x16x16xf32> to vector<16x16xf32>
    %131 = vector.broadcast %128 : vector<16x1xf32> to vector<16x16xf32>
    %132 = arith.mulf %131, %130 : vector<16x16xf32>
    %133 = arith.addf %127, %132 : vector<16x16xf32>
    %134 = vector.extract_strided_slice %113 {offsets = [0, 3], sizes = [16, 1], strides = [1, 1]} : vector<16x4xf32> to vector<16x1xf32>
    %135 = vector.extract_strided_slice %4 {offsets = [3, 0, 0], sizes = [1, 16, 16], strides = [1, 1, 1]} : vector<4x16x16xf32> to vector<1x16x16xf32>
    %136 = vector.shape_cast %135 : vector<1x16x16xf32> to vector<16x16xf32>
    %137 = vector.broadcast %134 : vector<16x1xf32> to vector<16x16xf32>
    %138 = arith.mulf %137, %136 : vector<16x16xf32>
    %139 = arith.addf %133, %138 : vector<16x16xf32>
    %140 = arith.addf %114, %139 : vector<16x16xf32>
    %141 = arith.addf %140, %9 : vector<16x16xf32>
    %cst_30 = arith.constant dense<0xFF800000> : vector<16xf32>
    %142 = vector.multi_reduction <maximumf>, %141, %cst_30 [1] : vector<16x16xf32> to vector<16xf32>
    %143 = vector.shape_cast %142 : vector<16xf32> to vector<16x1xf32>
    %144 = vector.broadcast %143 : vector<16x1xf32> to vector<16x16xf32>
    %145 = arith.subf %141, %144 : vector<16x16xf32>
    %146 = math.exp %145 : vector<16x16xf32>
    %cst_31 = arith.constant dense<0.000000e+00> : vector<16xf32>
    %147 = vector.multi_reduction <add>, %146, %cst_31 [1] : vector<16x16xf32> to vector<16xf32>
    %148 = vector.shape_cast %147 : vector<16xf32> to vector<16x1xf32>
    %cst_32 = arith.constant 9.99999968E-21 : f32
    %149 = vector.broadcast %cst_32 : f32 to vector<16x1xf32>
    %150 = arith.maximumf %148, %149 : vector<16x1xf32>
    %151 = tpu.reciprocal %150 {approx = true} : vector<16x1xf32> -> vector<16x1xf32>
    %152 = vector.broadcast %151 : vector<16x1xf32> to vector<16x16xf32>
    %153 = arith.mulf %146, %152 : vector<16x16xf32>
    %cst_33 = arith.constant dense<0.000000e+00> : vector<16x8xf32>
    %154 = tpu.matmul %153, %111, %cst_33 {dimension_numbers = #tpu.dot_dimension_numbers<[1], [0], [0], [1], [0, 0, 1, 1], [], []>} : vector<16x16xf32>, vector<16x8xf32>, vector<16x8xf32> -> vector<16x8xf32>
    %155 = vector.shape_cast %153 : vector<16x16xf32> to vector<1x16x16xf32>
    %156 = vector.broadcast %155 : vector<1x16x16xf32> to vector<4x16x16xf32>
    %157 = arith.mulf %4, %156 : vector<4x16x16xf32>
    %cst_34 = arith.constant dense<0.000000e+00> : vector<4x16xf32>
    %158 = vector.multi_reduction <add>, %157, %cst_34 [2] : vector<4x16x16xf32> to vector<4x16xf32>
    %159 = vector.shape_cast %158 : vector<4x16xf32> to vector<4x16x1xf32>
    %160 = vector.extract_strided_slice %159 {offsets = [0, 0, 0], sizes = [1, 16, 1], strides = [1, 1, 1]} : vector<4x16x1xf32> to vector<1x16x1xf32>
    %161 = vector.shape_cast %160 : vector<1x16x1xf32> to vector<16x1xf32>
    %162 = vector.extract_strided_slice %112 {offsets = [0, 0], sizes = [1, 8], strides = [1, 1]} : vector<4x8xf32> to vector<1x8xf32>
    %163 = vector.broadcast %161 : vector<16x1xf32> to vector<16x8xf32>
    %164 = vector.broadcast %162 : vector<1x8xf32> to vector<16x8xf32>
    %165 = arith.mulf %163, %164 : vector<16x8xf32>
    %cst_35 = arith.constant 0.000000e+00 : f32
    %166 = vector.broadcast %cst_35 : f32 to vector<16x8xf32>
    %167 = arith.addf %166, %165 : vector<16x8xf32>
    %168 = vector.extract_strided_slice %159 {offsets = [1, 0, 0], sizes = [1, 16, 1], strides = [1, 1, 1]} : vector<4x16x1xf32> to vector<1x16x1xf32>
    %169 = vector.shape_cast %168 : vector<1x16x1xf32> to vector<16x1xf32>
    %170 = vector.extract_strided_slice %112 {offsets = [1, 0], sizes = [1, 8], strides = [1, 1]} : vector<4x8xf32> to vector<1x8xf32>
    %171 = vector.broadcast %169 : vector<16x1xf32> to vector<16x8xf32>
    %172 = vector.broadcast %170 : vector<1x8xf32> to vector<16x8xf32>
    %173 = arith.mulf %171, %172 : vector<16x8xf32>
    %174 = arith.addf %167, %173 : vector<16x8xf32>
    %175 = vector.extract_strided_slice %159 {offsets = [2, 0, 0], sizes = [1, 16, 1], strides = [1, 1, 1]} : vector<4x16x1xf32> to vector<1x16x1xf32>
    %176 = vector.shape_cast %175 : vector<1x16x1xf32> to vector<16x1xf32>
    %177 = vector.extract_strided_slice %112 {offsets = [2, 0], sizes = [1, 8], strides = [1, 1]} : vector<4x8xf32> to vector<1x8xf32>
    %178 = vector.broadcast %176 : vector<16x1xf32> to vector<16x8xf32>
    %179 = vector.broadcast %177 : vector<1x8xf32> to vector<16x8xf32>
    %180 = arith.mulf %178, %179 : vector<16x8xf32>
    %181 = arith.addf %174, %180 : vector<16x8xf32>
    %182 = vector.extract_strided_slice %159 {offsets = [3, 0, 0], sizes = [1, 16, 1], strides = [1, 1, 1]} : vector<4x16x1xf32> to vector<1x16x1xf32>
    %183 = vector.shape_cast %182 : vector<1x16x1xf32> to vector<16x1xf32>
    %184 = vector.extract_strided_slice %112 {offsets = [3, 0], sizes = [1, 8], strides = [1, 1]} : vector<4x8xf32> to vector<1x8xf32>
    %185 = vector.broadcast %183 : vector<16x1xf32> to vector<16x8xf32>
    %186 = vector.broadcast %184 : vector<1x8xf32> to vector<16x8xf32>
    %187 = arith.mulf %185, %186 : vector<16x8xf32>
    %188 = arith.addf %181, %187 : vector<16x8xf32>
    %189 = arith.addf %154, %188 : vector<16x8xf32>
    %190 = vector.extract_strided_slice %24 {offsets = [0, 16], sizes = [16, 8], strides = [1, 1]} : vector<16x32xf32> to vector<16x8xf32>
    %191 = vector.extract_strided_slice %25 {offsets = [0, 16], sizes = [16, 8], strides = [1, 1]} : vector<16x32xf32> to vector<16x8xf32>
    %192 = vector.extract_strided_slice %26 {offsets = [0, 16], sizes = [16, 8], strides = [1, 1]} : vector<16x32xf32> to vector<16x8xf32>
    %193 = vector.extract_strided_slice %16 {offsets = [0, 16], sizes = [4, 8], strides = [1, 1]} : vector<4x32xf32> to vector<4x8xf32>
    %cst_36 = arith.constant dense<0.000000e+00> : vector<16x4xf32>
    %194 = tpu.matmul %190, %193, %cst_36 {dimension_numbers = #tpu.dot_dimension_numbers<[1], [1], [0], [0], [0, 0, 1, 0], [], []>} : vector<16x8xf32>, vector<4x8xf32>, vector<16x4xf32> -> vector<16x4xf32>
    %cst_37 = arith.constant dense<0.000000e+00> : vector<16x16xf32>
    %195 = tpu.matmul %190, %191, %cst_37 {dimension_numbers = #tpu.dot_dimension_numbers<[1], [1], [0], [0], [0, 0, 1, 0], [], []>} : vector<16x8xf32>, vector<16x8xf32>, vector<16x16xf32> -> vector<16x16xf32>
    %196 = vector.extract_strided_slice %194 {offsets = [0, 0], sizes = [16, 1], strides = [1, 1]} : vector<16x4xf32> to vector<16x1xf32>
    %197 = vector.extract_strided_slice %4 {offsets = [0, 0, 0], sizes = [1, 16, 16], strides = [1, 1, 1]} : vector<4x16x16xf32> to vector<1x16x16xf32>
    %198 = vector.shape_cast %197 : vector<1x16x16xf32> to vector<16x16xf32>
    %199 = vector.broadcast %196 : vector<16x1xf32> to vector<16x16xf32>
    %200 = arith.mulf %199, %198 : vector<16x16xf32>
    %cst_38 = arith.constant 0.000000e+00 : f32
    %201 = vector.broadcast %cst_38 : f32 to vector<16x16xf32>
    %202 = arith.addf %201, %200 : vector<16x16xf32>
    %203 = vector.extract_strided_slice %194 {offsets = [0, 1], sizes = [16, 1], strides = [1, 1]} : vector<16x4xf32> to vector<16x1xf32>
    %204 = vector.extract_strided_slice %4 {offsets = [1, 0, 0], sizes = [1, 16, 16], strides = [1, 1, 1]} : vector<4x16x16xf32> to vector<1x16x16xf32>
    %205 = vector.shape_cast %204 : vector<1x16x16xf32> to vector<16x16xf32>
    %206 = vector.broadcast %203 : vector<16x1xf32> to vector<16x16xf32>
    %207 = arith.mulf %206, %205 : vector<16x16xf32>
    %208 = arith.addf %202, %207 : vector<16x16xf32>
    %209 = vector.extract_strided_slice %194 {offsets = [0, 2], sizes = [16, 1], strides = [1, 1]} : vector<16x4xf32> to vector<16x1xf32>
    %210 = vector.extract_strided_slice %4 {offsets = [2, 0, 0], sizes = [1, 16, 16], strides = [1, 1, 1]} : vector<4x16x16xf32> to vector<1x16x16xf32>
    %211 = vector.shape_cast %210 : vector<1x16x16xf32> to vector<16x16xf32>
    %212 = vector.broadcast %209 : vector<16x1xf32> to vector<16x16xf32>
    %213 = arith.mulf %212, %211 : vector<16x16xf32>
    %214 = arith.addf %208, %213 : vector<16x16xf32>
    %215 = vector.extract_strided_slice %194 {offsets = [0, 3], sizes = [16, 1], strides = [1, 1]} : vector<16x4xf32> to vector<16x1xf32>
    %216 = vector.extract_strided_slice %4 {offsets = [3, 0, 0], sizes = [1, 16, 16], strides = [1, 1, 1]} : vector<4x16x16xf32> to vector<1x16x16xf32>
    %217 = vector.shape_cast %216 : vector<1x16x16xf32> to vector<16x16xf32>
    %218 = vector.broadcast %215 : vector<16x1xf32> to vector<16x16xf32>
    %219 = arith.mulf %218, %217 : vector<16x16xf32>
    %220 = arith.addf %214, %219 : vector<16x16xf32>
    %221 = arith.addf %195, %220 : vector<16x16xf32>
    %222 = arith.addf %221, %9 : vector<16x16xf32>
    %cst_39 = arith.constant dense<0xFF800000> : vector<16xf32>
    %223 = vector.multi_reduction <maximumf>, %222, %cst_39 [1] : vector<16x16xf32> to vector<16xf32>
    %224 = vector.shape_cast %223 : vector<16xf32> to vector<16x1xf32>
    %225 = vector.broadcast %224 : vector<16x1xf32> to vector<16x16xf32>
    %226 = arith.subf %222, %225 : vector<16x16xf32>
    %227 = math.exp %226 : vector<16x16xf32>
    %cst_40 = arith.constant dense<0.000000e+00> : vector<16xf32>
    %228 = vector.multi_reduction <add>, %227, %cst_40 [1] : vector<16x16xf32> to vector<16xf32>
    %229 = vector.shape_cast %228 : vector<16xf32> to vector<16x1xf32>
    %cst_41 = arith.constant 9.99999968E-21 : f32
    %230 = vector.broadcast %cst_41 : f32 to vector<16x1xf32>
    %231 = arith.maximumf %229, %230 : vector<16x1xf32>
    %232 = tpu.reciprocal %231 {approx = true} : vector<16x1xf32> -> vector<16x1xf32>
    %233 = vector.broadcast %232 : vector<16x1xf32> to vector<16x16xf32>
    %234 = arith.mulf %227, %233 : vector<16x16xf32>
    %cst_42 = arith.constant dense<0.000000e+00> : vector<16x8xf32>
    %235 = tpu.matmul %234, %192, %cst_42 {dimension_numbers = #tpu.dot_dimension_numbers<[1], [0], [0], [1], [0, 0, 1, 1], [], []>} : vector<16x16xf32>, vector<16x8xf32>, vector<16x8xf32> -> vector<16x8xf32>
    %236 = vector.shape_cast %234 : vector<16x16xf32> to vector<1x16x16xf32>
    %237 = vector.broadcast %236 : vector<1x16x16xf32> to vector<4x16x16xf32>
    %238 = arith.mulf %4, %237 : vector<4x16x16xf32>
    %cst_43 = arith.constant dense<0.000000e+00> : vector<4x16xf32>
    %239 = vector.multi_reduction <add>, %238, %cst_43 [2] : vector<4x16x16xf32> to vector<4x16xf32>
    %240 = vector.shape_cast %239 : vector<4x16xf32> to vector<4x16x1xf32>
    %241 = vector.extract_strided_slice %240 {offsets = [0, 0, 0], sizes = [1, 16, 1], strides = [1, 1, 1]} : vector<4x16x1xf32> to vector<1x16x1xf32>
    %242 = vector.shape_cast %241 : vector<1x16x1xf32> to vector<16x1xf32>
    %243 = vector.extract_strided_slice %193 {offsets = [0, 0], sizes = [1, 8], strides = [1, 1]} : vector<4x8xf32> to vector<1x8xf32>
    %244 = vector.broadcast %242 : vector<16x1xf32> to vector<16x8xf32>
    %245 = vector.broadcast %243 : vector<1x8xf32> to vector<16x8xf32>
    %246 = arith.mulf %244, %245 : vector<16x8xf32>
    %cst_44 = arith.constant 0.000000e+00 : f32
    %247 = vector.broadcast %cst_44 : f32 to vector<16x8xf32>
    %248 = arith.addf %247, %246 : vector<16x8xf32>
    %249 = vector.extract_strided_slice %240 {offsets = [1, 0, 0], sizes = [1, 16, 1], strides = [1, 1, 1]} : vector<4x16x1xf32> to vector<1x16x1xf32>
    %250 = vector.shape_cast %249 : vector<1x16x1xf32> to vector<16x1xf32>
    %251 = vector.extract_strided_slice %193 {offsets = [1, 0], sizes = [1, 8], strides = [1, 1]} : vector<4x8xf32> to vector<1x8xf32>
    %252 = vector.broadcast %250 : vector<16x1xf32> to vector<16x8xf32>
    %253 = vector.broadcast %251 : vector<1x8xf32> to vector<16x8xf32>
    %254 = arith.mulf %252, %253 : vector<16x8xf32>
    %255 = arith.addf %248, %254 : vector<16x8xf32>
    %256 = vector.extract_strided_slice %240 {offsets = [2, 0, 0], sizes = [1, 16, 1], strides = [1, 1, 1]} : vector<4x16x1xf32> to vector<1x16x1xf32>
    %257 = vector.shape_cast %256 : vector<1x16x1xf32> to vector<16x1xf32>
    %258 = vector.extract_strided_slice %193 {offsets = [2, 0], sizes = [1, 8], strides = [1, 1]} : vector<4x8xf32> to vector<1x8xf32>
    %259 = vector.broadcast %257 : vector<16x1xf32> to vector<16x8xf32>
    %260 = vector.broadcast %258 : vector<1x8xf32> to vector<16x8xf32>
    %261 = arith.mulf %259, %260 : vector<16x8xf32>
    %262 = arith.addf %255, %261 : vector<16x8xf32>
    %263 = vector.extract_strided_slice %240 {offsets = [3, 0, 0], sizes = [1, 16, 1], strides = [1, 1, 1]} : vector<4x16x1xf32> to vector<1x16x1xf32>
    %264 = vector.shape_cast %263 : vector<1x16x1xf32> to vector<16x1xf32>
    %265 = vector.extract_strided_slice %193 {offsets = [3, 0], sizes = [1, 8], strides = [1, 1]} : vector<4x8xf32> to vector<1x8xf32>
    %266 = vector.broadcast %264 : vector<16x1xf32> to vector<16x8xf32>
    %267 = vector.broadcast %265 : vector<1x8xf32> to vector<16x8xf32>
    %268 = arith.mulf %266, %267 : vector<16x8xf32>
    %269 = arith.addf %262, %268 : vector<16x8xf32>
    %270 = arith.addf %235, %269 : vector<16x8xf32>
    %271 = vector.extract_strided_slice %24 {offsets = [0, 24], sizes = [16, 8], strides = [1, 1]} : vector<16x32xf32> to vector<16x8xf32>
    %272 = vector.extract_strided_slice %25 {offsets = [0, 24], sizes = [16, 8], strides = [1, 1]} : vector<16x32xf32> to vector<16x8xf32>
    %273 = vector.extract_strided_slice %26 {offsets = [0, 24], sizes = [16, 8], strides = [1, 1]} : vector<16x32xf32> to vector<16x8xf32>
    %274 = vector.extract_strided_slice %16 {offsets = [0, 24], sizes = [4, 8], strides = [1, 1]} : vector<4x32xf32> to vector<4x8xf32>
    %cst_45 = arith.constant dense<0.000000e+00> : vector<16x4xf32>
    %275 = tpu.matmul %271, %274, %cst_45 {dimension_numbers = #tpu.dot_dimension_numbers<[1], [1], [0], [0], [0, 0, 1, 0], [], []>} : vector<16x8xf32>, vector<4x8xf32>, vector<16x4xf32> -> vector<16x4xf32>
    %cst_46 = arith.constant dense<0.000000e+00> : vector<16x16xf32>
    %276 = tpu.matmul %271, %272, %cst_46 {dimension_numbers = #tpu.dot_dimension_numbers<[1], [1], [0], [0], [0, 0, 1, 0], [], []>} : vector<16x8xf32>, vector<16x8xf32>, vector<16x16xf32> -> vector<16x16xf32>
    %277 = vector.extract_strided_slice %275 {offsets = [0, 0], sizes = [16, 1], strides = [1, 1]} : vector<16x4xf32> to vector<16x1xf32>
    %278 = vector.extract_strided_slice %4 {offsets = [0, 0, 0], sizes = [1, 16, 16], strides = [1, 1, 1]} : vector<4x16x16xf32> to vector<1x16x16xf32>
    %279 = vector.shape_cast %278 : vector<1x16x16xf32> to vector<16x16xf32>
    %280 = vector.broadcast %277 : vector<16x1xf32> to vector<16x16xf32>
    %281 = arith.mulf %280, %279 : vector<16x16xf32>
    %cst_47 = arith.constant 0.000000e+00 : f32
    %282 = vector.broadcast %cst_47 : f32 to vector<16x16xf32>
    %283 = arith.addf %282, %281 : vector<16x16xf32>
    %284 = vector.extract_strided_slice %275 {offsets = [0, 1], sizes = [16, 1], strides = [1, 1]} : vector<16x4xf32> to vector<16x1xf32>
    %285 = vector.extract_strided_slice %4 {offsets = [1, 0, 0], sizes = [1, 16, 16], strides = [1, 1, 1]} : vector<4x16x16xf32> to vector<1x16x16xf32>
    %286 = vector.shape_cast %285 : vector<1x16x16xf32> to vector<16x16xf32>
    %287 = vector.broadcast %284 : vector<16x1xf32> to vector<16x16xf32>
    %288 = arith.mulf %287, %286 : vector<16x16xf32>
    %289 = arith.addf %283, %288 : vector<16x16xf32>
    %290 = vector.extract_strided_slice %275 {offsets = [0, 2], sizes = [16, 1], strides = [1, 1]} : vector<16x4xf32> to vector<16x1xf32>
    %291 = vector.extract_strided_slice %4 {offsets = [2, 0, 0], sizes = [1, 16, 16], strides = [1, 1, 1]} : vector<4x16x16xf32> to vector<1x16x16xf32>
    %292 = vector.shape_cast %291 : vector<1x16x16xf32> to vector<16x16xf32>
    %293 = vector.broadcast %290 : vector<16x1xf32> to vector<16x16xf32>
    %294 = arith.mulf %293, %292 : vector<16x16xf32>
    %295 = arith.addf %289, %294 : vector<16x16xf32>
    %296 = vector.extract_strided_slice %275 {offsets = [0, 3], sizes = [16, 1], strides = [1, 1]} : vector<16x4xf32> to vector<16x1xf32>
    %297 = vector.extract_strided_slice %4 {offsets = [3, 0, 0], sizes = [1, 16, 16], strides = [1, 1, 1]} : vector<4x16x16xf32> to vector<1x16x16xf32>
    %298 = vector.shape_cast %297 : vector<1x16x16xf32> to vector<16x16xf32>
    %299 = vector.broadcast %296 : vector<16x1xf32> to vector<16x16xf32>
    %300 = arith.mulf %299, %298 : vector<16x16xf32>
    %301 = arith.addf %295, %300 : vector<16x16xf32>
    %302 = arith.addf %276, %301 : vector<16x16xf32>
    %303 = arith.addf %302, %9 : vector<16x16xf32>
    %cst_48 = arith.constant dense<0xFF800000> : vector<16xf32>
    %304 = vector.multi_reduction <maximumf>, %303, %cst_48 [1] : vector<16x16xf32> to vector<16xf32>
    %305 = vector.shape_cast %304 : vector<16xf32> to vector<16x1xf32>
    %306 = vector.broadcast %305 : vector<16x1xf32> to vector<16x16xf32>
    %307 = arith.subf %303, %306 : vector<16x16xf32>
    %308 = math.exp %307 : vector<16x16xf32>
    %cst_49 = arith.constant dense<0.000000e+00> : vector<16xf32>
    %309 = vector.multi_reduction <add>, %308, %cst_49 [1] : vector<16x16xf32> to vector<16xf32>
    %310 = vector.shape_cast %309 : vector<16xf32> to vector<16x1xf32>
    %cst_50 = arith.constant 9.99999968E-21 : f32
    %311 = vector.broadcast %cst_50 : f32 to vector<16x1xf32>
    %312 = arith.maximumf %310, %311 : vector<16x1xf32>
    %313 = tpu.reciprocal %312 {approx = true} : vector<16x1xf32> -> vector<16x1xf32>
    %314 = vector.broadcast %313 : vector<16x1xf32> to vector<16x16xf32>
    %315 = arith.mulf %308, %314 : vector<16x16xf32>
    %cst_51 = arith.constant dense<0.000000e+00> : vector<16x8xf32>
    %316 = tpu.matmul %315, %273, %cst_51 {dimension_numbers = #tpu.dot_dimension_numbers<[1], [0], [0], [1], [0, 0, 1, 1], [], []>} : vector<16x16xf32>, vector<16x8xf32>, vector<16x8xf32> -> vector<16x8xf32>
    %317 = vector.shape_cast %315 : vector<16x16xf32> to vector<1x16x16xf32>
    %318 = vector.broadcast %317 : vector<1x16x16xf32> to vector<4x16x16xf32>
    %319 = arith.mulf %4, %318 : vector<4x16x16xf32>
    %cst_52 = arith.constant dense<0.000000e+00> : vector<4x16xf32>
    %320 = vector.multi_reduction <add>, %319, %cst_52 [2] : vector<4x16x16xf32> to vector<4x16xf32>
    %321 = vector.shape_cast %320 : vector<4x16xf32> to vector<4x16x1xf32>
    %322 = vector.extract_strided_slice %321 {offsets = [0, 0, 0], sizes = [1, 16, 1], strides = [1, 1, 1]} : vector<4x16x1xf32> to vector<1x16x1xf32>
    %323 = vector.shape_cast %322 : vector<1x16x1xf32> to vector<16x1xf32>
    %324 = vector.extract_strided_slice %274 {offsets = [0, 0], sizes = [1, 8], strides = [1, 1]} : vector<4x8xf32> to vector<1x8xf32>
    %325 = vector.broadcast %323 : vector<16x1xf32> to vector<16x8xf32>
    %326 = vector.broadcast %324 : vector<1x8xf32> to vector<16x8xf32>
    %327 = arith.mulf %325, %326 : vector<16x8xf32>
    %cst_53 = arith.constant 0.000000e+00 : f32
    %328 = vector.broadcast %cst_53 : f32 to vector<16x8xf32>
    %329 = arith.addf %328, %327 : vector<16x8xf32>
    %330 = vector.extract_strided_slice %321 {offsets = [1, 0, 0], sizes = [1, 16, 1], strides = [1, 1, 1]} : vector<4x16x1xf32> to vector<1x16x1xf32>
    %331 = vector.shape_cast %330 : vector<1x16x1xf32> to vector<16x1xf32>
    %332 = vector.extract_strided_slice %274 {offsets = [1, 0], sizes = [1, 8], strides = [1, 1]} : vector<4x8xf32> to vector<1x8xf32>
    %333 = vector.broadcast %331 : vector<16x1xf32> to vector<16x8xf32>
    %334 = vector.broadcast %332 : vector<1x8xf32> to vector<16x8xf32>
    %335 = arith.mulf %333, %334 : vector<16x8xf32>
    %336 = arith.addf %329, %335 : vector<16x8xf32>
    %337 = vector.extract_strided_slice %321 {offsets = [2, 0, 0], sizes = [1, 16, 1], strides = [1, 1, 1]} : vector<4x16x1xf32> to vector<1x16x1xf32>
    %338 = vector.shape_cast %337 : vector<1x16x1xf32> to vector<16x1xf32>
    %339 = vector.extract_strided_slice %274 {offsets = [2, 0], sizes = [1, 8], strides = [1, 1]} : vector<4x8xf32> to vector<1x8xf32>
    %340 = vector.broadcast %338 : vector<16x1xf32> to vector<16x8xf32>
    %341 = vector.broadcast %339 : vector<1x8xf32> to vector<16x8xf32>
    %342 = arith.mulf %340, %341 : vector<16x8xf32>
    %343 = arith.addf %336, %342 : vector<16x8xf32>
    %344 = vector.extract_strided_slice %321 {offsets = [3, 0, 0], sizes = [1, 16, 1], strides = [1, 1, 1]} : vector<4x16x1xf32> to vector<1x16x1xf32>
    %345 = vector.shape_cast %344 : vector<1x16x1xf32> to vector<16x1xf32>
    %346 = vector.extract_strided_slice %274 {offsets = [3, 0], sizes = [1, 8], strides = [1, 1]} : vector<4x8xf32> to vector<1x8xf32>
    %347 = vector.broadcast %345 : vector<16x1xf32> to vector<16x8xf32>
    %348 = vector.broadcast %346 : vector<1x8xf32> to vector<16x8xf32>
    %349 = arith.mulf %347, %348 : vector<16x8xf32>
    %350 = arith.addf %343, %349 : vector<16x8xf32>
    %351 = arith.addf %316, %350 : vector<16x8xf32>
    %352 = tpu.concatenate %108, %189, %270, %351 in 1 : vector<16x8xf32>, vector<16x8xf32>, vector<16x8xf32>, vector<16x8xf32> -> vector<16x32xf32>
    %353 = vector.broadcast %15 : vector<16x1xf32> to vector<16x32xf32>
    %354 = arith.mulf %352, %353 : vector<16x32xf32>
    %355 = arith.addf %354, %27 : vector<16x32xf32>
    %cst_54 = arith.constant dense<0.000000e+00> : vector<32xf32>
    %356 = vector.multi_reduction <add>, %355, %cst_54 [0] : vector<16x32xf32> to vector<32xf32>
    %357 = vector.shape_cast %356 : vector<32xf32> to vector<1x32xf32>
    %cst_55 = arith.constant 1.600000e+01 : f32
    %358 = vector.broadcast %cst_55 : f32 to vector<1x32xf32>
    %359 = arith.divf %357, %358 : vector<1x32xf32>
    %360 = vector.broadcast %359 : vector<1x32xf32> to vector<16x32xf32>
    %361 = arith.subf %355, %360 : vector<16x32xf32>
    %362 = arith.mulf %361, %361 : vector<16x32xf32>
    %cst_56 = arith.constant dense<0.000000e+00> : vector<32xf32>
    %363 = vector.multi_reduction <add>, %362, %cst_56 [0] : vector<16x32xf32> to vector<32xf32>
    %364 = vector.shape_cast %363 : vector<32xf32> to vector<1x32xf32>
    %cst_57 = arith.constant 1.600000e+01 : f32
    %365 = vector.broadcast %cst_57 : f32 to vector<1x32xf32>
    %366 = arith.divf %364, %365 : vector<1x32xf32>
    %367 = vector.broadcast %359 : vector<1x32xf32> to vector<16x32xf32>
    %368 = arith.subf %355, %367 : vector<16x32xf32>
    %cst_58 = arith.constant 9.99999974E-6 : f32
    %369 = vector.broadcast %cst_58 : f32 to vector<1x32xf32>
    %370 = arith.addf %366, %369 : vector<1x32xf32>
    %371 = math.rsqrt %370 : vector<1x32xf32>
    %372 = vector.broadcast %371 : vector<1x32xf32> to vector<16x32xf32>
    %373 = arith.mulf %368, %372 : vector<16x32xf32>
    %c0_59 = arith.constant 0 : index
    %c0_60 = arith.constant 0 : index
    %374 = vector.load %arg7[%c0_59, %c0_60] : memref<1x32xf32, #tpu.memory_space<vmem>>, vector<1x32xf32>
    %375 = vector.broadcast %374 : vector<1x32xf32> to vector<16x32xf32>
    %376 = arith.mulf %373, %375 : vector<16x32xf32>
    %c0_61 = arith.constant 0 : index
    %c0_62 = arith.constant 0 : index
    %377 = vector.load %arg8[%c0_61, %c0_62] : memref<1x32xf32, #tpu.memory_space<vmem>>, vector<1x32xf32>
    %378 = vector.broadcast %377 : vector<1x32xf32> to vector<16x32xf32>
    %379 = arith.addf %376, %378 : vector<16x32xf32>
    %380 = tpu.concatenate %379, %0 in 1 : vector<16x32xf32>, vector<16x4xf32> -> vector<16x36xf32>
    %c0_63 = arith.constant 0 : index
    %c0_64 = arith.constant 0 : index
    %381 = vector.load %arg11[%c0_63, %c0_64] : memref<4x36xf32, #tpu.memory_space<vmem>>, vector<4x36xf32>
    %c0_65 = arith.constant 0 : index
    %c0_66 = arith.constant 0 : index
    %382 = vector.load %arg9[%c0_65, %c0_66] : memref<36x144xf32, #tpu.memory_space<vmem>>, vector<36x144xf32>
    %cst_67 = arith.constant dense<0.000000e+00> : vector<16x144xf32>
    %383 = tpu.matmul %380, %382, %cst_67 {dimension_numbers = #tpu.dot_dimension_numbers<[1], [0], [0], [1], [0, 0, 1, 1], [], []>} : vector<16x36xf32>, vector<36x144xf32>, vector<16x144xf32> -> vector<16x144xf32>
    %c0_68 = arith.constant 0 : index
    %c0_69 = arith.constant 0 : index
    %384 = vector.load %arg10[%c0_68, %c0_69] : memref<1x144xf32, #tpu.memory_space<vmem>>, vector<1x144xf32>
    %385 = vector.broadcast %384 : vector<1x144xf32> to vector<16x144xf32>
    %386 = arith.addf %383, %385 : vector<16x144xf32>
    %387 = vector.extract_strided_slice %386 {offsets = [0, 0], sizes = [16, 36], strides = [1, 1]} : vector<16x144xf32> to vector<16x36xf32>
    %cst_70 = arith.constant 0.166666672 : f32
    %388 = vector.broadcast %cst_70 : f32 to vector<16x36xf32>
    %389 = arith.mulf %387, %388 : vector<16x36xf32>
    %390 = vector.extract_strided_slice %386 {offsets = [0, 36], sizes = [16, 36], strides = [1, 1]} : vector<16x144xf32> to vector<16x36xf32>
    %391 = vector.extract_strided_slice %386 {offsets = [0, 72], sizes = [16, 36], strides = [1, 1]} : vector<16x144xf32> to vector<16x36xf32>
    %392 = vector.extract_strided_slice %386 {offsets = [0, 108], sizes = [16, 36], strides = [1, 1]} : vector<16x144xf32> to vector<16x36xf32>
    %cst_71 = arith.constant dense<0.000000e+00> : vector<16x4xf32>
    %393 = tpu.matmul %389, %381, %cst_71 {dimension_numbers = #tpu.dot_dimension_numbers<[1], [1], [0], [0], [0, 0, 1, 0], [], []>} : vector<16x36xf32>, vector<4x36xf32>, vector<16x4xf32> -> vector<16x4xf32>
    %cst_72 = arith.constant dense<0.000000e+00> : vector<16x16xf32>
    %394 = tpu.matmul %389, %390, %cst_72 {dimension_numbers = #tpu.dot_dimension_numbers<[1], [1], [0], [0], [0, 0, 1, 0], [], []>} : vector<16x36xf32>, vector<16x36xf32>, vector<16x16xf32> -> vector<16x16xf32>
    %395 = vector.extract_strided_slice %393 {offsets = [0, 0], sizes = [16, 1], strides = [1, 1]} : vector<16x4xf32> to vector<16x1xf32>
    %396 = vector.extract_strided_slice %4 {offsets = [0, 0, 0], sizes = [1, 16, 16], strides = [1, 1, 1]} : vector<4x16x16xf32> to vector<1x16x16xf32>
    %397 = vector.shape_cast %396 : vector<1x16x16xf32> to vector<16x16xf32>
    %398 = vector.broadcast %395 : vector<16x1xf32> to vector<16x16xf32>
    %399 = arith.mulf %398, %397 : vector<16x16xf32>
    %cst_73 = arith.constant 0.000000e+00 : f32
    %400 = vector.broadcast %cst_73 : f32 to vector<16x16xf32>
    %401 = arith.addf %400, %399 : vector<16x16xf32>
    %402 = vector.extract_strided_slice %393 {offsets = [0, 1], sizes = [16, 1], strides = [1, 1]} : vector<16x4xf32> to vector<16x1xf32>
    %403 = vector.extract_strided_slice %4 {offsets = [1, 0, 0], sizes = [1, 16, 16], strides = [1, 1, 1]} : vector<4x16x16xf32> to vector<1x16x16xf32>
    %404 = vector.shape_cast %403 : vector<1x16x16xf32> to vector<16x16xf32>
    %405 = vector.broadcast %402 : vector<16x1xf32> to vector<16x16xf32>
    %406 = arith.mulf %405, %404 : vector<16x16xf32>
    %407 = arith.addf %401, %406 : vector<16x16xf32>
    %408 = vector.extract_strided_slice %393 {offsets = [0, 2], sizes = [16, 1], strides = [1, 1]} : vector<16x4xf32> to vector<16x1xf32>
    %409 = vector.extract_strided_slice %4 {offsets = [2, 0, 0], sizes = [1, 16, 16], strides = [1, 1, 1]} : vector<4x16x16xf32> to vector<1x16x16xf32>
    %410 = vector.shape_cast %409 : vector<1x16x16xf32> to vector<16x16xf32>
    %411 = vector.broadcast %408 : vector<16x1xf32> to vector<16x16xf32>
    %412 = arith.mulf %411, %410 : vector<16x16xf32>
    %413 = arith.addf %407, %412 : vector<16x16xf32>
    %414 = vector.extract_strided_slice %393 {offsets = [0, 3], sizes = [16, 1], strides = [1, 1]} : vector<16x4xf32> to vector<16x1xf32>
    %415 = vector.extract_strided_slice %4 {offsets = [3, 0, 0], sizes = [1, 16, 16], strides = [1, 1, 1]} : vector<4x16x16xf32> to vector<1x16x16xf32>
    %416 = vector.shape_cast %415 : vector<1x16x16xf32> to vector<16x16xf32>
    %417 = vector.broadcast %414 : vector<16x1xf32> to vector<16x16xf32>
    %418 = arith.mulf %417, %416 : vector<16x16xf32>
    %419 = arith.addf %413, %418 : vector<16x16xf32>
    %420 = arith.addf %394, %419 : vector<16x16xf32>
    %421 = arith.addf %420, %9 : vector<16x16xf32>
    %cst_74 = arith.constant dense<0xFF800000> : vector<16xf32>
    %422 = vector.multi_reduction <maximumf>, %421, %cst_74 [1] : vector<16x16xf32> to vector<16xf32>
    %423 = vector.shape_cast %422 : vector<16xf32> to vector<16x1xf32>
    %424 = vector.broadcast %423 : vector<16x1xf32> to vector<16x16xf32>
    %425 = arith.subf %421, %424 : vector<16x16xf32>
    %426 = math.exp %425 : vector<16x16xf32>
    %cst_75 = arith.constant dense<0.000000e+00> : vector<16xf32>
    %427 = vector.multi_reduction <add>, %426, %cst_75 [1] : vector<16x16xf32> to vector<16xf32>
    %428 = vector.shape_cast %427 : vector<16xf32> to vector<16x1xf32>
    %cst_76 = arith.constant 9.99999968E-21 : f32
    %429 = vector.broadcast %cst_76 : f32 to vector<16x1xf32>
    %430 = arith.maximumf %428, %429 : vector<16x1xf32>
    %431 = tpu.reciprocal %430 {approx = true} : vector<16x1xf32> -> vector<16x1xf32>
    %432 = vector.broadcast %431 : vector<16x1xf32> to vector<16x16xf32>
    %433 = arith.mulf %426, %432 : vector<16x16xf32>
    %cst_77 = arith.constant dense<0.000000e+00> : vector<16x36xf32>
    %434 = tpu.matmul %433, %391, %cst_77 {dimension_numbers = #tpu.dot_dimension_numbers<[1], [0], [0], [1], [0, 0, 1, 1], [], []>} : vector<16x16xf32>, vector<16x36xf32>, vector<16x36xf32> -> vector<16x36xf32>
    %435 = vector.shape_cast %433 : vector<16x16xf32> to vector<1x16x16xf32>
    %436 = vector.broadcast %435 : vector<1x16x16xf32> to vector<4x16x16xf32>
    %437 = arith.mulf %4, %436 : vector<4x16x16xf32>
    %cst_78 = arith.constant dense<0.000000e+00> : vector<4x16xf32>
    %438 = vector.multi_reduction <add>, %437, %cst_78 [2] : vector<4x16x16xf32> to vector<4x16xf32>
    %439 = vector.shape_cast %438 : vector<4x16xf32> to vector<4x16x1xf32>
    %440 = vector.extract_strided_slice %439 {offsets = [0, 0, 0], sizes = [1, 16, 1], strides = [1, 1, 1]} : vector<4x16x1xf32> to vector<1x16x1xf32>
    %441 = vector.shape_cast %440 : vector<1x16x1xf32> to vector<16x1xf32>
    %442 = vector.extract_strided_slice %381 {offsets = [0, 0], sizes = [1, 36], strides = [1, 1]} : vector<4x36xf32> to vector<1x36xf32>
    %443 = vector.broadcast %441 : vector<16x1xf32> to vector<16x36xf32>
    %444 = vector.broadcast %442 : vector<1x36xf32> to vector<16x36xf32>
    %445 = arith.mulf %443, %444 : vector<16x36xf32>
    %cst_79 = arith.constant 0.000000e+00 : f32
    %446 = vector.broadcast %cst_79 : f32 to vector<16x36xf32>
    %447 = arith.addf %446, %445 : vector<16x36xf32>
    %448 = vector.extract_strided_slice %439 {offsets = [1, 0, 0], sizes = [1, 16, 1], strides = [1, 1, 1]} : vector<4x16x1xf32> to vector<1x16x1xf32>
    %449 = vector.shape_cast %448 : vector<1x16x1xf32> to vector<16x1xf32>
    %450 = vector.extract_strided_slice %381 {offsets = [1, 0], sizes = [1, 36], strides = [1, 1]} : vector<4x36xf32> to vector<1x36xf32>
    %451 = vector.broadcast %449 : vector<16x1xf32> to vector<16x36xf32>
    %452 = vector.broadcast %450 : vector<1x36xf32> to vector<16x36xf32>
    %453 = arith.mulf %451, %452 : vector<16x36xf32>
    %454 = arith.addf %447, %453 : vector<16x36xf32>
    %455 = vector.extract_strided_slice %439 {offsets = [2, 0, 0], sizes = [1, 16, 1], strides = [1, 1, 1]} : vector<4x16x1xf32> to vector<1x16x1xf32>
    %456 = vector.shape_cast %455 : vector<1x16x1xf32> to vector<16x1xf32>
    %457 = vector.extract_strided_slice %381 {offsets = [2, 0], sizes = [1, 36], strides = [1, 1]} : vector<4x36xf32> to vector<1x36xf32>
    %458 = vector.broadcast %456 : vector<16x1xf32> to vector<16x36xf32>
    %459 = vector.broadcast %457 : vector<1x36xf32> to vector<16x36xf32>
    %460 = arith.mulf %458, %459 : vector<16x36xf32>
    %461 = arith.addf %454, %460 : vector<16x36xf32>
    %462 = vector.extract_strided_slice %439 {offsets = [3, 0, 0], sizes = [1, 16, 1], strides = [1, 1, 1]} : vector<4x16x1xf32> to vector<1x16x1xf32>
    %463 = vector.shape_cast %462 : vector<1x16x1xf32> to vector<16x1xf32>
    %464 = vector.extract_strided_slice %381 {offsets = [3, 0], sizes = [1, 36], strides = [1, 1]} : vector<4x36xf32> to vector<1x36xf32>
    %465 = vector.broadcast %463 : vector<16x1xf32> to vector<16x36xf32>
    %466 = vector.broadcast %464 : vector<1x36xf32> to vector<16x36xf32>
    %467 = arith.mulf %465, %466 : vector<16x36xf32>
    %468 = arith.addf %461, %467 : vector<16x36xf32>
    %469 = arith.addf %434, %468 : vector<16x36xf32>
    %470 = vector.broadcast %15 : vector<16x1xf32> to vector<16x36xf32>
    %471 = arith.mulf %469, %470 : vector<16x36xf32>
    %472 = arith.addf %471, %392 : vector<16x36xf32>
    %cst_80 = arith.constant dense<0.000000e+00> : vector<36xf32>
    %473 = vector.multi_reduction <add>, %472, %cst_80 [0] : vector<16x36xf32> to vector<36xf32>
    %474 = vector.shape_cast %473 : vector<36xf32> to vector<1x36xf32>
    %cst_81 = arith.constant 1.600000e+01 : f32
    %475 = vector.broadcast %cst_81 : f32 to vector<1x36xf32>
    %476 = arith.divf %474, %475 : vector<1x36xf32>
    %477 = vector.broadcast %476 : vector<1x36xf32> to vector<16x36xf32>
    %478 = arith.subf %472, %477 : vector<16x36xf32>
    %479 = arith.mulf %478, %478 : vector<16x36xf32>
    %cst_82 = arith.constant dense<0.000000e+00> : vector<36xf32>
    %480 = vector.multi_reduction <add>, %479, %cst_82 [0] : vector<16x36xf32> to vector<36xf32>
    %481 = vector.shape_cast %480 : vector<36xf32> to vector<1x36xf32>
    %cst_83 = arith.constant 1.600000e+01 : f32
    %482 = vector.broadcast %cst_83 : f32 to vector<1x36xf32>
    %483 = arith.divf %481, %482 : vector<1x36xf32>
    %484 = vector.broadcast %476 : vector<1x36xf32> to vector<16x36xf32>
    %485 = arith.subf %472, %484 : vector<16x36xf32>
    %cst_84 = arith.constant 9.99999974E-6 : f32
    %486 = vector.broadcast %cst_84 : f32 to vector<1x36xf32>
    %487 = arith.addf %483, %486 : vector<1x36xf32>
    %488 = math.rsqrt %487 : vector<1x36xf32>
    %489 = vector.broadcast %488 : vector<1x36xf32> to vector<16x36xf32>
    %490 = arith.mulf %485, %489 : vector<16x36xf32>
    %c0_85 = arith.constant 0 : index
    %c0_86 = arith.constant 0 : index
    %491 = vector.load %arg12[%c0_85, %c0_86] : memref<1x36xf32, #tpu.memory_space<vmem>>, vector<1x36xf32>
    %492 = vector.broadcast %491 : vector<1x36xf32> to vector<16x36xf32>
    %493 = arith.mulf %490, %492 : vector<16x36xf32>
    %c0_87 = arith.constant 0 : index
    %c0_88 = arith.constant 0 : index
    %494 = vector.load %arg13[%c0_87, %c0_88] : memref<1x36xf32, #tpu.memory_space<vmem>>, vector<1x36xf32>
    %495 = vector.broadcast %494 : vector<1x36xf32> to vector<16x36xf32>
    %496 = arith.addf %493, %495 : vector<16x36xf32>
    %497 = tpu.concatenate %496, %380 in 1 : vector<16x36xf32>, vector<16x36xf32> -> vector<16x72xf32>
    %c0_89 = arith.constant 0 : index
    %c0_90 = arith.constant 0 : index
    %498 = vector.load %arg3[%c0_89, %c0_90] : memref<8x16xf32, #tpu.memory_space<vmem>>, vector<8x16xf32>
    %cst_91 = arith.constant dense<0.000000e+00> : vector<8x72xf32>
    %499 = tpu.matmul %498, %497, %cst_91 {dimension_numbers = #tpu.dot_dimension_numbers<[1], [0], [0], [1], [0, 0, 1, 1], [], []>} : vector<8x16xf32>, vector<16x72xf32>, vector<8x72xf32> -> vector<8x72xf32>
    %cst_92 = arith.constant dense<0.000000e+00> : vector<8xf32>
    %500 = vector.multi_reduction <add>, %498, %cst_92 [1] : vector<8x16xf32> to vector<8xf32>
    %501 = vector.shape_cast %500 : vector<8xf32> to vector<8x1xf32>
    %cst_93 = arith.constant 1.000000e+00 : f32
    %502 = vector.broadcast %cst_93 : f32 to vector<8x1xf32>
    %503 = arith.maximumf %501, %502 : vector<8x1xf32>
    %504 = tpu.reciprocal %503 {approx = true} : vector<8x1xf32> -> vector<8x1xf32>
    %505 = vector.broadcast %504 : vector<8x1xf32> to vector<8x72xf32>
    %506 = arith.mulf %499, %505 : vector<8x72xf32>
    %507 = vector.shape_cast %498 : vector<8x16xf32> to vector<8x16x1xf32>
    %508 = vector.extract_strided_slice %507 {offsets = [0, 0, 0], sizes = [1, 16, 1], strides = [1, 1, 1]} : vector<8x16x1xf32> to vector<1x16x1xf32>
    %509 = vector.shape_cast %508 : vector<1x16x1xf32> to vector<16x1xf32>
    %cst_94 = arith.constant 0.000000e+00 : f32
    %510 = vector.broadcast %cst_94 : f32 to vector<16x1xf32>
    %511 = arith.cmpf ogt, %509, %510 : vector<16x1xf32>
    %cst_95 = arith.constant -1.000000e+30 : f32
    %512 = vector.shape_cast %511 : vector<16x1xi1> to vector<16x1xi1>
    %513 = vector.broadcast %512 : vector<16x1xi1> to vector<16x72xi1>
    %514 = vector.broadcast %cst_95 : f32 to vector<16x72xf32>
    %515 = arith.select %513, %497, %514 : vector<16x72xi1>, vector<16x72xf32>
    %cst_96 = arith.constant dense<0xFF800000> : vector<72xf32>
    %516 = vector.multi_reduction <maximumf>, %515, %cst_96 [0] : vector<16x72xf32> to vector<72xf32>
    %517 = vector.shape_cast %516 : vector<72xf32> to vector<1x72xf32>
    %518 = vector.extract_strided_slice %507 {offsets = [1, 0, 0], sizes = [1, 16, 1], strides = [1, 1, 1]} : vector<8x16x1xf32> to vector<1x16x1xf32>
    %519 = vector.shape_cast %518 : vector<1x16x1xf32> to vector<16x1xf32>
    %cst_97 = arith.constant 0.000000e+00 : f32
    %520 = vector.broadcast %cst_97 : f32 to vector<16x1xf32>
    %521 = arith.cmpf ogt, %519, %520 : vector<16x1xf32>
    %cst_98 = arith.constant -1.000000e+30 : f32
    %522 = vector.shape_cast %521 : vector<16x1xi1> to vector<16x1xi1>
    %523 = vector.broadcast %522 : vector<16x1xi1> to vector<16x72xi1>
    %524 = vector.broadcast %cst_98 : f32 to vector<16x72xf32>
    %525 = arith.select %523, %497, %524 : vector<16x72xi1>, vector<16x72xf32>
    %cst_99 = arith.constant dense<0xFF800000> : vector<72xf32>
    %526 = vector.multi_reduction <maximumf>, %525, %cst_99 [0] : vector<16x72xf32> to vector<72xf32>
    %527 = vector.shape_cast %526 : vector<72xf32> to vector<1x72xf32>
    %cst_100 = arith.constant 0.000000e+00 : f32
    %528 = vector.broadcast %cst_100 : f32 to vector<6x72xf32>
    %529 = tpu.concatenate %517, %527, %528 in 0 : vector<1x72xf32>, vector<1x72xf32>, vector<6x72xf32> -> vector<8x72xf32>
    %c0_101 = arith.constant 0 : index
    %c0_102 = arith.constant 0 : index
    %530 = vector.load %arg14[%c0_101, %c0_102] : memref<72x108xf32, #tpu.memory_space<vmem>>, vector<72x108xf32>
    %cst_103 = arith.constant dense<0.000000e+00> : vector<8x108xf32>
    %531 = tpu.matmul %499, %530, %cst_103 {dimension_numbers = #tpu.dot_dimension_numbers<[1], [0], [0], [1], [0, 0, 1, 1], [], []>} : vector<8x72xf32>, vector<72x108xf32>, vector<8x108xf32> -> vector<8x108xf32>
    %c0_104 = arith.constant 0 : index
    %c0_105 = arith.constant 0 : index
    %532 = vector.load %arg15[%c0_104, %c0_105] : memref<72x108xf32, #tpu.memory_space<vmem>>, vector<72x108xf32>
    %cst_106 = arith.constant dense<0.000000e+00> : vector<8x108xf32>
    %533 = tpu.matmul %529, %532, %cst_106 {dimension_numbers = #tpu.dot_dimension_numbers<[1], [0], [0], [1], [0, 0, 1, 1], [], []>} : vector<8x72xf32>, vector<72x108xf32>, vector<8x108xf32> -> vector<8x108xf32>
    %534 = arith.addf %531, %533 : vector<8x108xf32>
    %c0_107 = arith.constant 0 : index
    %c0_108 = arith.constant 0 : index
    %535 = vector.load %arg16[%c0_107, %c0_108] : memref<72x108xf32, #tpu.memory_space<vmem>>, vector<72x108xf32>
    %cst_109 = arith.constant dense<0.000000e+00> : vector<8x108xf32>
    %536 = tpu.matmul %506, %535, %cst_109 {dimension_numbers = #tpu.dot_dimension_numbers<[1], [0], [0], [1], [0, 0, 1, 1], [], []>} : vector<8x72xf32>, vector<72x108xf32>, vector<8x108xf32> -> vector<8x108xf32>
    %537 = arith.addf %534, %536 : vector<8x108xf32>
    %c0_110 = arith.constant 0 : index
    %c0_111 = arith.constant 0 : index
    %538 = vector.load %arg17[%c0_110, %c0_111] : memref<1x108xf32, #tpu.memory_space<vmem>>, vector<1x108xf32>
    %539 = vector.broadcast %538 : vector<1x108xf32> to vector<8x108xf32>
    %540 = arith.addf %537, %539 : vector<8x108xf32>
    %c0_112 = arith.constant 0 : index
    %c0_113 = arith.constant 0 : index
    %541 = memref.load %arg20[%c0_112, %c0_113] : memref<1x1xf32, #tpu.memory_space<smem>>
    %cst_114 = arith.constant 0.000000e+00 : f32
    %542 = vector.broadcast %cst_114 : f32 to vector<8x108xf32>
    %543 = arith.cmpf ogt, %540, %542 : vector<8x108xf32>
    %544 = vector.broadcast %541 : f32 to vector<8x108xf32>
    %545 = arith.mulf %544, %540 : vector<8x108xf32>
    %546 = arith.select %543, %540, %545 : vector<8x108xi1>, vector<8x108xf32>
    %c0_115 = arith.constant 0 : index
    %c0_116 = arith.constant 0 : index
    %547 = vector.load %arg18[%c0_115, %c0_116] : memref<108x128xf32, #tpu.memory_space<vmem>>, vector<108x128xf32>
    %cst_117 = arith.constant dense<0.000000e+00> : vector<8x128xf32>
    %548 = tpu.matmul %546, %547, %cst_117 {dimension_numbers = #tpu.dot_dimension_numbers<[1], [0], [0], [1], [0, 0, 1, 1], [], []>} : vector<8x108xf32>, vector<108x128xf32>, vector<8x128xf32> -> vector<8x128xf32>
    %c0_118 = arith.constant 0 : index
    %c0_119 = arith.constant 0 : index
    %549 = vector.load %arg19[%c0_118, %c0_119] : memref<1x128xf32, #tpu.memory_space<vmem>>, vector<1x128xf32>
    %550 = vector.broadcast %549 : vector<1x128xf32> to vector<8x128xf32>
    %551 = arith.addf %548, %550 : vector<8x128xf32>
    %cst_120 = arith.constant dense<0xFF800000> : vector<8xf32>
    %552 = vector.multi_reduction <maximumf>, %551, %cst_120 [1] : vector<8x128xf32> to vector<8xf32>
    %553 = vector.shape_cast %552 : vector<8xf32> to vector<8x1xf32>
    %554 = vector.broadcast %553 : vector<8x1xf32> to vector<8x128xf32>
    %555 = arith.subf %551, %554 : vector<8x128xf32>
    %556 = math.exp %555 : vector<8x128xf32>
    %cst_121 = arith.constant dense<0.000000e+00> : vector<8xf32>
    %557 = vector.multi_reduction <add>, %556, %cst_121 [1] : vector<8x128xf32> to vector<8xf32>
    %558 = vector.shape_cast %557 : vector<8xf32> to vector<8x1xf32>
    %559 = math.log %558 : vector<8x1xf32>
    %560 = vector.broadcast %559 : vector<8x1xf32> to vector<8x128xf32>
    %561 = arith.subf %555, %560 : vector<8x128xf32>
    %c0_122 = arith.constant 0 : index
    %c0_123 = arith.constant 0 : index
    %562 = vector.load %arg21[%c0_122, %c0_123] : memref<8x128xf32, #tpu.memory_space<vmem>>, vector<8x128xf32>
    tpu.vector_store %arg21[%c0_122, %c0_123], %561 {strides = array<i32>} : memref<8x128xf32, #tpu.memory_space<vmem>>, vector<8x128xf32>,
    return
  }
}

</mosaic_0001>

<bundles_post_ra>
// kernel: net_forward.1
= control target key start
LH: loop header
LB: loop body
LE: loop exit
PB: predicated region body
PF: predicated region fallthrough
CT: control target
= control target key end

     0   :  { %s4845_s0 = inlined_call_operand.vmem [shape: f32[16,4], index: 0, kind: input, shape index: {}]   ;;  %s4846_s1 = inlined_call_operand.vmem [shape: bf16[16,16], index: 1, kind: input, shape index: {}]   ;;  %s4847_s2 = inlined_call_operand.vmem [shape: bf16[4,16,16], index: 2, kind: input, shape index: {}]   ;;  %s4848_s3 = inlined_call_operand.vmem [shape: f32[8,16], index: 3, kind: input, shape index: {}]   ;;  %s4849_s4 = inlined_call_operand.vmem [shape: f32[4,128], index: 4, kind: input, shape index: {}]   ;;  %s4850_s5 = inlined_call_operand.hbm [shape: f32[1,128], index: 5, kind: input, shape index: {}]   ;;  %s4851_s6 = inlined_call_operand.hbm [shape: f32[4,32], index: 6, kind: input, shape index: {}]   ;;  %s4852_s7 = inlined_call_operand.hbm [shape: f32[1,32], index: 7, kind: input, shape index: {}]   ;;  %s4853_s8 = inlined_call_operand.hbm [shape: f32[1,32], index: 8, kind: input, shape index: {}]   ;;  %s4854_s9 = inlined_call_operand.hbm [shape: f32[36,144], index: 9, kind: input, shape index: {}]   ;;  %s4855_s10 = inlined_call_operand.vmem [shape: f32[1,144], index: 10, kind: input, shape index: {}]   ;;  %s4856_s11 = inlined_call_operand.hbm [shape: f32[4,36], index: 11, kind: input, shape index: {}]   ;;  %s4857_s12 = inlined_call_operand.hbm [shape: f32[1,36], index: 12, kind: input, shape index: {}]   ;;  %s4858_s13 = inlined_call_operand.hbm [shape: f32[1,36], index: 13, kind: input, shape index: {}]   ;;  %s4859_s14 = inlined_call_operand.hbm [shape: f32[72,108], index: 14, kind: input, shape index: {}]   ;;  %s4860_s15 = inlined_call_operand.hbm [shape: f32[72,108], index: 15, kind: input, shape index: {}]   ;;  %s4861_s16 = inlined_call_operand.hbm [shape: f32[72,108], index: 16, kind: input, shape index: {}]   ;;  %s4862_s17 = inlined_call_operand.hbm [shape: f32[1,108], index: 17, kind: input, shape index: {}]   ;;  %s4863_s18 = inlined_call_operand.hbm [shape: f32[108,128], index: 18, kind: input, shape index: {}]   ;;  %s4864_s19 = inlined_call_operand.hbm [shape: f32[1,128], index: 19, kind: input, shape index: {}]   ;;  %s4865_s20 = inlined_call_operand.<no memory space> [shape: f32[1,1], index: 20, kind: input, shape index: {}]   ;;  %s4866_s21 = inlined_call_operand.vmem [shape: f32[8,128], index: 21, kind: output, shape index: {}]  }
   0x1   :  { %4869 = sst [smem:[#allocation33_spill]] %s4845_s0 }
   0x2   :  { %4870 = sst [smem:[#allocation34_spill]] %s4846_s1 }
   0x3   :  { %4871 = sst [smem:[#allocation35_spill]] %s4847_s2 }
   0x4   :  { %4872 = sst [smem:[#allocation36_spill]] %s4848_s3 }
   0x5   :  { %4873 = sst [smem:[#allocation37_spill]] %s4849_s4 }
   0x6   :  { %4874 = sst [smem:[#allocation38_spill]] %s4850_s5 }
   0x7   :  { %27 = vsyncpa [#allocation4], 0 }
   0x8   :  { %28 = vsyncpa [#allocation6], 0 }
   0x9   :  { %29 = vsyncpa [#allocation9], 0 }
   0xa   :  { %30 = vsyncpa [#allocation12], 0 }
   0xb   :  { %31 = vsyncpa [#allocation15], 0 }
   0xc   :  { %32 = vsyncpa [#allocation18], 0 }
   0xd   :  { %33 = vsyncpa [#allocation21], 0 }
   0xe   :  { %34 = vsyncpa [#allocation24], 0  ;;  %s3970_s2 = smov [#allocation5]   ;;  %s3971_s26 = smov [#allocation8]  }
   0xf   :  { %s61_s25 = sshll.u32 %s3970_s2, 4  ;;  %s81_s27 = sshll.u32 %s3971_s26, 4  ;;  %s62_s25 = int_to_ptr.vmem [resolvable:$true] %s61_s25  ;;  %s82_s27 = int_to_ptr.vmem [resolvable:$true] %s81_s27 }
  0x10   :  { %s3682_s3 = scalar_lea.vmem %s62_s25, 64  ;;  %p3687_p1 = scmp.lt.s32.totalorder %s62_s25, %s62_s25 }
  0x11   :  { %p3683_p0 = scmp.ne.s32.totalorder %s62_s25, %s3682_s3  ;;  %p3688_p2 = scmp.lt.s32.totalorder %s3682_s3, %s3682_s3 }
  0x13   :  { %p3689_p3 = por %p3688_p2, %p3687_p1 }
  0x15   :  { %p3690_p4 = pnand %p3689_p3, %p3683_p0 }
  0x17   :  { %3693 = shalt.err (!%p3690_p4)
}
  0x18   :  { %64 = dma.hbm_to_vmem [thread:$0]  %s4851_s6, 64, %s62_s25, [#allocation6]  }
  0x19   :  { %s3702_s0 = scalar_lea.vmem %s82_s27, 16  ;;  %s3706_s4 = scalar_lea.vmem %s82_s27, 32 }
  0x1a   :  { %p3703_p5 = scmp.ne.s32.totalorder %s82_s27, %s3702_s0  ;;  %p3707_p6 = scmp.lt.s32.totalorder %s82_s27, %s82_s27 }
  0x1b   :  { %p3708_p7 = scmp.lt.s32.totalorder %s3706_s4, %s3702_s0 }
  0x1d   :  { %p3709_p8 = por %p3708_p7, %p3707_p6 }
  0x1f   :  { %p3710_p9 = pnand %p3709_p8, %p3703_p5 }
  0x21   :  { %3713 = shalt.err (!%p3710_p9)
}
  0x22   :  { %84 = dma.hbm_to_vmem [thread:$0]  %s4853_s8, 16, %s82_s27, [#allocation9]  }
  0x23   :  { %s3972_s22 = smov [#allocation11]   ;;  %s3973_s1 = smov [#allocation14]  }
  0x24   :  { %s105_s23 = sshll.u32 %s3972_s22, 4  ;;  %s125_s24 = sshll.u32 %s3973_s1, 4  ;;  %s106_s23 = int_to_ptr.vmem [resolvable:$true] %s105_s23  ;;  %s126_s24 = int_to_ptr.vmem [resolvable:$true] %s125_s24 }
  0x25   :  { %s3722_s2 = scalar_lea.vmem %s106_s23, 64  ;;  %p3727_p11 = scmp.lt.s32.totalorder %s106_s23, %s106_s23 }
  0x26   :  { %p3723_p10 = scmp.ne.s32.totalorder %s106_s23, %s3722_s2  ;;  %p3728_p12 = scmp.lt.s32.totalorder %s3722_s2, %s3722_s2 }
  0x28   :  { %p3729_p13 = por %p3728_p12, %p3727_p11 }
  0x2a   :  { %p3730_p0 = pnand %p3729_p13, %p3723_p10 }
  0x2c   :  { %3733 = shalt.err (!%p3730_p0)
}
  0x2d   :  { %108 = dma.hbm_to_vmem [thread:$0]  %s4856_s11, 64, %s106_s23, [#allocation12]  }
  0x2e   :  { %s3742_s26 = scalar_lea.vmem %s126_s24, 16  ;;  %s3746_s8 = scalar_lea.vmem %s126_s24, 32 }
  0x2f   :  { %p3743_p1 = scmp.ne.s32.totalorder %s126_s24, %s3742_s26  ;;  %p3747_p2 = scmp.lt.s32.totalorder %s126_s24, %s126_s24 }
  0x30   :  { %p3748_p3 = scmp.lt.s32.totalorder %s3746_s8, %s3742_s26 }
  0x32   :  { %p3749_p4 = por %p3748_p3, %p3747_p2 }
  0x34   :  { %p3750_p5 = pnand %p3749_p4, %p3743_p1 }
  0x36   :  { %3753 = shalt.err (!%p3750_p5)
}
  0x37   :  { %128 = dma.hbm_to_vmem [thread:$0]  %s4858_s13, 16, %s126_s24, [#allocation15]  }
  0x38   :  { %s3974_s28 = smov [#allocation17]   ;;  %s3975_s0 = smov [#allocation20]  }
  0x39   :  { %s146_s29 = sshll.u32 %s3974_s28, 4  ;;  %s171_s4 = sshll.u32 %s3975_s0, 4  ;;  %s147_s29 = int_to_ptr.vmem [resolvable:$true] %s146_s29  ;;  %s172_s4 = int_to_ptr.vmem [resolvable:$true] %s171_s4 }
  0x3a   :  { %s3762_s30 = scalar_lea.vmem %s147_s29, 1152  ;;  %p3767_p7 = scmp.lt.s32.totalorder %s147_s29, %s147_s29 }
  0x3b   :  { %p3763_p6 = scmp.ne.s32.totalorder %s147_s29, %s3762_s30  ;;  %p3768_p8 = scmp.lt.s32.totalorder %s3762_s30, %s3762_s30 }
  0x3d   :  { %p3769_p9 = por %p3768_p8, %p3767_p7 }
  0x3f   :  { %p3770_p10 = pnand %p3769_p9, %p3763_p6 }
  0x41   :  { %3773 = shalt.err (!%p3770_p10)
}
  0x42   :  { %s3976_s11 = smov 128   ;;  %s3977_s5 = smov 8  }
  0x43   :  { %152 = dma.hbm_to_vmem [thread:$0]  %s4860_s15, 1152, %s147_s29, [#allocation18], %s3976_s11, %s3976_s11, %s3977_s5  }
  0x44   :  { %s3782_s23 = scalar_lea.vmem %s172_s4, 16  ;;  %s3786_s1 = scalar_lea.vmem %s172_s4, 32 }
  0x45   :  { %p3783_p11 = scmp.ne.s32.totalorder %s172_s4, %s3782_s23  ;;  %p3787_p12 = scmp.lt.s32.totalorder %s172_s4, %s172_s4 }
  0x46   :  { %p3788_p13 = scmp.lt.s32.totalorder %s3786_s1, %s3782_s23 }
  0x48   :  { %p3789_p0 = por %p3788_p13, %p3787_p12 }
  0x4a   :  { %p3790_p1 = pnand %p3789_p0, %p3783_p11 }
  0x4c   :  { %3793 = shalt.err (!%p3790_p1)
}
  0x4d   :  { %174 = dma.hbm_to_vmem [thread:$0]  %s4862_s17, 16, %s172_s4, [#allocation21]  }
  0x4e   :  { %s3978_s6 = smov [#allocation3]   ;;  %s3979_s26 = smov [#allocation7]  }
  0x4f   :  { %s51_s25 = sshll.u32 %s3978_s6, 4  ;;  %s71_s8 = sshll.u32 %s3979_s26, 4  ;;  %s52_s25 = int_to_ptr.vmem [resolvable:$true] %s51_s25  ;;  %s72_s8 = int_to_ptr.vmem [resolvable:$true] %s71_s8 }
  0x50   :  { %s3802_s27 = scalar_lea.vmem %s52_s25, 16  ;;  %s3806_s15 = scalar_lea.vmem %s52_s25, 32 }
  0x51   :  { %p3803_p2 = scmp.ne.s32.totalorder %s52_s25, %s3802_s27  ;;  %p3807_p3 = scmp.lt.s32.totalorder %s52_s25, %s52_s25 }
  0x52   :  { %p3808_p4 = scmp.lt.s32.totalorder %s3806_s15, %s3802_s27 }
  0x54   :  { %p3809_p5 = por %p3808_p4, %p3807_p3 }
  0x56   :  { %p3810_p6 = pnand %p3809_p5, %p3803_p2 }
  0x58   :  { %3813 = shalt.err (!%p3810_p6)
}
  0x59   :  { %s4875_s29 = sld [smem:[#allocation38_spill]]  ;;  %s3822_s0 = scalar_lea.vmem %s72_s8, 16 }
  0x5a   :  { %p3823_p7 = scmp.ne.s32.totalorder %s72_s8, %s3822_s0  ;;  %s3826_s17 = scalar_lea.vmem %s72_s8, 32 }
  0x5b   :  { %p3827_p8 = scmp.lt.s32.totalorder %s72_s8, %s72_s8  ;;  %p3828_p9 = scmp.lt.s32.totalorder %s3826_s17, %s3822_s0 }
  0x5d   :  { %p3829_p10 = por %p3828_p9, %p3827_p8 }
  0x5f   :  { %54 = dma.hbm_to_vmem [thread:$0]  %s4875_s29, 16, %s52_s25, [#allocation4]  }
  0x60   :  { %p3830_p11 = pnand %p3829_p10, %p3823_p7 }
  0x62   :  { %3833 = shalt.err (!%p3830_p11)
}
  0x63   :  { %74 = dma.hbm_to_vmem [thread:$0]  %s4852_s7, 16, %s72_s8, [#allocation6]  }
  0x64   :  { %s3980_s22 = smov [#allocation10]  }
  0x65   :  { %s90_s13 = sshll.u32 %s3980_s22, 4  ;;  %s91_s13 = int_to_ptr.vmem [resolvable:$true] %s90_s13 }
  0x66   :  { %s3842_s23 = scalar_lea.vmem %s91_s13, 1280  ;;  %p3847_p13 = scmp.lt.s32.totalorder %s91_s13, %s91_s13 }
  0x67   :  { %p3843_p12 = scmp.ne.s32.totalorder %s91_s13, %s3842_s23  ;;  %p3848_p0 = scmp.lt.s32.totalorder %s3842_s23, %s3842_s23 }
  0x69   :  { %p3849_p1 = por %p3848_p0, %p3847_p13 }
  0x6b   :  { %p3850_p2 = pnand %p3849_p1, %p3843_p12 }
  0x6d   :  { %3853 = shalt.err (!%p3850_p2)
}
  0x6e   :  { %s3981_s1 = smov 256   ;;  %s3982_s24 = smov 16  }
  0x6f   :  { %96 = dma.hbm_to_vmem [thread:$0]  %s4854_s9, 1280, %s91_s13, [#allocation9], %s3981_s1, %s3981_s1, %s3982_s24  }
  0x70   :  { %s3983_s25 = smov [#allocation13]   ;;  %s3984_s7 = smov [#allocation16]  }
  0x71   :  { %s115_s26 = sshll.u32 %s3983_s25, 4  ;;  %s134_s8 = sshll.u32 %s3984_s7, 4  ;;  %s116_s26 = int_to_ptr.vmem [resolvable:$true] %s115_s26  ;;  %s135_s8 = int_to_ptr.vmem [resolvable:$true] %s134_s8 }
  0x72   :  { %s3862_s27 = scalar_lea.vmem %s116_s26, 16  ;;  %s3866_s15 = scalar_lea.vmem %s116_s26, 32 }
  0x73   :  { %p3863_p3 = scmp.ne.s32.totalorder %s116_s26, %s3862_s27  ;;  %p3867_p4 = scmp.lt.s32.totalorder %s116_s26, %s116_s26 }
  0x74   :  { %p3868_p5 = scmp.lt.s32.totalorder %s3866_s15, %s3862_s27 }
  0x76   :  { %p3869_p6 = por %p3868_p5, %p3867_p4 }
  0x78   :  { %p3870_p7 = pnand %p3869_p6, %p3863_p3 }
  0x7a   :  { %3873 = shalt.err (!%p3870_p7)
}
  0x7b   :  { %118 = dma.hbm_to_vmem [thread:$0]  %s4857_s12, 16, %s116_s26, [#allocation12]  }
  0x7c   :  { %s3882_s29 = scalar_lea.vmem %s135_s8, 1152  ;;  %p3887_p9 = scmp.lt.s32.totalorder %s135_s8, %s135_s8 }
  0x7d   :  { %p3883_p8 = scmp.ne.s32.totalorder %s135_s8, %s3882_s29  ;;  %p3888_p10 = scmp.lt.s32.totalorder %s3882_s29, %s3882_s29 }
  0x7f   :  { %p3889_p11 = por %p3888_p10, %p3887_p9 }
  0x81   :  { %p3890_p12 = pnand %p3889_p11, %p3883_p8 }
  0x83   :  { %3893 = shalt.err (!%p3890_p12)
}
  0x84   :  { %140 = dma.hbm_to_vmem [thread:$0]  %s4859_s14, 1152, %s135_s8, [#allocation15], %s3976_s11, %s3976_s11, %s3977_s5  }
  0x85   :  { %s3985_s17 = smov [#allocation19]   ;;  %s3986_s30 = smov [#allocation22]  }
  0x86   :  { %s158_s4 = sshll.u32 %s3985_s17, 4  ;;  %s180_s12 = sshll.u32 %s3986_s30, 4  ;;  %s159_s4 = int_to_ptr.vmem [resolvable:$true] %s158_s4  ;;  %s181_s12 = int_to_ptr.vmem [resolvable:$true] %s180_s12 }
  0x87   :  { %s3902_s22 = scalar_lea.vmem %s159_s4, 1152  ;;  %p3907_p0 = scmp.lt.s32.totalorder %s159_s4, %s159_s4 }
  0x88   :  { %p3903_p13 = scmp.ne.s32.totalorder %s159_s4, %s3902_s22  ;;  %p3908_p1 = scmp.lt.s32.totalorder %s3902_s22, %s3902_s22 }
  0x8a   :  { %p3909_p2 = por %p3908_p1, %p3907_p0 }
  0x8c   :  { %p3910_p3 = pnand %p3909_p2, %p3903_p13 }
  0x8e   :  { %3913 = shalt.err (!%p3910_p3)
}
  0x8f   :  { %164 = dma.hbm_to_vmem [thread:$0]  %s4861_s16, 1152, %s159_s4, [#allocation18], %s3976_s11, %s3976_s11, %s3977_s5  }
  0x90   :  { %s3922_s14 = scalar_lea.vmem %s181_s12, 1792  ;;  %p3927_p5 = scmp.lt.s32.totalorder %s181_s12, %s181_s12 }
  0x91   :  { %p3923_p4 = scmp.ne.s32.totalorder %s181_s12, %s3922_s14  ;;  %p3928_p6 = scmp.lt.s32.totalorder %s3922_s14, %s3922_s14 }
  0x93   :  { %p3929_p7 = por %p3928_p6, %p3927_p5 }
  0x95   :  { %p3930_p8 = pnand %p3929_p7, %p3923_p4 }
  0x97   :  { %3933 = shalt.err (!%p3930_p8)
}
  0x98   :  { %186 = dma.hbm_to_vmem [thread:$0]  %s4863_s18, 1792, %s181_s12, [#allocation21], %s3976_s11, %s3976_s11, %s3977_s5  }
  0x99   :  { %s3987_s6 = smov [#allocation23]  }
  0x9a   :  { %s193_s25 = sshll.u32 %s3987_s6, 4  ;;  %s194_s25 = int_to_ptr.vmem [resolvable:$true] %s193_s25 }
  0x9b   :  { %s3942_s26 = scalar_lea.vmem %s194_s25, 16  ;;  %s3946_s16 = scalar_lea.vmem %s194_s25, 32 }
  0x9c   :  { %p3943_p9 = scmp.ne.s32.totalorder %s194_s25, %s3942_s26  ;;  %p3947_p10 = scmp.lt.s32.totalorder %s194_s25, %s194_s25 }
  0x9d   :  { %p3948_p11 = scmp.lt.s32.totalorder %s3946_s16, %s3942_s26 }
  0x9f   :  { %p3949_p12 = por %p3948_p11, %p3947_p10 }
  0xa1   :  { %p3950_p13 = pnand %p3949_p12, %p3943_p9 }
  0xa3   :  { %3953 = shalt.err (!%p3950_p13)
}
  0xa4   :  { %196 = dma.hbm_to_vmem [thread:$0]  %s4864_s19, 16, %s194_s25, [#allocation24]  }
  0xa5   :  { %3954 = dma.done.wait [#allocation4], 16  }
  0xa6   :  { %3955 = vsyncadd [#allocation4], 4294967280 }
  0xa7   :  { %3956 = dma.done.wait [#allocation6], 80  }
  0xa8   :  { %3957 = vsyncadd [#allocation6], 4294967216 }
  0xa9   :  { %3958 = dma.done.wait [#allocation9], 1296  }
  0xaa   :  { %3959 = vsyncadd [#allocation9], 4294966000 }
  0xab   :  { %3960 = dma.done.wait [#allocation12], 80  }
  0xac   :  { %3961 = vsyncadd [#allocation12], 4294967216 }
  0xad   :  { %3962 = dma.done.wait [#allocation15], 1168  }
  0xae   :  { %3963 = vsyncadd [#allocation15], 4294966128 }
  0xaf   :  { %3964 = dma.done.wait [#allocation18], 2304  }
  0xb0   :  { %3965 = vsyncadd [#allocation18], 4294964992 }
  0xb1   :  { %3966 = dma.done.wait [#allocation21], 1808  }
  0xb2   :  { %3967 = vsyncadd [#allocation21], 4294965488 }
  0xb3   :  { %3968 = dma.done.wait [#allocation24], 16  }
  0xb4   :  { %3969 = vsyncadd [#allocation24], 4294967280  ;;  %vm296_vm0 = vcmask 1043456   ;;  %vm289_vm1 = vcmask 31744   ;;  %s4876_s11 = sld [smem:[#allocation37_spill]]  ;;  %vm377_vm2 = vcmask 64512  }
  0xb5   :  { %s4877_s3 = sld [smem:[#allocation33_spill]]  ;;  %v4187_v3 = vld [vmem:[#allocation5] sm:$0xf]  ;;  %v3146_v4 = vld [vmem:[#allocation3] ss:$0 sm:$0xff]  ;;  %v3988_v5 = vmov 1  }
  0xb6   :  { %3345 = vmatprep.subr.msk.mxu1 %vm377_vm2, %v4187_v3  ;;  %3583 = vset.pattern.permute.xlu1 %v3988_v5  ;;  %v3989_v6 = vmov 0   ;;  %s3990_s9 = smov 96   ;;  %v3991_v17 = vmov 2   ;;  %v3992_v18 = vmov 3   ;;  %s4878_s4 = sld [smem:[#allocation35_spill]]  ;;  %vm267_vm5 = vcmask 130048  }
  0xb7   :  { %3346 = vmatpush3.xpose.msk.msra.mxu1 %vm377_vm2, %v4187_v3  ;;  %3582 = vset.pattern.permute.xlu0 %v3989_v6  ;;  %s4879_s1 = sld [smem:[#allocation34_spill]]  ;;  %v3993_v55 = vmov -1e+30   ;;  %s3994_s25 = smov 64   ;;  %vm1969_vm7 = vcmask 195584   ;;  %vm1982_vm9 = vcmask 261120  }
  0xb8   :  { %s3995_s26 = smov 120   ;;  %s3996_s16 = smov 88   ;;  %vm2061_vm10 = vcmask 293888   ;;  %vm4010_vm11 = vmmov 0   ;;  %vm2561_vm12 = vcmask 162816  }
  0xb9   :  { %s3997_s7 = smov 56   ;;  %s3998_s8 = smov 112  }
  0xba   :  { %v281_v0 = vld [vmem:[%s4876_s11] sm:$0xf]  ;;  %s3999_s18 = smov 80   ;;  %s4000_s19 = smov 48  }
  0xbb   :  { %v241_v1 = vld [vmem:[%s4877_s3] sm:$0xff]  ;;  %v242_v2 = vld [vmem:[%s4877_s3 + $0x8] sm:$0xff]  ;;  %3340 = vmatprep.subr.msk.mxu0 %vm296_vm0, %v281_v0  ;;  %s4001_s11 = smov 104   ;;  %s4002_s27 = smov 72  }
  0xbc   :  { %3342 = vmatprep.mubr.msk.f32.mxu0 %vm289_vm1, %v241_v1  ;;  %3341 = vmatpush3.msk.msra.mxu0 %vm296_vm0, %v281_v0  ;;  %v3231_v21 = vld [vmem:[%s4878_s4 + $0x8] sm:$0xff]   ;;  %v3216_v24 = vld [vmem:[%s4878_s4] sm:$0xff]   ;;  %v3232_v26 = vld [vmem:[%s4878_s4 + $0x10] sm:$0xff]   ;;  %s4003_s15 = smov 40   ;;  %s4006_s28 = smov 32  }
  0xbd   :  { %3343 = vmatmul.mubr.msk.f32.vlgmr.msra.gmra.mxu0 %vm289_vm1, %v242_v2  ;;  %v4229_v23 = vunpack.c.l.bf16 %v3231_v21  ;;  %v4237_v27 = vunpack.c.l.bf16 %v3216_v24  ;;  %v4239_v28 = vunpack.c.l.bf16 %v3232_v26  ;;  %v3212_v29 = vld [vmem:[%s4879_s1] sm:$0xff]   ;;  %v3233_v30 = vld [vmem:[%s4878_s4 + $0x18] sm:$0xff]   ;;  %v4247_v31 = vunpack.c.h.bf16 %v3231_v21  ;;  %s4007_s4 = smov 92   ;;  %s4880_s22 = sld [smem:[#allocation36_spill]] }
  0xbe   :  { %v4249_v32 = vunpack.c.h.bf16 %v3216_v24  ;;  %v3213_v35 = vunpack.c.l.bf16 %v3212_v29  ;;  %v4252_v36 = vunpack.c.h.bf16 %v3232_v26  ;;  %v4256_v39 = vunpack.c.l.bf16 %v3233_v30  ;;  %s4009_s13 = smov 36  }
  0xbf   :  { %v4260_v46 = vunpack.c.h.bf16 %v3233_v30  ;;  %v3214_v50 = vunpack.c.h.bf16 %v3212_v29  ;;  %vm2732_vm1 = vcmask 588800  }
  0xc0   :  { %vm263_vm3 = vcmp.gt.f32.partialorder %v3213_v35, 0.0 }
  0xc1   :  { %v4264_v56 = vsel %vm263_vm3, 0.0, %v3993_v55  ;;  %vm264_vm4 = vcmp.gt.f32.partialorder %v3214_v50, 0.0  ;;  %vm2759_vm3 = vcmask 1040384  }
  0xc2   :  { %v4268_v62 = vsel %vm264_vm4, 0.0, %v3993_v55  ;;  %vm2761_vm4 = vcmask 1041408  }
 0x17d   :  { %v3344_v7 = vpop.f32.mrf.mxu0 }
 0x17e   :  { %v4195_v8 = vadd.f32 %v3344_v7, %v3146_v4 }
 0x17f   :  { %v366_v9 = vpop.f32.mrf.mxu0 }
 0x180   :  { %v4197_v10 = vadd.f32 %v3146_v4, %v366_v9  ;;  %516 = vrot.lane.b32.xlu0 %v4195_v8, %s3990_s9  ;;  %v4204_v12 = vmul.f32 0.35355338, %v4195_v8 }
 0x182   :  { %v4201_v11 = vmul.f32 0.35355338, %v4197_v10 }
 0x184   :  { %514 = vrot.lane.b32.xlu0 %v4197_v10, %s3990_s9  ;;  %3347 = vmatprep.mubr.msk.f32.mxu1 %vm377_vm2, %v4201_v11 }
 0x185   :  { %3354 = vmatprep.mubr.msk.f32.mxu0 %vm377_vm2, %v4201_v11  ;;  %3348 = vmatmul.mubr.msk.f32.vlgmr.msra.gmra.mxu1 %vm377_vm2, %v4204_v12 }
 0x1f2   :  { %v517_v13 = vpop.permute.xlu0 %516 }
 0x1f3   :  { %3350 = vmatprep.subr.msk.mxu0 %vm377_vm2, %v517_v13 }
 0x1f4   :  { %3351 = vmatpush3.xpose.msk.msra.mxu0 %vm377_vm2, %v517_v13 }
 0x1f6   :  { %v515_v14 = vpop.permute.xlu0 %514 }
 0x1f7   :  { %3352 = vmatprep.subr.msk.mxu0 %vm377_vm2, %v515_v14 }
 0x1f8   :  { %3353 = vmatpush3.xpose.msk.msra.mxu0 %vm377_vm2, %v515_v14 }
 0x1fb   :  { %3355 = vmatmul.mubr.msk.f32.vlgmr.msra.gmra.mxu0 %vm377_vm2, %v4204_v12 }
 0x245   :  { %v3349_v15 = vpop.f32.mrf.mxu1 }
 0x246   :  { %481 = vperm.xlu1 %3583, %v3349_v15   ;;  %469 = vperm.xlu0 %3582, %v3349_v15  }
 0x247   :  { %v453_v16 = vpop.f32.mrf.mxu1 }
 0x24a   :  { %3585 = vset.pattern.permute.xlu1 %v3989_v6  ;;  %3584 = vset.pattern.permute.xlu0 %v3991_v17 }
 0x24b   :  { %493 = vperm.xlu0 %3584, %v3349_v15   ;;  %464 = vperm.xlu1 %3585, %v453_v16  }
 0x24f   :  { %3586 = vset.pattern.permute.xlu1 %v3988_v5  ;;  %3593 = vset.pattern.permute.xlu0 %v3988_v5 }
 0x250   :  { %477 = vperm.xlu1 %3586, %v453_v16  }
 0x254   :  { %3587 = vset.pattern.permute.xlu1 %v3991_v17 }
 0x255   :  { %489 = vperm.xlu1 %3587, %v453_v16  }
 0x259   :  { %3588 = vset.pattern.permute.xlu1 %v3992_v18 }
 0x25a   :  { %501 = vperm.xlu1 %3588, %v453_v16  }
 0x25e   :  { %505 = vperm.xlu1 %3588, %v3349_v15  }
 0x262   :  { %3589 = vset.pattern.permute.xlu1 %v3989_v6 }
 0x2bb   :  { %v3356_v44 = vpop.f32.mrf.mxu0 }
 0x2bd   :  { %v588_v53 = vpop.f32.mrf.mxu0 }
 0x2c1   :  { %v482_v19 = vpop.permute.xlu1 %481  ;;  %v470_v25 = vpop.permute.xlu0 %469 }
 0x2c2   :  { %v485_v41 = vmul.f32 %v4247_v31, %v482_v19  ;;  %v473_v42 = vmul.f32 %v4249_v32, %v470_v25 }
 0x2c4   :  { %v487_v51 = vadd.f32 %v485_v41, %v473_v42 }
 0x2c6   :  { %v465_v20 = vpop.permute.xlu1 %464  ;;  %v494_v40 = vpop.permute.xlu0 %493 }
 0x2c7   :  { %v472_v37 = vmul.f32 %v4237_v27, %v465_v20  ;;  %v497_v47 = vmul.f32 %v4252_v36, %v494_v40 }
 0x2c9   :  { %v499_v57 = vadd.f32 %v497_v47, %v487_v51 }
 0x2cb   :  { %v478_v22 = vpop.permute.xlu1 %477 }
 0x2cc   :  { %v484_v33 = vmul.f32 %v4229_v23, %v478_v22 }
 0x2ce   :  { %v486_v43 = vadd.f32 %v484_v33, %v472_v37 }
 0x2d0   :  { %v490_v34 = vpop.permute.xlu1 %489 }
 0x2d1   :  { %v496_v38 = vmul.f32 %v4239_v28, %v490_v34 }
 0x2d3   :  { %v498_v48 = vadd.f32 %v496_v38, %v486_v43 }
 0x2d5   :  { %v502_v45 = vpop.permute.xlu1 %501 }
 0x2d6   :  { %v508_v49 = vmul.f32 %v4256_v39, %v502_v45 }
 0x2d8   :  { %v510_v52 = vadd.f32 %v508_v49, %v498_v48 }
 0x2d9   :  { %v506_v54 = vpop.permute.xlu1 %505 }
 0x2da   :  { %v509_v58 = vmul.f32 %v4260_v46, %v506_v54  ;;  %v589_v59 = vadd.f32 %v588_v53, %v510_v52 }
 0x2dc   :  { %v511_v60 = vadd.f32 %v509_v58, %v499_v57  ;;  %v597_v61 = vadd.f32 %v589_v59, %v4264_v56 }
 0x2de   :  { %v599_v63 = vsel %vm267_vm5, %v597_v61, -inf  ;;  %v594_v0 = vadd.f32 %v3356_v44, %v511_v60 }
 0x2df   :  { %600 = vmax.xlane.f32.xlu0 %v599_v63 }
 0x2e0   :  { %v598_v1 = vadd.f32 %v594_v0, %v4268_v62 }
 0x2e2   :  { %v602_v2 = vsel %vm267_vm5, %v598_v1, -inf }
 0x2e3   :  { %603 = vmax.xlane.f32.xlu1 %v602_v2 }
 0x2f4   :  { %689 = vrot.lane.b32.xlu1 %v4195_v8, %s3994_s25 }
 0x2f8   :  { %778 = vrot.lane.b32.xlu1 %v4187_v3, %s3995_s26 }
 0x2fc   :  { %774 = vrot.lane.b32.xlu1 %v4201_v11, %s3995_s26 }
 0x300   :  { %913 = vrot.lane.b32.xlu1 %v4195_v8, %s3996_s16 }
 0x368   :  { %v601_v4 = vpop.xlane.xlu0 %600 }
 0x369   :  { %v605_v7 = vsub.f32 %v597_v61, %v601_v4 }
 0x36b   :  { %v607_v14 = vmul.f32 1.442695, %v605_v7 }
 0x36c   :  { %v604_v9 = vpop.xlane.xlu1 %603 }
 0x36d   :  { %v606_v13 = vsub.f32 %v598_v1, %v604_v9 }
 0x36f   :  { %v609_v15 = vmul.f32 1.442695, %v606_v13 }
 0x370   :  { %v690_v16 = vpop.permute.xlu1 %689 }
 0x371   :  { %3621 = vpow2.f32 %v609_v15  ;;  %3357 = vmatprep.subr.mxu1 %v690_v16 }
 0x372   :  { %3358 = vmatpush3.msra.mxu1 %v690_v16  ;;  %3623 = vpow2.f32 %v607_v14 }
 0x374   :  { %v779_v19 = vpop.permute.xlu1 %778 }
 0x378   :  { %v775_v20 = vpop.permute.xlu1 %774 }
 0x379   :  { %3373 = vmatprep.mubr.msk.f32.mxu0 %vm377_vm2, %v775_v20 }
 0x37c   :  { %v914_v21 = vpop.permute.xlu1 %913 }
 0x37d   :  { %3369 = vmatprep.subr.msk.mxu0 %vm377_vm2, %v914_v21 }
 0x37e   :  { %v3622_v22 = vpop.eup %3621  ;;  %3370 = vmatpush3.xpose.msk.msra.mxu0 %vm377_vm2, %v914_v21 }
 0x37f   :  { %v614_v24 = vsel %vm267_vm5, %v3622_v22, 0.0  ;;  %v3624_v25 = vpop.eup %3623 }
 0x380   :  { %615 = vadd.xlane.f32.xlu0 %v614_v24  ;;  %v611_v26 = vsel %vm267_vm5, %v3624_v25, 0.0 }
 0x384   :  { %612 = vadd.xlane.f32.xlu0 %v611_v26 }
 0x39a   :  { %687 = vrot.lane.b32.xlu0 %v4197_v10, %s3994_s25 }
 0x39e   :  { %776 = vrot.lane.b32.xlu0 %v4204_v12, %s3995_s26 }
 0x3a2   :  { %911 = vrot.lane.b32.xlu0 %v4197_v10, %s3996_s16 }
 0x409   :  { %v616_v29 = vpop.xlane.xlu0 %615 }
 0x40a   :  { %v618_v30 = vmax.f32 %v616_v29, 1e-20 }
 0x40c   :  { %3625 = vrcp.f32 %v618_v30 }
 0x40d   :  { %v613_v33 = vpop.xlane.xlu0 %612 }
 0x40e   :  { %v617_v34 = vmax.f32 %v613_v33, 1e-20 }
 0x410   :  { %3627 = vrcp.f32 %v617_v34 }
 0x411   :  { %v688_v35 = vpop.permute.xlu0 %687 }
 0x412   :  { %3359 = vmatprep.subr.mxu1 %v688_v35 }
 0x413   :  { %3360 = vmatpush3.msra.mxu1 %v688_v35 }
 0x414   :  { %3364 = vmatprep.subr.msk.mxu1 %vm377_vm2, %v779_v19 }
 0x415   :  { %v777_v37 = vpop.permute.xlu0 %776 }
 0x419   :  { %v912_v38 = vpop.permute.xlu0 %911  ;;  %v3626_v40 = vpop.eup %3625 }
 0x41a   :  { %3371 = vmatprep.subr.msk.mxu0 %vm377_vm2, %v912_v38  ;;  %v4294_v43 = vmul.f32 %v3626_v40, %v3622_v22 }
 0x41b   :  { %3372 = vmatpush3.xpose.msk.msra.mxu0 %vm377_vm2, %v912_v38 }
 0x41d   :  { %v3628_v41 = vpop.eup %3627 }
 0x41e   :  { %3374 = vmatmul.mubr.msk.f32.vlgmr.msra.gmra.mxu0 %vm377_vm2, %v777_v37  ;;  %v4292_v42 = vmul.f32 %v3628_v41, %v3624_v25 }
 0x420   :  { %3361 = vmatprep.mubr.msk.f32.mxu1 %vm267_vm5, %v4292_v42 }
 0x421   :  { %3362 = vmatmul.mubr.msk.f32.vlgmr.msra.gmra.mxu1 %vm267_vm5, %v4294_v43 }
 0x422   :  { %3365 = vmatpush3.xpose.msk.msra.mxu1 %vm377_vm2, %v779_v19  ;;  %3366 = vmatprep.mubr.msk.f32.mxu1 %vm377_vm2, %v775_v20 }
 0x425   :  { %3367 = vmatmul.mubr.msk.f32.vlgmr.msra.gmra.mxu1 %vm377_vm2, %v777_v37 }
 0x4de   :  { %v3375_v1 = vpop.f32.mrf.mxu0 }
 0x4e0   :  { %v985_v22 = vpop.f32.mrf.mxu0 }
 0x4e1   :  { %v4303_v44 = vpop.f32.mrf.mxu1 }
 0x4e3   :  { %v4305_v45 = vpop.f32.mrf.mxu1 }
 0x4e5   :  { %v3368_v47 = vpop.f32.mrf.mxu1 }
 0x4e6   :  { %868 = vperm.xlu1 %3589, %v3368_v47  }
 0x4e7   :  { %v852_v48 = vpop.f32.mrf.mxu1 }
 0x4e8   :  { %876 = vperm.xlu0 %3593, %v852_v48  }
 0x4ea   :  { %3590 = vset.pattern.permute.xlu1 %v3988_v5 }
 0x4eb   :  { %880 = vperm.xlu1 %3590, %v3368_v47  }
 0x4ec   :  { %3594 = vset.pattern.permute.xlu0 %v3991_v17 }
 0x4ed   :  { %888 = vperm.xlu0 %3594, %v852_v48  }
 0x4ef   :  { %3591 = vset.pattern.permute.xlu1 %v3991_v17 }
 0x4f0   :  { %892 = vperm.xlu1 %3591, %v3368_v47  }
 0x4f1   :  { %3596 = vset.pattern.permute.xlu0 %v3992_v18 }
 0x4f2   :  { %904 = vperm.xlu0 %3596, %v3368_v47  }
 0x4f4   :  { %3592 = vset.pattern.permute.xlu1 %v3989_v6 }
 0x4f5   :  { %863 = vperm.xlu1 %3592, %v852_v48  }
 0x4f6   :  { %3601 = vset.pattern.permute.xlu0 %v3988_v5 }
 0x4f9   :  { %3595 = vset.pattern.permute.xlu1 %v3992_v18 }
 0x4fa   :  { %900 = vperm.xlu1 %3595, %v852_v48  }
 0x4fe   :  { %3597 = vset.pattern.permute.xlu1 %v3989_v6 }
 0x561   :  { %v869_v49 = vpop.permute.xlu1 %868 }
 0x562   :  { %v872_v54 = vmul.f32 %v4249_v32, %v869_v49 }
 0x563   :  { %v877_v50 = vpop.permute.xlu0 %876 }
 0x564   :  { %v883_v2 = vmul.f32 %v4229_v23, %v877_v50 }
 0x566   :  { %v881_v51 = vpop.permute.xlu1 %880 }
 0x567   :  { %v884_v52 = vmul.f32 %v4247_v31, %v881_v51 }
 0x568   :  { %v889_v53 = vpop.permute.xlu0 %888 }
 0x569   :  { %v886_v57 = vadd.f32 %v884_v52, %v872_v54  ;;  %v895_v9 = vmul.f32 %v4239_v28, %v889_v53 }
 0x56b   :  { %v893_v55 = vpop.permute.xlu1 %892 }
 0x56c   :  { %v896_v58 = vmul.f32 %v4252_v36, %v893_v55 }
 0x56d   :  { %v905_v59 = vpop.permute.xlu0 %904 }
 0x56e   :  { %v898_v60 = vadd.f32 %v896_v58, %v886_v57  ;;  %v908_v61 = vmul.f32 %v4260_v46, %v905_v59 }
 0x570   :  { %v910_v63 = vadd.f32 %v908_v61, %v898_v60  ;;  %v864_v0 = vpop.permute.xlu1 %863 }
 0x571   :  { %v871_v4 = vmul.f32 %v4237_v27, %v864_v0 }
 0x572   :  { %v991_v7 = vadd.f32 %v3375_v1, %v910_v63 }
 0x573   :  { %v885_v13 = vadd.f32 %v883_v2, %v871_v4 }
 0x574   :  { %v995_v14 = vadd.f32 %v991_v7, %v4268_v62 }
 0x575   :  { %v897_v15 = vadd.f32 %v895_v9, %v885_v13  ;;  %v901_v16 = vpop.permute.xlu1 %900 }
 0x576   :  { %v907_v19 = vmul.f32 %v4256_v39, %v901_v16  ;;  %v999_v20 = vsel %vm267_vm5, %v995_v14, -inf }
 0x577   :  { %1000 = vmax.xlane.f32.xlu0 %v999_v20 }
 0x578   :  { %v909_v21 = vadd.f32 %v907_v19, %v897_v15 }
 0x57a   :  { %v986_v24 = vadd.f32 %v985_v22, %v909_v21 }
 0x57c   :  { %v994_v25 = vadd.f32 %v986_v24, %v4264_v56 }
 0x57e   :  { %v996_v26 = vsel %vm267_vm5, %v994_v25, -inf }
 0x57f   :  { %997 = vmax.xlane.f32.xlu1 %v996_v26 }
 0x590   :  { %1070 = vrot.lane.b32.xlu1 %v4195_v8, %s3997_s7 }
 0x594   :  { %1167 = vrot.lane.b32.xlu1 %v4187_v3, %s3998_s8 }
 0x600   :  { %v1001_v29 = vpop.xlane.xlu0 %1000 }
 0x601   :  { %v1003_v30 = vsub.f32 %v995_v14, %v1001_v29 }
 0x603   :  { %v1006_v33 = vmul.f32 1.442695, %v1003_v30 }
 0x605   :  { %3629 = vpow2.f32 %v1006_v33 }
 0x608   :  { %v998_v34 = vpop.xlane.xlu1 %997 }
 0x609   :  { %v1002_v35 = vsub.f32 %v994_v25, %v998_v34 }
 0x60b   :  { %v1004_v37 = vmul.f32 1.442695, %v1002_v35 }
 0x60c   :  { %v1071_v38 = vpop.permute.xlu1 %1070 }
 0x60d   :  { %3631 = vpow2.f32 %v1004_v37  ;;  %3376 = vmatprep.subr.mxu1 %v1071_v38 }
 0x60e   :  { %3377 = vmatpush3.msra.mxu1 %v1071_v38 }
 0x610   :  { %v1168_v50 = vpop.permute.xlu1 %1167 }
 0x612   :  { %v3630_v40 = vpop.eup %3629 }
 0x613   :  { %v1011_v41 = vsel %vm267_vm5, %v3630_v40, 0.0 }
 0x614   :  { %1012 = vadd.xlane.f32.xlu0 %v1011_v41 }
 0x61a   :  { %v3632_v47 = vpop.eup %3631 }
 0x61b   :  { %v1008_v48 = vsel %vm267_vm5, %v3632_v47, 0.0 }
 0x61c   :  { %1009 = vadd.xlane.f32.xlu1 %v1008_v48 }
 0x62a   :  { %1068 = vrot.lane.b32.xlu0 %v4197_v10, %s3997_s7 }
 0x62d   :  { %1163 = vrot.lane.b32.xlu1 %v4201_v11, %s3998_s8 }
 0x62e   :  { %1165 = vrot.lane.b32.xlu0 %v4204_v12, %s3998_s8 }
 0x631   :  { %1302 = vrot.lane.b32.xlu1 %v4195_v8, %s3999_s18 }
 0x632   :  { %1300 = vrot.lane.b32.xlu0 %v4197_v10, %s3999_s18 }
 0x69d   :  { %v1013_v49 = vpop.xlane.xlu0 %1012 }
 0x69e   :  { %v1015_v52 = vmax.f32 %v1013_v49, 1e-20 }
 0x6a0   :  { %3633 = vrcp.f32 %v1015_v52 }
 0x6a1   :  { %v1069_v51 = vpop.permute.xlu0 %1068 }
 0x6a2   :  { %3378 = vmatprep.subr.mxu1 %v1069_v51 }
 0x6a3   :  { %3379 = vmatpush3.msra.mxu1 %v1069_v51 }
 0x6a4   :  { %3383 = vmatprep.subr.msk.mxu1 %vm377_vm2, %v1168_v50 }
 0x6a5   :  { %v1010_v53 = vpop.xlane.xlu1 %1009  ;;  %v1166_v55 = vpop.permute.xlu0 %1165 }
 0x6a6   :  { %v1014_v54 = vmax.f32 %v1010_v53, 1e-20 }
 0x6a8   :  { %3635 = vrcp.f32 %v1014_v54 }
 0x6a9   :  { %v1164_v57 = vpop.permute.xlu1 %1163  ;;  %v1301_v59 = vpop.permute.xlu0 %1300 }
 0x6aa   :  { %3392 = vmatprep.mubr.msk.f32.mxu0 %vm377_vm2, %v1164_v57 }
 0x6ad   :  { %v1303_v58 = vpop.permute.xlu1 %1302  ;;  %v3634_v60 = vpop.eup %3633 }
 0x6ae   :  { %3388 = vmatprep.subr.msk.mxu0 %vm377_vm2, %v1303_v58  ;;  %v4350_v0 = vmul.f32 %v3634_v60, %v3630_v40 }
 0x6af   :  { %3389 = vmatpush3.xpose.msk.msra.mxu0 %vm377_vm2, %v1303_v58 }
 0x6b0   :  { %3390 = vmatprep.subr.msk.mxu0 %vm377_vm2, %v1301_v59 }
 0x6b3   :  { %3391 = vmatpush3.xpose.msk.msra.mxu0 %vm377_vm2, %v1301_v59 }
 0x6b5   :  { %v3636_v61 = vpop.eup %3635 }
 0x6b6   :  { %3393 = vmatmul.mubr.msk.f32.vlgmr.msra.gmra.mxu0 %vm377_vm2, %v1166_v55  ;;  %v4348_v63 = vmul.f32 %v3636_v61, %v3632_v47 }
 0x6b8   :  { %3380 = vmatprep.mubr.msk.f32.mxu1 %vm267_vm5, %v4348_v63 }
 0x6b9   :  { %3381 = vmatmul.mubr.msk.f32.vlgmr.msra.gmra.mxu1 %vm267_vm5, %v4350_v0 }
 0x6ba   :  { %3384 = vmatpush3.xpose.msk.msra.mxu1 %vm377_vm2, %v1168_v50  ;;  %3385 = vmatprep.mubr.msk.f32.mxu1 %vm377_vm2, %v1164_v57 }
 0x6bd   :  { %3386 = vmatmul.mubr.msk.f32.vlgmr.msra.gmra.mxu1 %vm377_vm2, %v1166_v55 }
 0x776   :  { %v3394_v33 = vpop.f32.mrf.mxu0 }
 0x778   :  { %v1374_v52 = vpop.f32.mrf.mxu0 }
 0x779   :  { %v4359_v1 = vpop.f32.mrf.mxu1 }
 0x77b   :  { %v4361_v2 = vpop.f32.mrf.mxu1 }
 0x77d   :  { %v3387_v4 = vpop.f32.mrf.mxu1 }
 0x77e   :  { %1257 = vperm.xlu1 %3597, %v3387_v4  }
 0x77f   :  { %v1241_v7 = vpop.f32.mrf.mxu1 }
 0x780   :  { %1265 = vperm.xlu0 %3601, %v1241_v7  }
 0x782   :  { %3598 = vset.pattern.permute.xlu1 %v3988_v5 }
 0x783   :  { %1269 = vperm.xlu1 %3598, %v3387_v4  }
 0x784   :  { %3602 = vset.pattern.permute.xlu0 %v3991_v17 }
 0x785   :  { %1277 = vperm.xlu0 %3602, %v1241_v7  }
 0x787   :  { %3599 = vset.pattern.permute.xlu1 %v3991_v17 }
 0x788   :  { %1281 = vperm.xlu1 %3599, %v3387_v4  }
 0x789   :  { %3604 = vset.pattern.permute.xlu0 %v3992_v18 }
 0x78a   :  { %1293 = vperm.xlu0 %3604, %v3387_v4  }
 0x78c   :  { %3600 = vset.pattern.permute.xlu1 %v3989_v6 }
 0x78d   :  { %1252 = vperm.xlu1 %3600, %v1241_v7  }
 0x78e   :  { %3609 = vset.pattern.permute.xlu0 %v3988_v5 }
 0x791   :  { %3603 = vset.pattern.permute.xlu1 %v3992_v18 }
 0x792   :  { %1289 = vperm.xlu1 %3603, %v1241_v7  }
 0x796   :  { %3605 = vset.pattern.permute.xlu1 %v3989_v6 }
 0x7f9   :  { %v1258_v9 = vpop.permute.xlu1 %1257 }
 0x7fa   :  { %v1261_v19 = vmul.f32 %v4249_v32, %v1258_v9 }
 0x7fb   :  { %v1266_v13 = vpop.permute.xlu0 %1265 }
 0x7fc   :  { %v1272_v34 = vmul.f32 %v4229_v23, %v1266_v13 }
 0x7fe   :  { %v1270_v14 = vpop.permute.xlu1 %1269 }
 0x7ff   :  { %v1273_v15 = vmul.f32 %v4247_v31, %v1270_v14 }
 0x800   :  { %v1278_v16 = vpop.permute.xlu0 %1277 }
 0x801   :  { %v1275_v21 = vadd.f32 %v1273_v15, %v1261_v19  ;;  %v1284_v38 = vmul.f32 %v4239_v28, %v1278_v16 }
 0x803   :  { %v1282_v20 = vpop.permute.xlu1 %1281 }
 0x804   :  { %v1285_v22 = vmul.f32 %v4252_v36, %v1282_v20 }
 0x805   :  { %v1294_v24 = vpop.permute.xlu0 %1293 }
 0x806   :  { %v1287_v25 = vadd.f32 %v1285_v22, %v1275_v21  ;;  %v1297_v26 = vmul.f32 %v4260_v46, %v1294_v24 }
 0x808   :  { %v1299_v29 = vadd.f32 %v1297_v26, %v1287_v25  ;;  %v1253_v30 = vpop.permute.xlu1 %1252 }
 0x809   :  { %v1260_v35 = vmul.f32 %v4237_v27, %v1253_v30 }
 0x80a   :  { %v1380_v37 = vadd.f32 %v3394_v33, %v1299_v29 }
 0x80b   :  { %v1274_v40 = vadd.f32 %v1272_v34, %v1260_v35 }
 0x80c   :  { %v1384_v41 = vadd.f32 %v1380_v37, %v4268_v62 }
 0x80d   :  { %v1286_v47 = vadd.f32 %v1284_v38, %v1274_v40  ;;  %v1290_v48 = vpop.permute.xlu1 %1289 }
 0x80e   :  { %v1296_v49 = vmul.f32 %v4256_v39, %v1290_v48  ;;  %v1388_v50 = vsel %vm267_vm5, %v1384_v41, -inf }
 0x80f   :  { %1389 = vmax.xlane.f32.xlu0 %v1388_v50 }
 0x810   :  { %v1298_v51 = vadd.f32 %v1296_v49, %v1286_v47 }
 0x812   :  { %v1375_v53 = vadd.f32 %v1374_v52, %v1298_v51 }
 0x814   :  { %v1383_v54 = vadd.f32 %v1375_v53, %v4264_v56 }
 0x816   :  { %v1385_v55 = vsel %vm267_vm5, %v1383_v54, -inf }
 0x817   :  { %1386 = vmax.xlane.f32.xlu1 %v1385_v55 }
 0x828   :  { %1459 = vrot.lane.b32.xlu1 %v4195_v8, %s4000_s19 }
 0x82c   :  { %1556 = vrot.lane.b32.xlu1 %v4187_v3, %s4001_s11 }
 0x898   :  { %v1390_v57 = vpop.xlane.xlu0 %1389 }
 0x899   :  { %v1392_v58 = vsub.f32 %v1384_v41, %v1390_v57 }
 0x89b   :  { %v1395_v59 = vmul.f32 1.442695, %v1392_v58 }
 0x89d   :  { %3637 = vpow2.f32 %v1395_v59 }
 0x8a0   :  { %v1387_v60 = vpop.xlane.xlu1 %1386 }
 0x8a1   :  { %v1391_v61 = vsub.f32 %v1383_v54, %v1387_v60 }
 0x8a3   :  { %v1393_v4 = vmul.f32 1.442695, %v1391_v61 }
 0x8a4   :  { %v1460_v7 = vpop.permute.xlu1 %1459 }
 0x8a5   :  { %3639 = vpow2.f32 %v1393_v4  ;;  %3395 = vmatprep.subr.mxu1 %v1460_v7 }
 0x8a6   :  { %3396 = vmatpush3.msra.mxu1 %v1460_v7 }
 0x8a8   :  { %v1557_v16 = vpop.permute.xlu1 %1556 }
 0x8aa   :  { %v3638_v9 = vpop.eup %3637 }
 0x8ab   :  { %v1400_v13 = vsel %vm267_vm5, %v3638_v9, 0.0 }
 0x8ac   :  { %1401 = vadd.xlane.f32.xlu0 %v1400_v13 }
 0x8b2   :  { %v3640_v14 = vpop.eup %3639 }
 0x8b3   :  { %v1397_v15 = vsel %vm267_vm5, %v3640_v14, 0.0 }
 0x8b4   :  { %1398 = vadd.xlane.f32.xlu1 %v1397_v15 }
 0x8c2   :  { %1457 = vrot.lane.b32.xlu0 %v4197_v10, %s4000_s19 }
 0x8c5   :  { %1552 = vrot.lane.b32.xlu1 %v4201_v11, %s4001_s11 }
 0x8c6   :  { %1554 = vrot.lane.b32.xlu0 %v4204_v12, %s4001_s11 }
 0x8c9   :  { %1691 = vrot.lane.b32.xlu1 %v4195_v8, %s4002_s27 }
 0x8ca   :  { %1689 = vrot.lane.b32.xlu0 %v4197_v10, %s4002_s27 }
 0x935   :  { %v1402_v3 = vpop.xlane.xlu0 %1401 }
 0x936   :  { %v1404_v20 = vmax.f32 %v1402_v3, 1e-20 }
 0x938   :  { %3641 = vrcp.f32 %v1404_v20 }
 0x939   :  { %v1458_v19 = vpop.permute.xlu0 %1457 }
 0x93a   :  { %3397 = vmatprep.subr.mxu1 %v1458_v19 }
 0x93b   :  { %3398 = vmatpush3.msra.mxu1 %v1458_v19 }
 0x93c   :  { %3402 = vmatprep.subr.msk.mxu1 %vm377_vm2, %v1557_v16 }
 0x93d   :  { %v1399_v21 = vpop.xlane.xlu1 %1398  ;;  %v1555_v11 = vpop.permute.xlu0 %1554 }
 0x93e   :  { %v1403_v22 = vmax.f32 %v1399_v21, 1e-20 }
 0x940   :  { %3643 = vrcp.f32 %v1403_v22 }
 0x941   :  { %v1553_v24 = vpop.permute.xlu1 %1552  ;;  %v1690_v25 = vpop.permute.xlu0 %1689 }
 0x942   :  { %3411 = vmatprep.mubr.msk.f32.mxu0 %vm377_vm2, %v1553_v24 }
 0x945   :  { %v1692_v12 = vpop.permute.xlu1 %1691  ;;  %v3642_v26 = vpop.eup %3641 }
 0x946   :  { %3407 = vmatprep.subr.msk.mxu0 %vm377_vm2, %v1692_v12  ;;  %v4404_v33 = vmul.f32 %v3642_v26, %v3638_v9 }
 0x947   :  { %3408 = vmatpush3.xpose.msk.msra.mxu0 %vm377_vm2, %v1692_v12 }
 0x948   :  { %3409 = vmatprep.subr.msk.mxu0 %vm377_vm2, %v1690_v25 }
 0x94b   :  { %3410 = vmatpush3.xpose.msk.msra.mxu0 %vm377_vm2, %v1690_v25 }
 0x94d   :  { %v3644_v29 = vpop.eup %3643 }
 0x94e   :  { %3412 = vmatmul.mubr.msk.f32.vlgmr.msra.gmra.mxu0 %vm377_vm2, %v1555_v11  ;;  %v4402_v30 = vmul.f32 %v3644_v29, %v3640_v14 }
 0x950   :  { %3399 = vmatprep.mubr.msk.f32.mxu1 %vm267_vm5, %v4402_v30 }
 0x951   :  { %3400 = vmatmul.mubr.msk.f32.vlgmr.msra.gmra.mxu1 %vm267_vm5, %v4404_v33 }
 0x952   :  { %3403 = vmatpush3.xpose.msk.msra.mxu1 %vm377_vm2, %v1557_v16  ;;  %3404 = vmatprep.mubr.msk.f32.mxu1 %vm377_vm2, %v1553_v24 }
 0x955   :  { %3405 = vmatmul.mubr.msk.f32.vlgmr.msra.gmra.mxu1 %vm377_vm2, %v1555_v11 }
 0xa0e   :  { %v3413_v60 = vpop.f32.mrf.mxu0 }
 0xa10   :  { %v1763_v21 = vpop.f32.mrf.mxu0 }
 0xa11   :  { %v4413_v34 = vpop.f32.mrf.mxu1 }
 0xa13   :  { %v4415_v35 = vpop.f32.mrf.mxu1 }
 0xa15   :  { %v3406_v37 = vpop.f32.mrf.mxu1 }
 0xa16   :  { %1646 = vperm.xlu1 %3605, %v3406_v37  }
 0xa17   :  { %v1630_v38 = vpop.f32.mrf.mxu1 }
 0xa18   :  { %1654 = vperm.xlu0 %3609, %v1630_v38  }
 0xa1a   :  { %3606 = vset.pattern.permute.xlu1 %v3988_v5 }
 0xa1b   :  { %1658 = vperm.xlu1 %3606, %v3406_v37  }
 0xa1c   :  { %3610 = vset.pattern.permute.xlu0 %v3991_v17 }
 0xa1d   :  { %1666 = vperm.xlu0 %3610, %v1630_v38  }
 0xa1f   :  { %3607 = vset.pattern.permute.xlu1 %v3991_v17 }
 0xa20   :  { %1670 = vperm.xlu1 %3607, %v3406_v37  }
 0xa21   :  { %3612 = vset.pattern.permute.xlu0 %v3992_v18 }
 0xa22   :  { %1682 = vperm.xlu0 %3612, %v3406_v37  }
 0xa24   :  { %3608 = vset.pattern.permute.xlu1 %v3989_v6 }
 0xa25   :  { %1641 = vperm.xlu1 %3608, %v1630_v38  }
 0xa26   :  { %3614 = vset.pattern.permute.xlu0 %v3988_v5 }
 0xa29   :  { %3611 = vset.pattern.permute.xlu1 %v3992_v18 }
 0xa2a   :  { %1678 = vperm.xlu1 %3611, %v1630_v38  }
 0xa2e   :  { %3613 = vset.pattern.permute.xlu1 %v3989_v6 }
 0xa91   :  { %v1647_v40 = vpop.permute.xlu1 %1646 }
 0xa92   :  { %v1650_v50 = vmul.f32 %v4249_v32, %v1647_v40 }
 0xa93   :  { %v1655_v41 = vpop.permute.xlu0 %1654 }
 0xa94   :  { %v1661_v61 = vmul.f32 %v4229_v23, %v1655_v41 }
 0xa96   :  { %v1659_v47 = vpop.permute.xlu1 %1658 }
 0xa97   :  { %v1662_v48 = vmul.f32 %v4247_v31, %v1659_v47 }
 0xa98   :  { %v1667_v49 = vpop.permute.xlu0 %1666 }
 0xa99   :  { %v1664_v52 = vadd.f32 %v1662_v48, %v1650_v50  ;;  %v1673_v9 = vmul.f32 %v4239_v28, %v1667_v49  ;;  %v1021_v49 = vmul.f32 %v4249_v32, %v4350_v0 }
 0xa9b   :  { %v1671_v51 = vpop.permute.xlu1 %1670  ;;  %v1031_v50 = vsel %vm267_vm5, %v1021_v49, 0.0 }
 0xa9c   :  { %v1674_v53 = vmul.f32 %v4252_v36, %v1671_v51  ;;  %v1023_v51 = vmul.f32 %v4247_v31, %v4350_v0 }
 0xa9d   :  { %v1683_v54 = vpop.permute.xlu0 %1682 }
 0xa9e   :  { %v1676_v55 = vadd.f32 %v1674_v53, %v1664_v52  ;;  %v1686_v57 = vmul.f32 %v4260_v46, %v1683_v54  ;;  %v1037_v52 = vsel %vm267_vm5, %v1023_v51, 0.0  ;;  %v1410_v53 = vmul.f32 %v4249_v32, %v4404_v33 }
 0xa9f   :  { %v1020_v54 = vmul.f32 %v4237_v27, %v4348_v63 }
 0xaa0   :  { %v1688_v58 = vadd.f32 %v1686_v57, %v1676_v55  ;;  %v1642_v59 = vpop.permute.xlu1 %1641  ;;  %v1420_v55 = vsel %vm267_vm5, %v1410_v53, 0.0 }
 0xaa1   :  { %v1649_v4 = vmul.f32 %v4237_v27, %v1642_v59  ;;  %v1028_v57 = vsel %vm267_vm5, %v1020_v54, 0.0  ;;  %v1022_v59 = vmul.f32 %v4229_v23, %v4348_v63 }
 0xaa2   :  { %v1769_v7 = vadd.f32 %v3413_v60, %v1688_v58  ;;  %v1412_v58 = vmul.f32 %v4247_v31, %v4404_v33 }
 0xaa3   :  { %v1663_v13 = vadd.f32 %v1661_v61, %v1649_v4  ;;  %v1034_v61 = vsel %vm267_vm5, %v1022_v59, 0.0  ;;  %v1025_v4 = vmul.f32 %v4252_v36, %v4350_v0 }
 0xaa4   :  { %v1773_v14 = vadd.f32 %v1769_v7, %v4268_v62  ;;  %v1426_v60 = vsel %vm267_vm5, %v1412_v58, 0.0  ;;  %v1409_v7 = vmul.f32 %v4237_v27, %v4402_v30 }
 0xaa5   :  { %v1675_v15 = vadd.f32 %v1673_v9, %v1663_v13  ;;  %v1679_v3 = vpop.permute.xlu1 %1678  ;;  %v1043_v9 = vsel %vm267_vm5, %v1025_v4, 0.0 }
 0xaa6   :  { %v1685_v16 = vmul.f32 %v4256_v39, %v1679_v3  ;;  %v1777_v19 = vsel %vm267_vm5, %v1773_v14, -inf  ;;  %v1417_v13 = vsel %vm267_vm5, %v1409_v7, 0.0 }
 0xaa7   :  { %1778 = vmax.xlane.f32.xlu0 %v1777_v19  ;;  %v1027_v19 = vmul.f32 %v4260_v46, %v4350_v0 }
 0xaa8   :  { %v1687_v20 = vadd.f32 %v1685_v16, %v1675_v15  ;;  %v1411_v15 = vmul.f32 %v4229_v23, %v4402_v30 }
 0xaaa   :  { %v1764_v22 = vadd.f32 %v1763_v21, %v1687_v20  ;;  %v1423_v16 = vsel %vm267_vm5, %v1411_v15, 0.0  ;;  %v1024_v20 = vmul.f32 %v4239_v28, %v4348_v63  ;;  %v1049_v21 = vsel %vm267_vm5, %v1027_v19, 0.0 }
 0xaac   :  { %v1772_v11 = vadd.f32 %v1764_v22, %v4264_v56  ;;  %v1040_v22 = vsel %vm267_vm5, %v1024_v20, 0.0 }
 0xaae   :  { %v1774_v24 = vsel %vm267_vm5, %v1772_v11, -inf }
 0xaaf   :  { %1775 = vmax.xlane.f32.xlu1 %v1774_v24  ;;  %v1413_v24 = vmul.f32 %v4239_v28, %v4402_v30 }
 0xab1   :  { %v1429_v0 = vsel %vm267_vm5, %v1413_v24, 0.0 }
 0xb30   :  { %v1779_v12 = vpop.xlane.xlu0 %1778 }
 0xb31   :  { %v1781_v25 = vsub.f32 %v1773_v14, %v1779_v12  ;;  %v1414_v14 = vmul.f32 %v4252_v36, %v4404_v33 }
 0xb33   :  { %v1784_v26 = vmul.f32 1.442695, %v1781_v25  ;;  %v1432_v3 = vsel %vm267_vm5, %v1414_v14, 0.0  ;;  %v1026_v25 = vmul.f32 %v4256_v39, %v4348_v63 }
 0xb35   :  { %3645 = vpow2.f32 %v1784_v26  ;;  %v1046_v26 = vsel %vm267_vm5, %v1026_v25, 0.0 }
 0xb38   :  { %v1776_v29 = vpop.xlane.xlu1 %1775 }
 0xb39   :  { %v1780_v37 = vsub.f32 %v1772_v11, %v1776_v29  ;;  %v1416_v11 = vmul.f32 %v4260_v46, %v4404_v33  ;;  %v1415_v29 = vmul.f32 %v4256_v39, %v4402_v30 }
 0xb3b   :  { %v1782_v38 = vmul.f32 1.442695, %v1780_v37  ;;  %v1438_v12 = vsel %vm267_vm5, %v1416_v11, 0.0  ;;  %v1435_v33 = vsel %vm267_vm5, %v1415_v29, 0.0 }
 0xb3d   :  { %3647 = vpow2.f32 %v1782_v38 }
 0xb42   :  { %v4437_v40 = vpop.eup %3645 }
 0xb43   :  { %v1789_v41 = vsel %vm267_vm5, %v4437_v40, 0.0 }
 0xb44   :  { %1790 = vadd.xlane.f32.xlu0 %v1789_v41 }
 0xb4a   :  { %v4441_v47 = vpop.eup %3647 }
 0xb4b   :  { %v1786_v48 = vsel %vm267_vm5, %v4441_v47, 0.0 }
 0xb4c   :  { %1787 = vadd.xlane.f32.xlu1 %v1786_v48 }
 0xb5a   :  { %1846 = vrot.lane.b32.xlu0 %v4197_v10, %s4003_s15 }
 0xb5d   :  { %1848 = vrot.lane.b32.xlu1 %v4195_v8, %s4003_s15 }
 0xb79   :  { %1032 = vadd.xlane.f32.xlu0 %v1031_v50 }
 0xb7d   :  { %1038 = vadd.xlane.f32.xlu0 %v1037_v52 }
 0xb81   :  { %1421 = vadd.xlane.f32.xlu0 %v1420_v55  ;;  %1029 = vadd.xlane.f32.xlu1 %v1028_v57 }
 0xb85   :  { %1427 = vadd.xlane.f32.xlu0 %v1426_v60  ;;  %1035 = vadd.xlane.f32.xlu1 %v1034_v61  ;;  %v655_v61 = vlaneseq }
 0xb89   :  { %1044 = vadd.xlane.f32.xlu0 %v1043_v9  ;;  %1418 = vadd.xlane.f32.xlu1 %v1417_v13 }
 0xb8d   :  { %1433 = vadd.xlane.f32.xlu0 %v1432_v3  ;;  %1424 = vadd.xlane.f32.xlu1 %v1423_v16  ;;  %v3671_v3 = vld [vmem:[#allocation5] sm:$0xf] }
 0xb91   :  { %1050 = vadd.xlane.f32.xlu0 %v1049_v21  ;;  %1041 = vadd.xlane.f32.xlu1 %v1040_v22 }
 0xb95   :  { %1439 = vadd.xlane.f32.xlu0 %v1438_v12  ;;  %1430 = vadd.xlane.f32.xlu1 %v1429_v0 }
 0xb99   :  { %1047 = vadd.xlane.f32.xlu1 %v1046_v26 }
 0xb9d   :  { %1436 = vadd.xlane.f32.xlu1 %v1435_v33 }
 0xbcd   :  { %v1791_v37 = vpop.xlane.xlu0 %1790 }
 0xbce   :  { %v1793_v38 = vmax.f32 %v1791_v37, 1e-20 }
 0xbd0   :  { %3649 = vrcp.f32 %v1793_v38 }
 0xbd1   :  { %v1847_v63 = vpop.permute.xlu0 %1846 }
 0xbd5   :  { %v1788_v41 = vpop.xlane.xlu1 %1787 }
 0xbd6   :  { %v1792_v48 = vmax.f32 %v1788_v41, 1e-20 }
 0xbd8   :  { %3651 = vrcp.f32 %v1792_v48 }
 0xbd9   :  { %v1849_v49 = vpop.permute.xlu1 %1848 }
 0xbda   :  { %3414 = vmatprep.subr.mxu1 %v1849_v49 }
 0xbdb   :  { %3415 = vmatpush3.msra.mxu1 %v1849_v49 }
 0xbdc   :  { %3416 = vmatprep.subr.mxu1 %v1847_v63 }
 0xbdd   :  { %v3650_v50 = vpop.eup %3649  ;;  %3417 = vmatpush3.msra.mxu1 %v1847_v63 }
 0xbde   :  { %v1797_v51 = vmul.f32 %v3650_v50, %v4437_v40 }
 0xbe0   :  { %v1799_v30 = vmul.f32 %v4249_v32, %v1797_v51  ;;  %v1801_v53 = vmul.f32 %v4247_v31, %v1797_v51  ;;  %v1803_v58 = vmul.f32 %v4252_v36, %v1797_v51  ;;  %v1805_v59 = vmul.f32 %v4260_v46, %v1797_v51 }
 0xbe2   :  { %v1809_v52 = vsel %vm267_vm5, %v1799_v30, 0.0  ;;  %v1815_v55 = vsel %vm267_vm5, %v1801_v53, 0.0  ;;  %v1821_v40 = vsel %vm267_vm5, %v1803_v58, 0.0  ;;  %v1827_v60 = vsel %vm267_vm5, %v1805_v59, 0.0 }
 0xbe3   :  { %1810 = vadd.xlane.f32.xlu0 %v1809_v52 }
 0xbe5   :  { %v3652_v54 = vpop.eup %3651 }
 0xbe6   :  { %v4501_v57 = vmul.f32 %v3652_v54, %v4441_v47  ;;  %v4510_v47 = vshrl.u32 %v655_v61, 7 }
 0xbe7   :  { %1816 = vadd.xlane.f32.xlu0 %v1815_v55 }
 0xbe8   :  { %3418 = vmatprep.mubr.msk.f32.mxu1 %vm267_vm5, %v4501_v57  ;;  %v4513_v9 = vsub.s32 0, %v4510_v47  ;;  %v4516_v13 = vsub.s32 1, %v4510_v47  ;;  %v673_v24 = vsub.s32 2, %v4510_v47  ;;  %v681_v29 = vsub.s32 3, %v4510_v47 }
 0xbe9   :  { %3419 = vmatmul.mubr.msk.f32.vlgmr.msra.gmra.mxu1 %vm267_vm5, %v1797_v51 }
 0xbea   :  { %v4519_v16 = vrot.slane %v3671_v3, %v4513_v9  ;;  %v4522_v19 = vrot.slane %v3671_v3, %v4516_v13  ;;  %v4529_v26 = vrot.slane %v3671_v3, %v673_v24  ;;  %v4538_v63 = vrot.slane %v3671_v3, %v681_v29 }
 0xbeb   :  { %1822 = vadd.xlane.f32.xlu0 %v1821_v40 }
 0xbef   :  { %1828 = vadd.xlane.f32.xlu0 %v1827_v60 }
 0xc02   :  { %v1033_v4 = vpop.xlane.xlu0 %1032 }
 0xc03   :  { %v1053_v41 = vmul.f32 %v1033_v4, %v4519_v16 }
 0xc06   :  { %v1039_v7 = vpop.xlane.xlu0 %1038 }
 0xc07   :  { %v1057_v33 = vmul.f32 %v1039_v7, %v4522_v19 }
 0xc09   :  { %v1059_v50 = vadd.f32 %v1057_v33, %v1053_v41 }
 0xc0a   :  { %v1422_v14 = vpop.xlane.xlu0 %1421  ;;  %v1030_v15 = vpop.xlane.xlu1 %1029 }
 0xc0b   :  { %v1442_v22 = vmul.f32 %v1422_v14, %v4519_v16  ;;  %v1052_v59 = vmul.f32 %v1030_v15, %v4519_v16 }
 0xc0e   :  { %v1428_v20 = vpop.xlane.xlu0 %1427  ;;  %v1036_v21 = vpop.xlane.xlu1 %1035 }
 0xc0f   :  { %v1446_v11 = vmul.f32 %v1428_v20, %v4522_v19  ;;  %v1056_v55 = vmul.f32 %v1036_v21, %v4522_v19 }
 0xc11   :  { %v1448_v12 = vadd.f32 %v1446_v11, %v1442_v22  ;;  %v1058_v61 = vadd.f32 %v1056_v55, %v1052_v59  ;;  %v1804_v59 = vmul.f32 %v4256_v39, %v4501_v57 }
 0xc12   :  { %v1045_v0 = vpop.xlane.xlu0 %1044  ;;  %v1419_v25 = vpop.xlane.xlu1 %1418 }
 0xc13   :  { %v1061_v48 = vmul.f32 %v1045_v0, %v4529_v26  ;;  %v1441_v14 = vmul.f32 %v1419_v25, %v4519_v16 }
 0xc15   :  { %v1063_v53 = vadd.f32 %v1061_v48, %v1059_v50  ;;  %v626_v48 = vmul.f32 %v4247_v31, %v4294_v43  ;;  %v628_v50 = vmul.f32 %v4252_v36, %v4294_v43 }
 0xc16   :  { %v1434_v37 = vpop.xlane.xlu0 %1433  ;;  %v1425_v38 = vpop.xlane.xlu1 %1424 }
 0xc17   :  { %v1450_v49 = vmul.f32 %v1434_v37, %v4529_v26  ;;  %v1445_v4 = vmul.f32 %v1425_v38, %v4522_v19  ;;  %v623_v37 = vmul.f32 %v4237_v27, %v4292_v42  ;;  %v625_v38 = vmul.f32 %v4229_v23, %v4292_v42 }
 0xc19   :  { %v1452_v51 = vadd.f32 %v1450_v49, %v1448_v12  ;;  %v1447_v21 = vadd.f32 %v1445_v4, %v1441_v14  ;;  %v631_v25 = vsel %vm267_vm5, %v623_v37, 0.0  ;;  %v637_v41 = vsel %vm267_vm5, %v625_v38, 0.0 }
 0xc1a   :  { %v1051_v30 = vpop.xlane.xlu0 %1050  ;;  %v1042_v52 = vpop.xlane.xlu1 %1041  ;;  %v640_v49 = vsel %vm267_vm5, %v626_v48, 0.0  ;;  %v624_v14 = vmul.f32 %v4249_v32, %v4294_v43 }
 0xc1b   :  { %v1065_v54 = vmul.f32 %v1051_v30, %v4538_v63  ;;  %v1060_v60 = vmul.f32 %v1042_v52, %v4529_v26  ;;  %v646_v30 = vsel %vm267_vm5, %v628_v50, 0.0  ;;  %v1798_v52 = vmul.f32 %v4237_v27, %v4501_v57 }
 0xc1d   :  { %v1067_v58 = vadd.f32 %v1065_v54, %v1063_v53  ;;  %v1062_v3 = vadd.f32 %v1060_v60, %v1058_v61  ;;  %v1806_v53 = vsel %vm267_vm5, %v1798_v52, 0.0  ;;  %v1800_v54 = vmul.f32 %v4229_v23, %v4501_v57 }
 0xc1e   :  { %v1431_v40 = vpop.xlane.xlu1 %1430  ;;  %v1824_v60 = vsel %vm267_vm5, %v1804_v59, 0.0  ;;  %v1440_v61 = vpop.xlane.xlu0 %1439 }
 0xc1f   :  { %1078 = vrot.lane.b32.xlu0 %v1067_v58, %s3995_s26  ;;  %v1449_v20 = vmul.f32 %v1431_v40, %v4529_v26  ;;  %v1812_v55 = vsel %vm267_vm5, %v1800_v54, 0.0  ;;  %v1802_v58 = vmul.f32 %v4239_v28, %v4501_v57  ;;  %v1454_v4 = vmul.f32 %v1440_v61, %v4538_v63 }
 0xc21   :  { %v1451_v0 = vadd.f32 %v1449_v20, %v1447_v21  ;;  %v1818_v40 = vsel %vm267_vm5, %v1802_v58, 0.0  ;;  %v634_v20 = vsel %vm267_vm5, %v624_v14, 0.0  ;;  %v629_v21 = vmul.f32 %v4256_v39, %v4292_v42 }
 0xc22   :  { %v1048_v7 = vpop.xlane.xlu1 %1047 }
 0xc23   :  { %v1064_v22 = vmul.f32 %v1048_v7, %v4538_v63  ;;  %v1456_v7 = vadd.f32 %v1454_v4, %v1452_v51  ;;  %v649_v51 = vsel %vm267_vm5, %v629_v21, 0.0 }
 0xc25   :  { %v1066_v11 = vadd.f32 %v1064_v22, %v1062_v3  ;;  %v627_v22 = vmul.f32 %v4239_v28, %v4292_v42  ;;  %v4004_v42 = vmov 0.0  }
 0xc26   :  { %v1437_v12 = vpop.xlane.xlu1 %1436  ;;  %2138 = vmatprep.mubr.f32.mxu1 %v4004_v42 }
 0xc27   :  { %v1453_v15 = vmul.f32 %v1437_v12, %v4538_v63  ;;  %1076 = vrot.lane.b32.xlu1 %v1066_v11, %s3995_s26  ;;  %v643_v57 = vsel %vm267_vm5, %v627_v22, 0.0 }
 0xc29   :  { %v1455_v33 = vadd.f32 %v1453_v15, %v1451_v0 }
 0xc2b   :  { %1465 = vrot.lane.b32.xlu1 %v1455_v33, %s3998_s8 }
 0xc3e   :  { %632 = vadd.xlane.f32.xlu0 %v631_v25 }
 0xc42   :  { %638 = vadd.xlane.f32.xlu0 %v637_v41 }
 0xc46   :  { %641 = vadd.xlane.f32.xlu0 %v640_v49 }
 0xc4a   :  { %647 = vadd.xlane.f32.xlu0 %v646_v30  ;;  %v268_v30 = vsel %vm267_vm5, %v4264_v56, -inf }
 0xc4f   :  { %1807 = vadd.xlane.f32.xlu1 %v1806_v53 }
 0xc53   :  { %1813 = vadd.xlane.f32.xlu1 %v1812_v55 }
 0xc57   :  { %1819 = vadd.xlane.f32.xlu1 %v1818_v40 }
 0xc5b   :  { %1825 = vadd.xlane.f32.xlu1 %v1824_v60 }
 0xc6c   :  { %1467 = vrot.lane.b32.xlu1 %v1456_v7, %s3998_s8  ;;  %v1811_v3 = vpop.xlane.xlu0 %1810 }
 0xc6d   :  { %v1831_v33 = vmul.f32 %v1811_v3, %v4519_v16 }
 0xc70   :  { %v1817_v11 = vpop.xlane.xlu0 %1816 }
 0xc71   :  { %v1835_v0 = vmul.f32 %v1817_v11, %v4522_v19 }
 0xc73   :  { %v1837_v25 = vadd.f32 %v1835_v0, %v1831_v33 }
 0xc74   :  { %v1823_v12 = vpop.xlane.xlu0 %1822 }
 0xc75   :  { %v1839_v37 = vmul.f32 %v1823_v12, %v4529_v26 }
 0xc77   :  { %v1841_v41 = vadd.f32 %v1839_v37, %v1837_v25 }
 0xc78   :  { %v1829_v15 = vpop.xlane.xlu0 %1828 }
 0xc79   :  { %v1843_v38 = vmul.f32 %v1829_v15, %v4538_v63  ;;  %v271_v15 = vsel %vm267_vm5, %v4268_v62, -inf }
 0xc7b   :  { %v1845_v48 = vadd.f32 %v1843_v38, %v1841_v41 }
 0xc90   :  { %635 = vadd.xlane.f32.xlu1 %v634_v20 }
 0xc91   :  { %v1079_v49 = vpop.permute.xlu0 %1078 }
 0xc94   :  { %644 = vadd.xlane.f32.xlu1 %v643_v57 }
 0xc98   :  { %650 = vadd.xlane.f32.xlu1 %v649_v51 }
 0xc99   :  { %v1077_v55 = vpop.permute.xlu1 %1076 }
 0xc9a   :  { %v1155_v60 = vadd.f32 %v4361_v2, %v1077_v55 }
 0xc9d   :  { %v1466_v40 = vpop.permute.xlu1 %1465 }
 0xc9e   :  { %v1544_v7 = vadd.f32 %v4415_v35, %v1466_v40  ;;  %v630_v35 = vmul.f32 %v4260_v46, %v4294_v43 }
 0xca0   :  { %v652_v0 = vsel %vm267_vm5, %v630_v35, 0.0 }
 0xca9   :  { %1856 = vrot.lane.b32.xlu1 %v1845_v48, %s4001_s11 }
 0xcc7   :  { %v633_v50 = vpop.xlane.xlu0 %632 }
 0xcc8   :  { %v659_v53 = vmul.f32 %v4519_v16, %v633_v50  ;;  %v1160_v50 = vadd.f32 %v4359_v1, %v1079_v49 }
 0xccb   :  { %v639_v52 = vpop.xlane.xlu0 %638 }
 0xccc   :  { %v667_v54 = vmul.f32 %v4522_v19, %v639_v52 }
 0xccd   :  { %269 = vmax.xlane.f32.xlu1 %v268_v30 }
 0xcce   :  { %v669_v58 = vadd.f32 %v667_v54, %v659_v53  ;;  %v3420_v54 = vpop.f32.mrf.mxu1 }
 0xccf   :  { %v642_v33 = vpop.xlane.xlu0 %641 }
 0xcd0   :  { %v668_v25 = vmul.f32 %v4522_v19, %v642_v33 }
 0xcd3   :  { %v648_v1 = vpop.xlane.xlu0 %647 }
 0xcd8   :  { %v1808_v59 = vpop.xlane.xlu1 %1807 }
 0xcd9   :  { %v1830_v3 = vmul.f32 %v1808_v59, %v4519_v16  ;;  %v3673_v59 = vld [vmem:[%s4877_s3] sm:$0xff] }
 0xcdc   :  { %v1814_v61 = vpop.xlane.xlu1 %1813 }
 0xcdd   :  { %v1834_v4 = vmul.f32 %v1814_v61, %v4522_v19  ;;  %v1932_v19 = vpop.f32.mrf.mxu1  ;;  %v2046_v61 = vld [vmem:[#allocation10 + $0x38] sm:$0xff] }
 0xcde   :  { %1943 = vrot.lane.b32.xlu1 %v1155_v60, %s3977_s5  ;;  %v2048_v60 = vld [vmem:[#allocation10 + $0x48] sm:$0xf] }
 0xcdf   :  { %v1836_v22 = vadd.f32 %v1834_v4, %v1830_v3  ;;  %3188 = vmatprep.subr.msk.mxu1 %vm296_vm0, %v2048_v60  ;;  %v2045_v4 = vld [vmem:[#allocation10 + $0x30] sm:$0xff]  ;;  %v2042_v3 = vld [vmem:[#allocation10 + $0x18] sm:$0xff] }
 0xce0   :  { %v1820_v14 = vpop.xlane.xlu1 %1819 }
 0xce1   :  { %v1838_v20 = vmul.f32 %v1820_v14, %v4529_v26  ;;  %v2043_v14 = vld [vmem:[#allocation10 + $0x20] sm:$0xff] }
 0xce2   :  { %1951 = vrot.lane.b32.xlu1 %v1544_v7, %s3982_s24  ;;  %v2044_v7 = vld [vmem:[#allocation10 + $0x28] sm:$0xff] }
 0xce3   :  { %v1840_v21 = vadd.f32 %v1838_v20, %v1836_v22  ;;  %v2040_v20 = vld [vmem:[#allocation10 + $0x8] sm:$0xff]  ;;  %v2039_v22 = vld [vmem:[#allocation10] sm:$0xff] }
 0xce4   :  { %v1826_v57 = vpop.xlane.xlu1 %1825 }
 0xce5   :  { %v1842_v11 = vmul.f32 %v1826_v57, %v4538_v63 }
 0xce7   :  { %v1844_v2 = vadd.f32 %v1842_v11, %v1840_v21 }
 0xce8   :  { %v1468_v51 = vpop.permute.xlu1 %1467 }
 0xce9   :  { %v1549_v12 = vadd.f32 %v4413_v34, %v1468_v51  ;;  %1854 = vrot.lane.b32.xlu0 %v1844_v2, %s4001_s11  ;;  %v676_v2 = vmul.f32 %v4529_v26, %v648_v1 }
 0xceb   :  { %1953 = vrot.lane.b32.xlu1 %v1549_v12, %s3982_s24  ;;  %s4005_s24 = smov 24  }
 0xd08   :  { %653 = vadd.xlane.f32.xlu0 %v652_v0 }
 0xd0c   :  { %272 = vmax.xlane.f32.xlu0 %v271_v15 }
 0xd19   :  { %v636_v37 = vpop.xlane.xlu1 %635 }
 0xd1a   :  { %v660_v34 = vmul.f32 %v4519_v16, %v636_v37  ;;  %v3672_v16 = vld [vmem:[%s4877_s3 + $0x8] sm:$0xff] }
 0xd1c   :  { %v670_v38 = vadd.f32 %v668_v25, %v660_v34 }
 0xd1d   :  { %v645_v41 = vpop.xlane.xlu1 %644 }
 0xd1e   :  { %v675_v48 = vmul.f32 %v4529_v26, %v645_v41  ;;  %v678_v35 = vadd.f32 %v676_v2, %v670_v38 }
 0xd20   :  { %v677_v43 = vadd.f32 %v675_v48, %v669_v58 }
 0xd21   :  { %v651_v30 = vpop.xlane.xlu1 %650 }
 0xd22   :  { %v683_v52 = vmul.f32 %v4538_v63, %v651_v30  ;;  %1945 = vrot.lane.b32.xlu0 %v1160_v50, %s3977_s5 }
 0xd24   :  { %v685_v53 = vadd.f32 %v683_v52, %v677_v43 }
 0xd25   :  { %v1857_v55 = vpop.permute.xlu1 %1856 }
 0xd26   :  { %v1938_v40 = vadd.f32 %v3420_v54, %v1857_v55 }
 0xd28   :  { %1961 = vrot.lane.b32.xlu1 %v1938_v40, %s4005_s24 }
 0xd2c   :  { %1976 = vrot.lane.b32.xlu1 %v4195_v8, %s4006_s28  ;;  %v2047_v8 = vld [vmem:[#allocation10 + $0x40] sm:$0xf] }
 0xd2d   :  { %3189 = vmatpush1.msk.msra.mxu1 %vm296_vm0, %v2047_v8 }
 0xd2e   :  { %2098 = vmatprep.subr.mxu1 %v2046_v61 }
 0xd2f   :  { %2099 = vmatpush1.msra.mxu1 %v2045_v4 }
 0xd30   :  { %2032 = vrot.lane.b32.xlu1 %v3672_v16, %s4006_s28  ;;  %2100 = vmatprep.subr.mxu1 %v2044_v7 }
 0xd31   :  { %2101 = vmatpush1.msra.mxu1 %v2043_v14 }
 0xd32   :  { %2102 = vmatprep.subr.mxu1 %v2042_v3 }
 0xd56   :  { %v270_v57 = vpop.xlane.xlu1 %269 }
 0xd57   :  { %vm274_vm8 = vcmp.eq.f32.partialorder %v270_v57, 0.0 }
 0xd58   :  { %v4643_v54 = vsel %vm274_vm8, 1.0, %v4004_v42 }
 0xd5a   :  { %v1944_v11 = vpop.permute.xlu1 %1943 }
 0xd5b   :  { %v1855_v49 = vpop.permute.xlu0 %1854 }
 0xd5c   :  { %v1933_v58 = vadd.f32 %v1932_v19, %v1855_v49 }
 0xd5e   :  { %1959 = vrot.lane.b32.xlu0 %v1933_v58, %s4005_s24  ;;  %v1952_v0 = vpop.permute.xlu1 %1951 }
 0xd62   :  { %1974 = vrot.lane.b32.xlu0 %v4197_v10, %s4006_s28  ;;  %v2041_v10 = vld [vmem:[#allocation10 + $0x10] sm:$0xff]  ;;  %v1954_v25 = vpop.permute.xlu1 %1953 }
 0xd63   :  { %2103 = vmatpush1.msra.mxu1 %v2041_v10 }
 0xd64   :  { %2104 = vmatprep.subr.mxu1 %v2040_v20 }
 0xd65   :  { %2105 = vmatpush1.msra.mxu1 %v2039_v22 }
 0xd66   :  { %2030 = vrot.lane.b32.xlu0 %v3673_v59, %s4006_s28  ;;  %3468 = vmatprep.subr.mxu1 %v4004_v42 }
 0xd91   :  { %v654_v21 = vpop.xlane.xlu0 %653 }
 0xd92   :  { %v684_v51 = vmul.f32 %v4538_v63, %v654_v21  ;;  %v766_v63 = vadd.f32 %v4305_v45, %v685_v53 }
 0xd94   :  { %v686_v15 = vadd.f32 %v684_v51, %v678_v35  ;;  %v1965_v38 = vsel %vm377_vm2, %v766_v63, %v1944_v11 }
 0xd95   :  { %v273_v12 = vpop.xlane.xlu0 %272 }
 0xd96   :  { %v771_v37 = vadd.f32 %v4303_v44, %v686_v15  ;;  %vm275_vm6 = vcmp.eq.f32.partialorder %v273_v12, 0.0  ;;  %v1967_v44 = vsel %vm267_vm5, %v1965_v38, %v1952_v0 }
 0xd97   :  { %v4636_v50 = vsel %vm275_vm6, 1.0, %v4004_v42 }
 0xd99   :  { %v1946_v33 = vpop.permute.xlu0 %1945 }
 0xd9a   :  { %v1966_v34 = vsel %vm377_vm2, %v771_v37, %v1946_v33  ;;  %v1962_v48 = vpop.permute.xlu1 %1961 }
 0xd9b   :  { %v1968_v41 = vsel %vm267_vm5, %v1966_v34, %v1954_v25  ;;  %v3186_v25 = vld [vmem:[#allocation7] ss:$0 sm:$0xff] }
 0xd9c   :  { %v1971_v26 = vsel %vm1969_vm7, %v1968_v41, %v1962_v48  ;;  %v3187_v48 = vld [vmem:[#allocation8] ss:$0 sm:$0xff] }
 0xd9d   :  { %v1973_v43 = vmul.f32 %v4636_v50, %v1971_v26 }
 0xd9e   :  { %v1977_v30 = vpop.permute.xlu1 %1976 }
 0xd9f   :  { %v1981_v16 = vadd.f32 %v1977_v30, %v1973_v43 }
 0xda1   :  { %v1984_v45 = vsel %vm1982_vm9, %v1981_v16, 0.0 }
 0xda2   :  { %v2033_v43 = vpop.permute.xlu1 %2032 }
 0xdd0   :  { %v1960_v52 = vpop.permute.xlu0 %1959 }
 0xdd1   :  { %v1970_v55 = vsel %vm1969_vm7, %v1967_v44, %v1960_v52 }
 0xdd2   :  { %v1972_v40 = vmul.f32 %v4643_v54, %v1970_v55 }
 0xdd4   :  { %v1975_v1 = vpop.permute.xlu0 %1974 }
 0xdd5   :  { %v1980_v19 = vadd.f32 %v1975_v1, %v1972_v40  ;;  %v4661_v40 = vld [vmem:[#allocation11] sm:$0xf] }
 0xdd6   :  { %3421 = vmatprep.subr.msk.mxu0 %vm2061_vm10, %v4661_v40 }
 0xdd7   :  { %v1983_v53 = vsel %vm1982_vm9, %v1980_v19, 0.0  ;;  %3422 = vmatpush3.xpose.msk.msra.mxu0 %vm2061_vm10, %v4661_v40 }
 0xdd8   :  { %v1985_v49 = vadd.f32 %v1984_v45, %v1983_v53  ;;  %v2031_v38 = vpop.permute.xlu0 %2030 }
 0xdda   :  { %v1986_v58 = vrot.slane %v1985_v49, 4 }
 0xddc   :  { %v1987_v59 = vadd.f32 %v1986_v58, %v1985_v49 }
 0xdde   :  { %v1988_v60 = vrot.slane %v1987_v59, 2 }
 0xde0   :  { %v1989_v8 = vadd.f32 %v1988_v60, %v1987_v59 }
 0xde2   :  { %v1990_v61 = vrot.slane %v1989_v8, 1 }
 0xde4   :  { %v1991_v4 = vadd.f32 %v1990_v61, %v1989_v8 }
 0xde6   :  { %v1993_v7 = vmul.f32 0.0625, %v1991_v4 }
 0xde8   :  { %v1994_v14 = vsub.f32 %v1980_v19, %v1993_v7  ;;  %v1995_v3 = vsub.f32 %v1981_v16, %v1993_v7  ;;  %v4670_v16 = vld [vmem:[%s4855_s10] sm:$0x3]  ;;  %s4008_s10 = smov 20  }
 0xde9   :  { %v2054_v1 = vrot.slane %v4670_v16, %v4513_v9 }
 0xdea   :  { %v1996_v10 = vmul.f32 %v1994_v14, %v1994_v14  ;;  %v1997_v20 = vmul.f32 %v1995_v3, %v1995_v3 }
 0xdec   :  { %v1998_v22 = vsel %vm1982_vm9, %v1996_v10, 0.0  ;;  %v1999_v57 = vsel %vm1982_vm9, %v1997_v20, 0.0 }
 0xded   :  { %v2000_v21 = vadd.f32 %v1999_v57, %v1998_v22 }
 0xdef   :  { %v2001_v11 = vrot.slane %v2000_v21, 4 }
 0xdf1   :  { %v2002_v2 = vadd.f32 %v2001_v11, %v2000_v21 }
 0xdf3   :  { %v2003_v51 = vrot.slane %v2002_v2, 2 }
 0xdf5   :  { %v2004_v12 = vadd.f32 %v2003_v51, %v2002_v2 }
 0xdf7   :  { %v2005_v35 = vrot.slane %v2004_v12, 1 }
 0xdf9   :  { %v2006_v0 = vadd.f32 %v2005_v35, %v2004_v12 }
 0xdfb   :  { %v2007_v15 = vmul.f32 0.0625, %v2006_v0 }
 0xdfd   :  { %v2008_v33 = vadd.f32 1e-05, %v2007_v15 }
 0xdff   :  { %3653 = vrsqrt.f32 %v2008_v33 }
 0xe0c   :  { %v3654_v37 = vpop.eup %3653 }
 0xe0d   :  { %v2010_v34 = vmul.f32 %v3654_v37, %v1994_v14  ;;  %v2011_v41 = vmul.f32 %v3654_v37, %v1995_v3 }
 0xe0f   :  { %v2019_v26 = vmul.f32 %v3186_v25, %v2010_v34  ;;  %v2020_v63 = vmul.f32 %v3186_v25, %v2011_v41 }
 0xe11   :  { %v2028_v44 = vadd.f32 %v3187_v48, %v2019_v26  ;;  %v2029_v30 = vadd.f32 %v3187_v48, %v2020_v63 }
 0xe13   :  { %v4651_v52 = vsel %vm1982_vm9, %v2028_v44, %v2031_v38  ;;  %v4654_v55 = vsel %vm1982_vm9, %v2029_v30, %v2033_v43 }
 0xe14   :  { %3190 = vmatmul.mubr.msk.f32.vlgmr.msra.gmra.mxu1 %vm2061_vm10, %v4651_v52 }
 0xe15   :  { %2144 = vmatprep.mubr.f32.mxu1 %v4004_v42 }
 0xe18   :  { %3191 = vmatmul.mubr.msk.f32.gmra.mxu1 %vm2061_vm10, %v4654_v55 }
 0xe19   :  { %3486 = vmatprep.mubr.msk.f32.mxu1 %vm4010_vm11, %v4004_v42 }
 0xed4   :  { %v2140_v19 = vpop.f32.mrf.mxu1 }
 0xed5   :  { %v4674_v45 = vadd.f32 %v2140_v19, %v2054_v1 }
 0xed6   :  { %v4676_v53 = vpop.f32.mrf.mxu1 }
 0xed7   :  { %2289 = vrot.lane.b32.xlu1 %v4674_v45, %s4007_s4  ;;  %v2151_v49 = vmul.f32 0.16666667, %v4674_v45 }
 0xed8   :  { %v2146_v58 = vpop.f32.mrf.mxu1 }
 0xed9   :  { %v4680_v59 = vadd.f32 %v2146_v58, %v2054_v1  ;;  %3423 = vmatprep.mubr.msk.f32.mxu0 %vm2061_vm10, %v2151_v49 }
 0xedb   :  { %v2152_v60 = vmul.f32 0.16666667, %v4680_v59  ;;  %2291 = vrot.lane.b32.xlu0 %v4680_v59, %s4007_s4 }
 0xedd   :  { %3424 = vmatmul.mubr.msk.f32.vlgmr.msra.gmra.mxu0 %vm2061_vm10, %v2152_v60 }
 0xede   :  { %3430 = vmatprep.mubr.msk.f32.mxu0 %vm2061_vm10, %v2151_v49 }
 0xf49   :  { %v2290_v61 = vpop.permute.xlu1 %2289 }
 0xf4d   :  { %v2292_v8 = vpop.permute.xlu0 %2291 }
 0xf4e   :  { %3426 = vmatprep.subr.msk.mxu0 %vm2061_vm10, %v2292_v8 }
 0xf4f   :  { %3427 = vmatpush3.xpose.msk.msra.mxu0 %vm2061_vm10, %v2292_v8 }
 0xf50   :  { %3428 = vmatprep.subr.msk.mxu0 %vm2061_vm10, %v2290_v61 }
 0xf53   :  { %3429 = vmatpush3.xpose.msk.msra.mxu0 %vm2061_vm10, %v2290_v61 }
 0xf56   :  { %3431 = vmatmul.mubr.msk.f32.vlgmr.msra.gmra.mxu0 %vm2061_vm10, %v2152_v60 }
 0xf9d   :  { %v3425_v4 = vpop.f32.mrf.mxu0 }
 0xf9e   :  { %2256 = vperm.xlu0 %3614, %v3425_v4   ;;  %2244 = vperm.xlu1 %3613, %v3425_v4  }
 0xf9f   :  { %v2228_v7 = vpop.f32.mrf.mxu0 }
 0xfa2   :  { %3616 = vset.pattern.permute.xlu0 %v3989_v6  ;;  %3615 = vset.pattern.permute.xlu1 %v3991_v17 }
 0xfa3   :  { %2268 = vperm.xlu1 %3615, %v3425_v4   ;;  %2239 = vperm.xlu0 %3616, %v2228_v7  }
 0xfa7   :  { %3617 = vset.pattern.permute.xlu1 %v3988_v5  ;;  %3619 = vset.pattern.permute.xlu0 %v3992_v18 }
 0xfa8   :  { %2252 = vperm.xlu1 %3617, %v2228_v7   ;;  %2276 = vperm.xlu0 %3619, %v2228_v7  }
 0xfac   :  { %3618 = vset.pattern.permute.xlu1 %v3991_v17 }
 0xfad   :  { %2264 = vperm.xlu1 %3618, %v2228_v7  }
 0xfb1   :  { %3620 = vset.pattern.permute.xlu1 %v3992_v18 }
 0xfb2   :  { %2280 = vperm.xlu1 %3620, %v3425_v4  }
0x1016   :  { %v3432_v18 = vpop.f32.mrf.mxu0 }
0x1018   :  { %v2363_v25 = vpop.f32.mrf.mxu0 }
0x1019   :  { %v2245_v14 = vpop.permute.xlu1 %2244  ;;  %v2257_v3 = vpop.permute.xlu0 %2256 }
0x101a   :  { %v2260_v5 = vmul.f32 %v4247_v31, %v2257_v3  ;;  %v2248_v21 = vmul.f32 %v4249_v32, %v2245_v14 }
0x101c   :  { %v2262_v15 = vadd.f32 %v2260_v5, %v2248_v21 }
0x101e   :  { %v2269_v10 = vpop.permute.xlu1 %2268  ;;  %v2240_v6 = vpop.permute.xlu0 %2239 }
0x101f   :  { %v2247_v57 = vmul.f32 %v4237_v27, %v2240_v6  ;;  %v2272_v12 = vmul.f32 %v4252_v36, %v2269_v10 }
0x1021   :  { %v2274_v34 = vadd.f32 %v2272_v12, %v2262_v15 }
0x1023   :  { %v2253_v20 = vpop.permute.xlu1 %2252  ;;  %v2277_v11 = vpop.permute.xlu0 %2276 }
0x1024   :  { %v2259_v22 = vmul.f32 %v4229_v23, %v2253_v20  ;;  %v2283_v35 = vmul.f32 %v4256_v39, %v2277_v11 }
0x1026   :  { %v2261_v17 = vadd.f32 %v2259_v22, %v2247_v57 }
0x1028   :  { %v2265_v2 = vpop.permute.xlu1 %2264 }
0x1029   :  { %v2271_v51 = vmul.f32 %v4239_v28, %v2265_v2 }
0x102b   :  { %v2273_v0 = vadd.f32 %v2271_v51, %v2261_v17 }
0x102d   :  { %v2285_v33 = vadd.f32 %v2283_v35, %v2273_v0  ;;  %v2281_v37 = vpop.permute.xlu1 %2280 }
0x102e   :  { %v2284_v41 = vmul.f32 %v4260_v46, %v2281_v37 }
0x102f   :  { %v2364_v48 = vadd.f32 %v2363_v25, %v2285_v33 }
0x1030   :  { %v2286_v26 = vadd.f32 %v2284_v41, %v2274_v34 }
0x1031   :  { %v2372_v63 = vadd.f32 %v2364_v48, %v4264_v56 }
0x1032   :  { %v2369_v38 = vadd.f32 %v3432_v18, %v2286_v26  ;;  %v2770_v26 = vld [vmem:[#allocation16 + $0x38] sm:$0xff] }
0x1033   :  { %v2374_v43 = vsel %vm267_vm5, %v2372_v63, -inf }
0x1034   :  { %2375 = vmax.xlane.f32.xlu1 %v2374_v43  ;;  %v2373_v44 = vadd.f32 %v2369_v38, %v4268_v62  ;;  %v2058_v62 = vrot.slane %v4670_v16, %v4516_v13  ;;  %v2768_v43 = vld [vmem:[#allocation16 + $0x28] sm:$0xff] }
0x1036   :  { %v2377_v30 = vsel %vm267_vm5, %v2373_v44, -inf  ;;  %v2143_v14 = vadd.f32 %v4676_v53, %v2058_v62 }
0x1037   :  { %2378 = vmax.xlane.f32.xlu0 %v2377_v30  ;;  %v2767_v30 = vld [vmem:[#allocation16 + $0x20] sm:$0xff] }
0x10bd   :  { %v2376_v1 = vpop.xlane.xlu1 %2375 }
0x10be   :  { %v2380_v19 = vsub.f32 %v2372_v63, %v2376_v1  ;;  %v2769_v63 = vld [vmem:[#allocation16 + $0x30] sm:$0xff]  ;;  %v2766_v1 = vld [vmem:[#allocation16 + $0x18] sm:$0xff] }
0x10c0   :  { %v2382_v49 = vmul.f32 1.442695, %v2380_v19  ;;  %v2379_v58 = vpop.xlane.xlu0 %2378 }
0x10c1   :  { %v2381_v60 = vsub.f32 %v2373_v44, %v2379_v58 }
0x10c2   :  { %3655 = vpow2.f32 %v2382_v49  ;;  %v2765_v49 = vld [vmem:[#allocation16 + $0x10] sm:$0xff] }
0x10c3   :  { %v2384_v8 = vmul.f32 1.442695, %v2381_v60  ;;  %v2764_v60 = vld [vmem:[#allocation16 + $0x8] sm:$0xff] }
0x10c5   :  { %3657 = vpow2.f32 %v2384_v8  ;;  %v2433_v8 = vrot.slane %v4661_v40, %v4513_v9 }
0x10cf   :  { %v3656_v61 = vpop.eup %3655 }
0x10d0   :  { %v2386_v56 = vsel %vm267_vm5, %v3656_v61, 0.0 }
0x10d1   :  { %2387 = vadd.xlane.f32.xlu0 %v2386_v56  ;;  %v2449_v56 = vrot.slane %v4661_v40, %v673_v24 }
0x10d2   :  { %v3658_v4 = vpop.eup %3657 }
0x10d3   :  { %v2389_v7 = vsel %vm267_vm5, %v3658_v4, 0.0 }
0x10d4   :  { %2390 = vadd.xlane.f32.xlu1 %v2389_v7 }
0x10e5   :  { %2462 = vrot.lane.b32.xlu1 %v4674_v45, %s3997_s7 }
0x10e7   :  { %2464 = vrot.lane.b32.xlu0 %v4680_v59, %s3997_s7 }
0x10e9   :  { %2555 = vrot.lane.b32.xlu1 %v2143_v14, %s4008_s10 }
0x10eb   :  { %2553 = vrot.lane.b32.xlu0 %v4674_v45, %s4008_s10 }
0x115a   :  { %v2388_v3 = vpop.xlane.xlu0 %2387 }
0x115b   :  { %v2392_v10 = vmax.f32 %v2388_v3, 1e-20 }
0x115d   :  { %3659 = vrcp.f32 %v2392_v10  ;;  %v2391_v6 = vpop.xlane.xlu1 %2390 }
0x115e   :  { %v2393_v20 = vmax.f32 %v2391_v6, 1e-20  ;;  %v2465_v16 = vpop.permute.xlu0 %2464 }
0x115f   :  { %3433 = vmatprep.subr.mxu0 %v2465_v16 }
0x1160   :  { %3661 = vrcp.f32 %v2393_v20  ;;  %3434 = vmatpush3.msra.mxu0 %v2465_v16 }
0x1161   :  { %v2463_v22 = vpop.permute.xlu1 %2462 }
0x1162   :  { %3435 = vmatprep.subr.mxu0 %v2463_v22  ;;  %v2554_v41 = vpop.permute.xlu0 %2553 }
0x1163   :  { %3436 = vmatpush3.msra.mxu0 %v2463_v22 }
0x1164   :  { %3440 = vmatprep.subr.mxu0 %v4004_v42 }
0x1165   :  { %v4761_v34 = vpop.permute.xlu1 %2555 }
0x116a   :  { %v3660_v53 = vpop.eup %3659 }
0x116b   :  { %v2396_v57 = vmul.f32 %v3660_v53, %v3656_v61  ;;  %v2441_v61 = vrot.slane %v4661_v40, %v4516_v13 }
0x116d   :  { %v3662_v5 = vpop.eup %3661  ;;  %3437 = vmatprep.mubr.msk.f32.mxu0 %vm267_vm5, %v2396_v57  ;;  %v2400_v18 = vmul.f32 %v4229_v23, %v2396_v57  ;;  %v2404_v23 = vmul.f32 %v4256_v39, %v2396_v57 }
0x116e   :  { %v2397_v45 = vmul.f32 %v3662_v5, %v3658_v4 }
0x116f   :  { %v2412_v35 = vsel %vm267_vm5, %v2400_v18, 0.0  ;;  %v2424_v37 = vsel %vm267_vm5, %v2404_v23, 0.0 }
0x1170   :  { %3438 = vmatmul.mubr.msk.f32.vlgmr.msra.gmra.mxu0 %vm267_vm5, %v2397_v45  ;;  %v2401_v21 = vmul.f32 %v4247_v31, %v2397_v45  ;;  %v2399_v11 = vmul.f32 %v4249_v32, %v2397_v45  ;;  %v2403_v51 = vmul.f32 %v4252_v36, %v2397_v45  ;;  %v2405_v0 = vmul.f32 %v4260_v46, %v2397_v45  ;;  %v2148_v46 = vpop.f32.mrf.mxu1 }
0x1171   :  { %v2402_v31 = vmul.f32 %v4239_v28, %v2396_v57  ;;  %v2398_v36 = vmul.f32 %v4237_v27, %v2396_v57  ;;  %v4746_v28 = vld [vmem:[%s4880_s22] sm:$0xff]  ;;  %v2149_v27 = vadd.f32 %v2148_v46, %v2058_v62  ;;  %3444 = vmatprep.mubr.msk.f32.mxu0 %vm4010_vm11, %v4004_v42 }
0x1172   :  { %v2415_v2 = vsel %vm267_vm5, %v2401_v21, 0.0  ;;  %v2409_v17 = vsel %vm267_vm5, %v2399_v11, 0.0  ;;  %v2421_v12 = vsel %vm267_vm5, %v2403_v51, 0.0  ;;  %v2427_v32 = vsel %vm267_vm5, %v2405_v0, 0.0 }
0x1173   :  { %2416 = vadd.xlane.f32.xlu1 %v2415_v2  ;;  %2410 = vadd.xlane.f32.xlu0 %v2409_v17  ;;  %v2418_v15 = vsel %vm267_vm5, %v2402_v31, 0.0  ;;  %v2406_v33 = vsel %vm267_vm5, %v2398_v36, 0.0  ;;  %v2705_v39 = vrot.slane %v4746_v28, %v4513_v9  ;;  %v2716_v25 = vrot.slane %v4746_v28, %v4516_v13 }
0x1174   :  { %v2457_v9 = vrot.slane %v4661_v40, %v681_v29 }
0x1177   :  { %2422 = vadd.xlane.f32.xlu1 %v2421_v12  ;;  %2413 = vadd.xlane.f32.xlu0 %v2412_v35  ;;  %v2562_v35 = vsel %vm2561_vm12, %v2554_v41, %v4761_v34 }
0x117b   :  { %2428 = vadd.xlane.f32.xlu1 %v2427_v32  ;;  %2419 = vadd.xlane.f32.xlu0 %v2418_v15 }
0x117f   :  { %2407 = vadd.xlane.f32.xlu1 %v2406_v33  ;;  %2425 = vadd.xlane.f32.xlu0 %v2424_v37 }
0x1190   :  { %2557 = vrot.lane.b32.xlu1 %v4680_v59, %s4008_s10  ;;  %v2771_v59 = vld [vmem:[#allocation16 + $0x40] sm:$0xff] }
0x1191   :  { %3469 = vmatpush3.msra.mxu1 %v2771_v59 }
0x1192   :  { %3470 = vmatprep.subr.mxu1 %v4004_v42 }
0x1193   :  { %3471 = vmatpush3.msra.mxu1 %v2770_v26 }
0x1194   :  { %2616 = vrot.lane.b32.xlu1 %v4654_v55, %s4009_s13  ;;  %v2696_v55 = vsel %vm267_vm5, %v4746_v28, 0.0  ;;  %3472 = vmatprep.subr.mxu1 %v4004_v42 }
0x1195   :  { %2559 = vrot.lane.b32.xlu0 %v2149_v27, %s4008_s10  ;;  %3473 = vmatpush3.msra.mxu1 %v2769_v63 }
0x1196   :  { %3474 = vmatprep.subr.mxu1 %v4004_v42 }
0x1197   :  { %3475 = vmatpush3.msra.mxu1 %v2768_v43 }
0x1198   :  { %2707 = vbcast.lane.b32.xlu1 %v2705_v39, 256  ;;  %3476 = vmatprep.subr.mxu1 %v4004_v42 }
0x1199   :  { %2614 = vrot.lane.b32.xlu0 %v4651_v52, %s4009_s13  ;;  %3477 = vmatpush3.msra.mxu1 %v2767_v30 }
0x119a   :  { %3478 = vmatprep.subr.mxu1 %v4004_v42 }
0x119b   :  { %3479 = vmatpush3.msra.mxu1 %v2766_v1 }
0x119c   :  { %2718 = vbcast.lane.b32.xlu1 %v2716_v25, 256  ;;  %3480 = vmatprep.subr.mxu1 %v4004_v42 }
0x119d   :  { %2711 = vbcast.lane.b32.xlu0 %v2705_v39, 264  ;;  %3481 = vmatpush3.msra.mxu1 %v2765_v49 }
0x119e   :  { %3482 = vmatprep.subr.mxu1 %v4004_v42 }
0x119f   :  { %3483 = vmatpush3.msra.mxu1 %v2764_v60 }
0x11a0   :  { %3484 = vmatprep.subr.mxu1 %v4004_v42 }
0x11a1   :  { %2722 = vbcast.lane.b32.xlu0 %v2716_v25, 264 }
0x11c0   :  { %2697 = vadd.xlane.f32.xlu1 %v2696_v55 }
0x11fc   :  { %v2417_v52 = vpop.xlane.xlu1 %2416  ;;  %v2411_v38 = vpop.xlane.xlu0 %2410 }
0x11fd   :  { %v2435_v62 = vmul.f32 %v2433_v8, %v2411_v38  ;;  %v2443_v14 = vmul.f32 %v2441_v61, %v2417_v52 }
0x11ff   :  { %v2445_v6 = vadd.f32 %v2443_v14, %v2435_v62 }
0x1200   :  { %v2423_v48 = vpop.xlane.xlu1 %2422  ;;  %v2414_v19 = vpop.xlane.xlu0 %2413 }
0x1201   :  { %v2442_v3 = vmul.f32 %v2441_v61, %v2414_v19  ;;  %v2451_v13 = vmul.f32 %v2449_v56, %v2423_v48 }
0x1203   :  { %v2453_v53 = vadd.f32 %v2451_v13, %v2445_v6 }
0x1204   :  { %v2429_v44 = vpop.xlane.xlu1 %2428  ;;  %v2420_v4 = vpop.xlane.xlu0 %2419 }
0x1205   :  { %v2450_v20 = vmul.f32 %v2449_v56, %v2420_v4  ;;  %v2459_v16 = vmul.f32 %v2457_v9, %v2429_v44  ;;  %v3202_v4 = vld [vmem:[#allocation14] ss:$0 sm:$0xff] }
0x1207   :  { %v2461_v5 = vadd.f32 %v2459_v16, %v2453_v53 }
0x1208   :  { %v2408_v58 = vpop.xlane.xlu1 %2407  ;;  %v2426_v22 = vpop.xlane.xlu0 %2425 }
0x1209   :  { %v2434_v7 = vmul.f32 %v2433_v8, %v2408_v58  ;;  %v2458_v57 = vmul.f32 %v2457_v9, %v2426_v22  ;;  %v3201_v8 = vld [vmem:[#allocation13] ss:$0 sm:$0xff] }
0x120b   :  { %v2444_v10 = vadd.f32 %v2442_v3, %v2434_v7 }
0x120c   :  { %v2560_v21 = vpop.permute.xlu0 %2559  ;;  %v2558_v11 = vpop.permute.xlu1 %2557 }
0x120d   :  { %v2452_v24 = vadd.f32 %v2450_v20, %v2444_v10  ;;  %v2563_v40 = vsel %vm2561_vm12, %v2558_v11, %v2560_v21 }
0x120f   :  { %v2460_v17 = vadd.f32 %v2458_v57, %v2452_v24 }
0x1210   :  { %v2615_v1 = vpop.permute.xlu0 %2614  ;;  %v2617_v19 = vpop.permute.xlu1 %2616 }
0x1214   :  { %v2712_v49 = vpop.permute.xlu0 %2711  ;;  %v2708_v58 = vpop.permute.xlu1 %2707 }
0x1215   :  { %vm2725_vm13 = vcmp.gt.f32.partialorder %v2712_v49, 0.0  ;;  %vm2724_vm14 = vcmp.gt.f32.partialorder %v2708_v58, 0.0  ;;  %v3035_v58 = vld [vmem:[#allocation22 + $0x60] sm:$0xff] }
0x1218   :  { %v2723_v7 = vpop.permute.xlu0 %2722  ;;  %v2719_v3 = vpop.permute.xlu1 %2718 }
0x1219   :  { %vm2743_vm15 = vcmp.gt.f32.partialorder %v2723_v7, 0.0  ;;  %vm2742_vm2 = vcmp.gt.f32.partialorder %v2719_v3, 0.0  ;;  %v3030_v7 = vld [vmem:[#allocation22 + $0x38] sm:$0xff] }
0x1230   :  { %v3439_v45 = vpop.f32.mrf.mxu0 }
0x1231   :  { %v2546_v2 = vadd.f32 %v3439_v45, %v2461_v5  ;;  %v2780_v45 = vld [vmem:[#allocation17 + $0x40] sm:$0xff] }
0x1232   :  { %v2540_v51 = vpop.f32.mrf.mxu0 }
0x1233   :  { %v2550_v47 = vmul.f32 %v4636_v50, %v2546_v2  ;;  %v2541_v29 = vadd.f32 %v2540_v51, %v2460_v17  ;;  %v2779_v17 = vld [vmem:[#allocation17 + $0x38] sm:$0xff] }
0x1235   :  { %v2567_v18 = vadd.f32 %v2563_v40, %v2550_v47  ;;  %v2549_v12 = vmul.f32 %v4643_v54, %v2541_v29  ;;  %v2778_v29 = vld [vmem:[#allocation17 + $0x30] sm:$0xff] }
0x1237   :  { %v2566_v0 = vadd.f32 %v2562_v35, %v2549_v12  ;;  %v2569_v31 = vsel %vm2061_vm10, %v2567_v18, 0.0  ;;  %v2777_v12 = vld [vmem:[#allocation17 + $0x28] sm:$0xff] }
0x1239   :  { %v2568_v32 = vsel %vm2061_vm10, %v2566_v0, 0.0 }
0x123a   :  { %v2570_v15 = vadd.f32 %v2569_v31, %v2568_v32 }
0x123c   :  { %v2571_v36 = vrot.slane %v2570_v15, 4 }
0x123e   :  { %v2572_v23 = vadd.f32 %v2571_v36, %v2570_v15  ;;  %v2775_v15 = vld [vmem:[#allocation17 + $0x18] sm:$0xff] }
0x1240   :  { %v2573_v33 = vrot.slane %v2572_v23, 2 }
0x1242   :  { %v2574_v37 = vadd.f32 %v2573_v33, %v2572_v23  ;;  %v2774_v33 = vld [vmem:[#allocation17 + $0x10] sm:$0xff] }
0x1244   :  { %v2575_v46 = vrot.slane %v2574_v37, 1 }
0x1246   :  { %v2576_v27 = vadd.f32 %v2575_v46, %v2574_v37 }
0x1248   :  { %v2577_v50 = vmul.f32 0.0625, %v2576_v27  ;;  %v2773_v27 = vld [vmem:[#allocation17 + $0x8] sm:$0xff] }
0x124a   :  { %v2578_v39 = vsub.f32 %v2566_v0, %v2577_v50  ;;  %v2579_v25 = vsub.f32 %v2567_v18, %v2577_v50  ;;  %v2776_v0 = vld [vmem:[#allocation17 + $0x20] sm:$0xff] }
0x124b   :  { %v2772_v50 = vld [vmem:[#allocation17] sm:$0xff] }
0x124c   :  { %v2580_v55 = vmul.f32 %v2578_v39, %v2578_v39  ;;  %v2581_v59 = vmul.f32 %v2579_v25, %v2579_v25 }
0x124e   :  { %v2582_v54 = vsel %vm2061_vm10, %v2580_v55, 0.0  ;;  %v2583_v34 = vsel %vm2061_vm10, %v2581_v59, 0.0  ;;  %v2934_v59 = vld [vmem:[#allocation19 + $0x38] sm:$0xff] }
0x124f   :  { %v2584_v52 = vadd.f32 %v2583_v34, %v2582_v54  ;;  %v2933_v54 = vld [vmem:[#allocation19 + $0x30] sm:$0xff]  ;;  %v2932_v34 = vld [vmem:[#allocation19 + $0x28] sm:$0xff] }
0x1251   :  { %v2585_v41 = vrot.slane %v2584_v52, 4 }
0x1253   :  { %v2586_v48 = vadd.f32 %v2585_v41, %v2584_v52  ;;  %v2931_v52 = vld [vmem:[#allocation19 + $0x20] sm:$0xff]  ;;  %v2930_v41 = vld [vmem:[#allocation19 + $0x18] sm:$0xff] }
0x1255   :  { %v2587_v26 = vrot.slane %v2586_v48, 2 }
0x1257   :  { %v2588_v63 = vadd.f32 %v2587_v26, %v2586_v48  ;;  %v2929_v48 = vld [vmem:[#allocation19 + $0x10] sm:$0xff] }
0x1258   :  { %v2763_v26 = vld [vmem:[#allocation16] sm:$0xff] }
0x1259   :  { %v2589_v38 = vrot.slane %v2588_v63, 1  ;;  %3485 = vmatpush3.msra.mxu1 %v2763_v26 }
0x125a   :  { %3510 = vmatprep.subr.mxu1 %v4004_v42 }
0x125b   :  { %v2590_v43 = vadd.f32 %v2589_v38, %v2588_v63  ;;  %v2928_v63 = vld [vmem:[#allocation19 + $0x8] sm:$0xff]  ;;  %v2927_v38 = vld [vmem:[#allocation19] sm:$0xff] }
0x125d   :  { %v2591_v44 = vmul.f32 0.0625, %v2590_v43  ;;  %v2698_v43 = vpop.xlane.xlu1 %2697 }
0x125f   :  { %v2592_v30 = vadd.f32 1e-05, %v2591_v44  ;;  %v2699_v44 = vmax.f32 %v2698_v43, 1.0 }
0x1261   :  { %3663 = vrsqrt.f32 %v2592_v30 }
0x1262   :  { %3665 = vrcp.f32 %v2699_v44 }
0x126e   :  { %v3664_v60 = vpop.eup %3663 }
0x126f   :  { %v2594_v61 = vmul.f32 %v3664_v60, %v2578_v39  ;;  %v2595_v56 = vmul.f32 %v3664_v60, %v2579_v25  ;;  %v2935_v25 = vld [vmem:[#allocation19 + $0x40] sm:$0xff]  ;;  %v3666_v30 = vpop.eup %3665 }
0x1271   :  { %v2604_v62 = vmul.f32 %v3201_v8, %v2595_v56  ;;  %v2603_v14 = vmul.f32 %v3201_v8, %v2594_v61  ;;  %v3034_v8 = vld [vmem:[#allocation22 + $0x58] sm:$0xff]  ;;  %v3033_v61 = vld [vmem:[#allocation22 + $0x50] sm:$0xff]  ;;  %v3032_v56 = vld [vmem:[#allocation22 + $0x48] sm:$0xff] }
0x1273   :  { %v2613_v9 = vadd.f32 %v3202_v4, %v2604_v62  ;;  %v2612_v13 = vadd.f32 %v3202_v4, %v2603_v14  ;;  %v3031_v4 = vld [vmem:[#allocation22 + $0x40] sm:$0xff]  ;;  %v3029_v62 = vld [vmem:[#allocation22 + $0x30] sm:$0xff]  ;;  %v3028_v14 = vld [vmem:[#allocation22 + $0x28] sm:$0xff] }
0x1275   :  { %v2621_v10 = vsel %vm2061_vm10, %v2613_v9, %v2617_v19  ;;  %v2620_v6 = vsel %vm2061_vm10, %v2612_v13, %v2615_v1  ;;  %v3036_v1 = vld [vmem:[#allocation22 + $0x68] sm:$0xf]  ;;  %v3027_v13 = vld [vmem:[#allocation22 + $0x20] sm:$0xff] }
0x1276   :  { %v2731_v20 = vsel %vm2725_vm13, %v2621_v10, -1e+30  ;;  %v2730_v16 = vsel %vm2724_vm14, %v2620_v6, -1e+30  ;;  %v2749_v22 = vsel %vm2743_vm15, %v2621_v10, -1e+30  ;;  %3441 = vmatpush3.msra.mxu0 %v2621_v10 }
0x1277   :  { %v2734_v53 = vsel %vm2732_vm1, %v2731_v20, -inf  ;;  %v2733_v24 = vsel %vm2732_vm1, %v2730_v16, -inf  ;;  %v2751_v57 = vsel %vm2732_vm1, %v2749_v22, -inf  ;;  %v2748_v5 = vsel %vm2742_vm2, %v2620_v6, -1e+30  ;;  %3442 = vmatprep.subr.mxu0 %v4004_v42  ;;  %v3026_v10 = vld [vmem:[#allocation22 + $0x18] sm:$0xff] }
0x1278   :  { %v2735_v21 = vmax.f32 %v2733_v24, %v2734_v53  ;;  %v2750_v11 = vsel %vm2732_vm1, %v2748_v5, -inf  ;;  %3443 = vmatpush3.msra.mxu0 %v2620_v6  ;;  %v3025_v6 = vld [vmem:[#allocation22 + $0x10] sm:$0xff]  ;;  %v3024_v20 = vld [vmem:[#allocation22 + $0x8] sm:$0xff]  ;;  %v3023_v16 = vld [vmem:[#allocation22] sm:$0xff] }
0x1279   :  { %v2752_v2 = vmax.f32 %v2750_v11, %v2751_v57  ;;  %3445 = vmatmul.mubr.msk.f32.vlgmr.msra.gmra.mxu0 %vm267_vm5, %v4746_v28  ;;  %3447 = vmatprep.subr.mxu0 %v4004_v42  ;;  %v3207_v5 = vld [vmem:[#allocation20] ss:$0 sm:$0xff]  ;;  %vm3044_vm5 = vcmask 883712  }
0x127a   :  { %v2736_v51 = vrot.slane %v2735_v21, 4  ;;  %3448 = vmatpush3.msra.mxu0 %v2780_v45  ;;  %3465 = vmatprep.mubr.msk.f32.mxu0 %vm4010_vm11, %v4004_v42 }
0x127b   :  { %v2753_v47 = vrot.slane %v2752_v2, 4  ;;  %3449 = vmatprep.subr.mxu0 %v4004_v42 }
0x127c   :  { %v2737_v40 = vmax.f32 %v2735_v21, %v2736_v51  ;;  %3450 = vmatpush3.msra.mxu0 %v2779_v17  ;;  %v3020_v21 = vstv %s4865_s20 }
0x127d   :  { %v2754_v18 = vmax.f32 %v2752_v2, %v2753_v47  ;;  %3451 = vmatprep.subr.mxu0 %v4004_v42  ;;  %v3208_v47 = vld [vmem:[#allocation23] ss:$0 sm:$0xff] }
0x127e   :  { %v2738_v35 = vrot.slane %v2737_v40, 2  ;;  %3452 = vmatpush3.msra.mxu0 %v2778_v29 }
0x127f   :  { %v2755_v28 = vrot.slane %v2754_v18, 2  ;;  %3453 = vmatprep.subr.mxu0 %v4004_v42 }
0x1280   :  { %v2739_v31 = vmax.f32 %v2737_v40, %v2738_v35  ;;  %3454 = vmatpush3.msra.mxu0 %v2777_v12 }
0x1281   :  { %v2756_v32 = vmax.f32 %v2754_v18, %v2755_v28  ;;  %3455 = vmatprep.subr.mxu0 %v4004_v42 }
0x1282   :  { %v2740_v36 = vrot.slane %v2739_v31, 1  ;;  %3456 = vmatpush3.msra.mxu0 %v2776_v0 }
0x1283   :  { %v2757_v23 = vrot.slane %v2756_v32, 1  ;;  %3457 = vmatprep.subr.mxu0 %v4004_v42 }
0x1284   :  { %v2741_v37 = vmax.f32 %v2739_v31, %v2740_v36  ;;  %3458 = vmatpush3.msra.mxu0 %v2775_v15 }
0x1285   :  { %v2758_v46 = vmax.f32 %v2756_v32, %v2757_v23  ;;  %3459 = vmatprep.subr.mxu0 %v4004_v42 }
0x1286   :  { %3460 = vmatpush3.msra.mxu0 %v2774_v33 }
0x1287   :  { %3461 = vmatprep.subr.mxu0 %v4004_v42  ;;  %v2760_v39 = vsel %vm2759_vm3, %v2741_v37, %v2758_v46 }
0x1288   :  { %3462 = vmatpush3.msra.mxu0 %v2773_v27  ;;  %v2762_v55 = vsel %vm2761_vm4, %v2760_v39, 0.0 }
0x1289   :  { %3463 = vmatprep.subr.mxu0 %v4004_v42 }
0x128a   :  { %3464 = vmatpush3.msra.mxu0 %v2772_v50 }
0x128b   :  { %3466 = vmatmul.mubr.msk.f32.vlgmr.msra.gmra.mxu0 %vm2732_vm1, %v2762_v55  ;;  %3489 = vmatprep.subr.mxu0 %v4004_v42 }
0x128c   :  { %3490 = vmatpush3.msra.mxu0 %v2935_v25  ;;  %3507 = vmatprep.mubr.msk.f32.mxu0 %vm4010_vm11, %v4004_v42 }
0x128d   :  { %3491 = vmatprep.subr.mxu0 %v4004_v42 }
0x128e   :  { %3492 = vmatpush3.msra.mxu0 %v2934_v59 }
0x128f   :  { %3493 = vmatprep.subr.mxu0 %v4004_v42 }
0x1290   :  { %3494 = vmatpush3.msra.mxu0 %v2933_v54 }
0x1291   :  { %3495 = vmatprep.subr.mxu0 %v4004_v42 }
0x1292   :  { %3496 = vmatpush3.msra.mxu0 %v2932_v34 }
0x1293   :  { %3497 = vmatprep.subr.mxu0 %v4004_v42 }
0x1294   :  { %3498 = vmatpush3.msra.mxu0 %v2931_v52 }
0x1295   :  { %3499 = vmatprep.subr.mxu0 %v4004_v42 }
0x1296   :  { %3500 = vmatpush3.msra.mxu0 %v2930_v41 }
0x1297   :  { %3501 = vmatprep.subr.mxu0 %v4004_v42 }
0x1298   :  { %3502 = vmatpush3.msra.mxu0 %v2929_v48 }
0x1299   :  { %3503 = vmatprep.subr.mxu0 %v4004_v42 }
0x129a   :  { %3504 = vmatpush3.msra.mxu0 %v2928_v63 }
0x129b   :  { %3505 = vmatprep.subr.mxu0 %v4004_v42 }
0x129c   :  { %3506 = vmatpush3.msra.mxu0 %v2927_v38 }
0x1339   :  { %v2692_v19 = vpop.f32.mrf.mxu0 }
0x133a   :  { %v2701_v49 = vmul.f32 %v3666_v30, %v2692_v19  ;;  %3487 = vmatmul.mubr.msk.f32.vlgmr.msra.gmra.mxu1 %vm2732_vm1, %v2692_v19 }
0x133b   :  { %v3446_v60 = vpop.f32.mrf.mxu0  ;;  %3511 = vmatpush3.msk.msra.mxu1 %vm296_vm0, %v3036_v1  ;;  %3538 = vmatprep.mubr.msk.f32.mxu1 %vm4010_vm11, %v4004_v42 }
0x133c   :  { %3508 = vmatmul.mubr.msk.f32.vlgmr.msra.gmra.mxu0 %vm2732_vm1, %v2701_v49  ;;  %3512 = vmatprep.subr.mxu1 %v4004_v42 }
0x133d   :  { %3513 = vmatpush3.msra.mxu1 %v3035_v58 }
0x133e   :  { %3514 = vmatprep.subr.mxu1 %v4004_v42 }
0x133f   :  { %3515 = vmatpush3.msra.mxu1 %v3034_v8 }
0x1340   :  { %3516 = vmatprep.subr.mxu1 %v4004_v42 }
0x1341   :  { %3517 = vmatpush3.msra.mxu1 %v3033_v61 }
0x1342   :  { %3518 = vmatprep.subr.mxu1 %v4004_v42 }
0x1343   :  { %3519 = vmatpush3.msra.mxu1 %v3032_v56 }
0x1344   :  { %3520 = vmatprep.subr.mxu1 %v4004_v42 }
0x1345   :  { %3521 = vmatpush3.msra.mxu1 %v3031_v4 }
0x1346   :  { %3522 = vmatprep.subr.mxu1 %v4004_v42 }
0x1347   :  { %3523 = vmatpush3.msra.mxu1 %v3030_v7 }
0x1348   :  { %3524 = vmatprep.subr.mxu1 %v4004_v42 }
0x1349   :  { %3525 = vmatpush3.msra.mxu1 %v3029_v62 }
0x134a   :  { %3526 = vmatprep.subr.mxu1 %v4004_v42 }
0x134b   :  { %v2850_v3 = vpop.f32.mrf.mxu0  ;;  %3527 = vmatpush3.msra.mxu1 %v3028_v14 }
0x134c   :  { %3528 = vmatprep.subr.mxu1 %v4004_v42 }
0x134d   :  { %v3467_v9 = vpop.f32.mrf.mxu0  ;;  %3529 = vmatpush3.msra.mxu1 %v3027_v13 }
0x134e   :  { %3530 = vmatprep.subr.mxu1 %v4004_v42 }
0x134f   :  { %3531 = vmatpush3.msra.mxu1 %v3026_v10 }
0x1350   :  { %3532 = vmatprep.subr.mxu1 %v4004_v42 }
0x1351   :  { %3533 = vmatpush3.msra.mxu1 %v3025_v6 }
0x1352   :  { %3534 = vmatprep.subr.mxu1 %v4004_v42 }
0x1353   :  { %3535 = vmatpush3.msra.mxu1 %v3024_v20 }
0x1354   :  { %3536 = vmatprep.subr.mxu1 %v4004_v42 }
0x1355   :  { %3537 = vmatpush3.msra.mxu1 %v3023_v16 }
0x13fa   :  { %v2923_v22 = vpop.f32.mrf.mxu1 }
0x13fb   :  { %v2924_v53 = vadd.f32 %v2923_v22, %v2850_v3 }
0x13fc   :  { %v3488_v24 = vpop.f32.mrf.mxu1  ;;  %v3005_v57 = vpop.f32.mrf.mxu0 }
0x13fd   :  { %v3009_v45 = vadd.f32 %v3005_v57, %v2924_v53 }
0x13fe   :  { %v3509_v11 = vpop.f32.mrf.mxu0 }
0x13ff   :  { %v3017_v2 = vadd.f32 %v3207_v5, %v3009_v45 }
0x1401   :  { %vm3019_vm0 = vcmp.gt.f32.partialorder %v3017_v2, 0.0  ;;  %v3021_v17 = vmul.f32 %v3020_v21, %v3017_v2 }
0x1403   :  { %v3022_v51 = vsel %vm3019_vm0, %v3017_v2, %v3021_v17 }
0x1404   :  { %3539 = vmatmul.mubr.msk.f32.vlgmr.msra.gmra.mxu1 %vm3044_vm5, %v3022_v51 }
0x14c4   :  { %v3117_v42 = vpop.f32.mrf.mxu1 }
0x14c5   :  { %v3118_v29 = vadd.f32 %v3208_v47, %v3117_v42 }
0x14c6   :  { %v3540_v40 = vpop.f32.mrf.mxu1 }
0x14c7   :  { %3121 = vmax.xlane.f32.xlu0 %v3118_v29 }
0x1550   :  { %v3122_v18 = vpop.xlane.xlu0 %3121 }
0x1551   :  { %v3123_v12 = vsub.f32 %v3118_v29, %v3122_v18 }
0x1553   :  { %v3124_v35 = vmul.f32 1.442695, %v3123_v12 }
0x1555   :  { %3667 = vpow2.f32 %v3124_v35 }
0x1562   :  { %v3668_v28 = vpop.eup %3667 }
0x1563   :  { %3126 = vadd.xlane.f32.xlu0 %v3668_v28 }
0x15ec   :  { %v3127_v0 = vpop.xlane.xlu0 %3126 }
0x15ed   :  { %3669 = vlog2.f32 %v3127_v0 }
0x15fa   :  { %v3670_v31 = vpop.eup %3669 }
0x15fb   :  { %v3129_v32 = vmul.f32 0.6931472, %v3670_v31 }
0x15fd   :  { %v3130_v15 = vsub.f32 %v3123_v12, %v3129_v32 }
0x15ff   :  { %3131 = vst [vmem:[%s4866_s21] sm:$0xff] %v3130_v15 }
0x1600   :  { %3136 = vsyncpa [#allocation4], 1 }
0x1601   :  { %3137 = vsyncpa [#allocation6], 1 }
0x1602   :  { %3138 = vsyncpa [#allocation9], 1 }
0x1603   :  { %3139 = vsyncpa [#allocation12], 1 }
0x1604   :  { %3140 = vsyncpa [#allocation15], 1 }
0x1605   :  { %3141 = vsyncpa [#allocation18], 1 }
0x1606   :  { %3142 = vsyncpa [#allocation21], 1 }
0x1607   :  { %3143 = vsyncpa [#allocation24], 1 }

</bundles_post_ra>
